<compile_context>
chip_gen: v7x
topology: tpu7x:2x2x1
jax: 0.10.0
libtpu: 0.0.40
codegen_flags: <defaults>
</compile_context>

<pallas_src>
import math

import jax
import jax.numpy as jnp
from jax.experimental import pallas as pl
from jax.experimental.pallas import tpu as pltpu

NHID = 2048       # nhid == emsize == 2048 in the module
NCLASSES = 128    # small "nclasses" (lane-aligned)


def _detect_v7x():
    """True if the local chip has 2 TensorCores (v7x); best-effort, safe fallback."""
    try:
        return "v7" in jax.devices()[0].device_kind.lower()
    except Exception:  # pragma: no cover - conservative default
        return False


def _vmlp_kernel_acc(x_ref, w1_ref, b1_ref, w2_ref, b2_ref, out_ref):
    """Single-TC variant: output is resident across the N-split grid axis and
    accumulated in-kernel (decoder bias folded in at step 0).

      x_ref  : (B, 2048)             bf16
      w1_ref : (2048, NH_HALF)       bf16  (contiguous column slab of W1)
      b1_ref : (1, NH_HALF)          f32
      w2_ref : (NH_HALF, NCLASSES)   bf16  (matching row slab of W2)
      b2_ref : (1, NCLASSES)         f32
      out_ref: (B, NCLASSES)         f32   (resident accumulator)
    """
    z = jnp.dot(x_ref[...], w1_ref[...], preferred_element_type=jnp.float32)
    h = jax.nn.sigmoid(z + b1_ref[...])
    y = jnp.dot(h.astype(jnp.bfloat16), w2_ref[...],
                preferred_element_type=jnp.float32)

    @pl.when(pl.program_id(0) == 0)
    def _():
        out_ref[...] = y + b2_ref[...]

    @pl.when(pl.program_id(0) != 0)
    def _():
        out_ref[...] += y


def _vmlp_kernel_par(x_ref, w1_ref, b1_ref, w2_ref, b2_ref, out_ref):
    """v7x variant: each grid step writes its own partial; b2 is folded into the
    n == 0 partial so the wrapper only sums the partials."""
    z = jnp.dot(x_ref[...], w1_ref[...], preferred_element_type=jnp.float32)
    h = jax.nn.sigmoid(z + b1_ref[...])
    y = jnp.dot(h.astype(jnp.bfloat16), w2_ref[...],
                preferred_element_type=jnp.float32)
    bias = jnp.where(pl.program_id(0) == 0,
                     b2_ref[...], jnp.zeros_like(b2_ref[...]))
    out_ref[...] = y + bias


def make_forward(nsplit, use_parallel_split):
    """Build the jitted forward for a fixed N-split / execution strategy."""
    nh_half = NHID // nsplit

    @jax.jit
    def forward(x_nchw, w1_packed, b1_2d, w2b, b2_2d):
        B = x_nchw.shape[0]
        # --- Front: flatten + slice (tiny glue, plain JAX) ---
        x = x_nchw.reshape(B, -1)[:, :NHID].astype(jnp.bfloat16)

        in_specs = [
            pl.BlockSpec((B, NHID), lambda n: (0, 0)),                 # x (resident)
            pl.BlockSpec((None, NHID, nh_half), lambda n: (n, 0, 0)),  # W1 slab (contiguous)
            pl.BlockSpec((1, nh_half), lambda n: (0, n)),              # b1 slab
            pl.BlockSpec((nh_half, NCLASSES), lambda n: (n, 0)),       # W2 row slab
            pl.BlockSpec((1, NCLASSES), lambda n: (0, 0)),             # b2 (resident)
        ]

        if use_parallel_split:
            # v7x: 2 TCs stream disjoint W1 slabs; 2 steps/core -> pipelined DMA.
            partial = pl.pallas_call(
                _vmlp_kernel_par,
                out_shape=jax.ShapeDtypeStruct((nsplit, B, NCLASSES), jnp.float32),
                grid_spec=pltpu.PrefetchScalarGridSpec(
                    num_scalar_prefetch=0,
                    grid=(nsplit,),
                    in_specs=in_specs,
                    out_specs=pl.BlockSpec((None, B, NCLASSES),
                                           lambda n: (n, 0, 0)),
                ),
                compiler_params=pltpu.CompilerParams(
                    dimension_semantics=("parallel",),
                    vmem_limit_bytes=16 * 1024 * 1024,
                ),
            )(x, w1_packed, b1_2d, w2b, b2_2d)
            # Tiny (nsplit, B, 128) reduction; b2 already folded in at n == 0.
            return partial.sum(axis=0)

        # v5e/v6e: in-kernel accumulation, no partial-output HBM round-trip.
        return pl.pallas_call(
            _vmlp_kernel_acc,
            out_shape=jax.ShapeDtypeStruct((B, NCLASSES), jnp.float32),
            grid_spec=pltpu.PrefetchScalarGridSpec(
                num_scalar_prefetch=0,
                grid=(nsplit,),
                in_specs=in_specs,
                out_specs=pl.BlockSpec((B, NCLASSES), lambda n: (0, 0)),
            ),
            compiler_params=pltpu.CompilerParams(
                dimension_semantics=("arbitrary",),   # reduction axis
                vmem_limit_bytes=32 * 1024 * 1024,
            ),
        )(x, w1_packed, b1_2d, w2b, b2_2d)

    return forward


def init_params(key):
    """Deterministic params, shapes matching torch.nn.Linear, pre-transposed to (in, out)."""
    k1, k2, k3, k4 = jax.random.split(key, 4)
    lim = 1.0 / math.sqrt(NHID)
    w1 = jax.random.uniform(k1, (NHID, NHID), jnp.float32, -lim, lim)       # (in, out)
    b1 = jax.random.uniform(k2, (NHID,), jnp.float32, -lim, lim)
    w2 = jax.random.uniform(k3, (NHID, NCLASSES), jnp.float32, -lim, lim)   # (in, out)
    b2 = jax.random.uniform(k4, (NCLASSES,), jnp.float32, -lim, lim)
    return w1, b1, w2, b2


def pack_params(w1, b1, w2, b2, nsplit):
    """One-time (off the per-call path) bf16 cast + contiguous slab packing of W1."""
    nh_half = NHID // nsplit
    w1_packed = jnp.transpose(
        w1.astype(jnp.bfloat16).reshape(NHID, nsplit, nh_half), (1, 0, 2))
    w2b = w2.astype(jnp.bfloat16)
    b1_2d = b1.reshape(1, NHID)
    b2_2d = b2.reshape(1, NCLASSES)
    packed = (w1_packed, b1_2d, w2b, b2_2d)
    return jax.block_until_ready(jax.device_put(packed))


if __name__ == "__main__":
    is_v7x = _detect_v7x()
    nsplit = 4 if is_v7x else 2
    forward = make_forward(nsplit, use_parallel_split=is_v7x)

    key = jax.random.PRNGKey(0)
    kx, kp = jax.random.split(key)

    # Small NCHW input whose flattened feature count is exactly 2048: (2, 8, 16, 16).
    x = jax.random.normal(kx, (2, 8, 16, 16), jnp.float32)
    w1, b1, w2, b2 = init_params(kp)
    params = pack_params(w1, b1, w2, b2, nsplit)

    out = forward(x, *params)
    jax.block_until_ready(out)

    # --- reference checks ---
    xf = x.reshape(x.shape[0], -1)[:, :NHID]

    # (1) precision-matched reference: bf16 matmul operands, f32 accumulate.
    w1b, w2b = w1.astype(jnp.bfloat16), w2.astype(jnp.bfloat16)
    z = jnp.dot(xf.astype(jnp.bfloat16), w1b, preferred_element_type=jnp.float32) + b1
    h = jax.nn.sigmoid(z)
    ref_bf16 = jnp.dot(h.astype(jnp.bfloat16), w2b,
                       preferred_element_type=jnp.float32) + b2
    assert jnp.allclose(out, ref_bf16, atol=2e-2, rtol=2e-2), "mismatch vs bf16 reference"

    # (2) original f32 module semantics (loose tolerance: weights stored bf16 by choice).
    ref_f32 = jax.nn.sigmoid(xf @ w1 + b1) @ w2 + b2
    assert jnp.allclose(out, ref_f32, atol=5e-2, rtol=5e-2), "mismatch vs f32 reference"

    print("KERNEL_OK")
</pallas_src>

<mosaic_0001>
module attributes {stable_mosaic.version = 11 : i64} {
  func.func @_vmlp_kernel_acc(%arg0: i32, %arg1: memref<2x2048xbf16, #tpu.memory_space<vmem>>, %arg2: memref<1x2048x1024xbf16, #tpu.memory_space<vmem>>, %arg3: memref<1x1024xf32, #tpu.memory_space<vmem>>, %arg4: memref<1024x128xbf16, #tpu.memory_space<vmem>>, %arg5: memref<1x128xf32, #tpu.memory_space<vmem>>, %arg6: memref<2x128xf32, #tpu.memory_space<vmem>>) attributes {dimension_semantics = [#tpu.dimension_semantics<arbitrary>], iteration_bounds = array<i64: 2>, scalar_prefetch = 0 : i64, scratch_operands = 0 : i64, tpu.core_type = #tpu.core_type<tc>, window_params = [{pipeline_mode = #tpu.pipeline_mode<synchronous>, transform_indices = @transform_0, window_bounds = array<i64: 2, 2048>}, {transform_indices = @transform_1, window_bounds = array<i64: 1, 2048, 1024>}, {transform_indices = @transform_2, window_bounds = array<i64: 1, 1024>}, {transform_indices = @transform_3, window_bounds = array<i64: 1024, 128>}, {pipeline_mode = #tpu.pipeline_mode<synchronous>, transform_indices = @transform_4, window_bounds = array<i64: 1, 128>}, {pipeline_mode = #tpu.pipeline_mode<synchronous>, transform_indices = @transform_5, window_bounds = array<i64: 2, 128>}]} {
    %c0 = arith.constant 0 : index
    %c0_0 = arith.constant 0 : index
    %0 = vector.load %arg1[%c0, %c0_0] : memref<2x2048xbf16, #tpu.memory_space<vmem>>, vector<2x2048xbf16>
    %c0_1 = arith.constant 0 : index
    %c0_2 = arith.constant 0 : index
    %c0_3 = arith.constant 0 : index
    %1 = vector.load %arg2[%c0_1, %c0_2, %c0_3] : memref<1x2048x1024xbf16, #tpu.memory_space<vmem>>, vector<1x2048x1024xbf16>
    %2 = vector.shape_cast %1 : vector<1x2048x1024xbf16> to vector<2048x1024xbf16>
    %cst = arith.constant dense<0.000000e+00> : vector<2x1024xf32>
    %3 = tpu.matmul %0, %2, %cst {dimension_numbers = #tpu.dot_dimension_numbers<[1], [0], [0], [1], [0, 0, 1, 1], [], []>} : vector<2x2048xbf16>, vector<2048x1024xbf16>, vector<2x1024xf32> -> vector<2x1024xf32>
    %c0_4 = arith.constant 0 : index
    %c0_5 = arith.constant 0 : index
    %4 = vector.load %arg3[%c0_4, %c0_5] : memref<1x1024xf32, #tpu.memory_space<vmem>>, vector<1x1024xf32>
    %5 = vector.broadcast %4 : vector<1x1024xf32> to vector<2x1024xf32>
    %6 = arith.addf %3, %5 : vector<2x1024xf32>
    %7 = arith.negf %6 : vector<2x1024xf32>
    %8 = math.exp %7 : vector<2x1024xf32>
    %cst_6 = arith.constant 1.000000e+00 : f32
    %9 = vector.broadcast %cst_6 : f32 to vector<2x1024xf32>
    %10 = arith.addf %9, %8 : vector<2x1024xf32>
    %11 = arith.divf %9, %10 : vector<2x1024xf32>
    %12 = arith.truncf %11 : vector<2x1024xf32> to vector<2x1024xbf16>
    %c0_7 = arith.constant 0 : index
    %c0_8 = arith.constant 0 : index
    %13 = vector.load %arg4[%c0_7, %c0_8] : memref<1024x128xbf16, #tpu.memory_space<vmem>>, vector<1024x128xbf16>
    %cst_9 = arith.constant dense<0.000000e+00> : vector<2x128xf32>
    %14 = tpu.matmul %12, %13, %cst_9 {dimension_numbers = #tpu.dot_dimension_numbers<[1], [0], [0], [1], [0, 0, 1, 1], [], []>} : vector<2x1024xbf16>, vector<1024x128xbf16>, vector<2x128xf32> -> vector<2x128xf32>
    %c0_i32 = arith.constant 0 : i32
    %15 = arith.cmpi eq, %arg0, %c0_i32 : i32
    %16 = arith.extui %15 : i1 to i32
    %c0_i32_10 = arith.constant 0 : i32
    %17 = arith.cmpi ne, %16, %c0_i32_10 : i32
    scf.if %17 {
      %c0_13 = arith.constant 0 : index
      %c0_14 = arith.constant 0 : index
      %21 = vector.load %arg5[%c0_13, %c0_14] : memref<1x128xf32, #tpu.memory_space<vmem>>, vector<1x128xf32>
      %22 = vector.broadcast %21 : vector<1x128xf32> to vector<2x128xf32>
      %23 = arith.addf %14, %22 : vector<2x128xf32>
      %c0_15 = arith.constant 0 : index
      %c0_16 = arith.constant 0 : index
      %24 = vector.load %arg6[%c0_15, %c0_16] : memref<2x128xf32, #tpu.memory_space<vmem>>, vector<2x128xf32>
      tpu.vector_store %arg6[%c0_15, %c0_16], %23 {strides = array<i32>} : memref<2x128xf32, #tpu.memory_space<vmem>>, vector<2x128xf32>,
    } else {
    }
    %c0_i32_11 = arith.constant 0 : i32
    %18 = arith.cmpi ne, %arg0, %c0_i32_11 : i32
    %19 = arith.extui %18 : i1 to i32
    %c0_i32_12 = arith.constant 0 : i32
    %20 = arith.cmpi ne, %19, %c0_i32_12 : i32
    scf.if %20 {
      %c0_13 = arith.constant 0 : index
      %c0_14 = arith.constant 0 : index
      %21 = vector.load %arg6[%c0_13, %c0_14] : memref<2x128xf32, #tpu.memory_space<vmem>>, vector<2x128xf32>
      %22 = arith.addf %21, %14 : vector<2x128xf32>
      %c0_15 = arith.constant 0 : index
      %c0_16 = arith.constant 0 : index
      %23 = vector.load %arg6[%c0_15, %c0_16] : memref<2x128xf32, #tpu.memory_space<vmem>>, vector<2x128xf32>
      tpu.vector_store %arg6[%c0_15, %c0_16], %22 {strides = array<i32>} : memref<2x128xf32, #tpu.memory_space<vmem>>, vector<2x128xf32>,
    } else {
    }
    return
  }
  func.func @transform_0(%arg0: i32) -> (i32, i32) {
    %c0_i32 = arith.constant 0 : i32
    %c0_i32_0 = arith.constant 0 : i32
    %c0_i32_1 = arith.constant 0 : i32
    return %c0_i32, %c0_i32_0 : i32, i32
  }
  func.func @transform_1(%arg0: i32) -> (i32, i32, i32) {
    %c0_i32 = arith.constant 0 : i32
    %c0_i32_0 = arith.constant 0 : i32
    %c0_i32_1 = arith.constant 0 : i32
    return %arg0, %c0_i32, %c0_i32_0 : i32, i32, i32
  }
  func.func @transform_2(%arg0: i32) -> (i32, i32) {
    %c0_i32 = arith.constant 0 : i32
    %c0_i32_0 = arith.constant 0 : i32
    return %c0_i32, %arg0 : i32, i32
  }
  func.func @transform_3(%arg0: i32) -> (i32, i32) {
    %c0_i32 = arith.constant 0 : i32
    %c0_i32_0 = arith.constant 0 : i32
    return %arg0, %c0_i32 : i32, i32
  }
  func.func @transform_4(%arg0: i32) -> (i32, i32) {
    %c0_i32 = arith.constant 0 : i32
    %c0_i32_0 = arith.constant 0 : i32
    %c0_i32_1 = arith.constant 0 : i32
    return %c0_i32, %c0_i32_0 : i32, i32
  }
  func.func @transform_5(%arg0: i32) -> (i32, i32) {
    %c0_i32 = arith.constant 0 : i32
    %c0_i32_0 = arith.constant 0 : i32
    %c0_i32_1 = arith.constant 0 : i32
    return %c0_i32, %c0_i32_0 : i32, i32
  }
}

</mosaic_0001>

<bundles_post_ra>
// kernel: forward.1
= control target key start
LH: loop header
LB: loop body
LE: loop exit
PB: predicated region body
PF: predicated region fallthrough
CT: control target
= control target key end

     0   :  { %s12065_s0 = inlined_call_operand.vmem [shape: bf16[2,2048], index: 0, kind: input, shape index: {}]   ;;  %s12066_s1 = inlined_call_operand.hbm [shape: bf16[2,2048,1024], index: 1, kind: input, shape index: {}]   ;;  %s12067_s2 = inlined_call_operand.hbm [shape: f32[1,2048], index: 2, kind: input, shape index: {}]   ;;  %s12068_s3 = inlined_call_operand.hbm [shape: bf16[2048,128], index: 3, kind: input, shape index: {}]   ;;  %s12069_s4 = inlined_call_operand.hbm [shape: f32[1,128], index: 4, kind: input, shape index: {}]   ;;  %s12070_s5 = inlined_call_operand.hbm [shape: f32[2,128], index: 5, kind: output, shape index: {}]  }
   0x1   :  { %12078 = sst [smem:[#allocation15_spill]] %s12067_s2 }
   0x2   :  { %10 = vsyncpa [#allocation3], 0 }
   0x3   :  { %12 = vsyncpa [#allocation3 + $0x1], 0 }
   0x4   :  { %13 = vsyncpa [#allocation6], 0 }
   0x5   :  { %15 = vsyncpa [#allocation6 + $0x1], 0 }
   0x6   :  { %16 = vsyncpa [#allocation9], 0 }
   0x7   :  { %17 = vsyncpa [#allocation4], 0  ;;  %s10530_s18 = smov 0   ;;  %s10532_s19 = smov 0  }
   0x8   :  { %s10534_s20 = smov 0   ;;  %s10536_s21 = smov 0  }
   0x9 LB: > { %s10551_s22 = sadd.s32 1, %s10488_s21   ;;  %s51_s23 = sadd.s32 1, %s10484_s20  ;;  %s10488_s21 = sphi %s10536_s21, %s12097_s21   ;;  %s10484_s20 = sphi %s10534_s20, %s12096_s20   ;;  %s10480_s19 = sphi %s10532_s19, %s12095_s19   ;;  %s10476_s18 = sphi %s10530_s18, %s12094_s18  }
   0xa   : > { %s48_s24 = ssub.s32 %s10488_s21, %s10551_s22  ;;  %p58_p0 = scmp.ne.s32.totalorder %s10484_s20, %s10480_s19 }
   0xb   : > { %p49_p1 = scmp.eq.s32.totalorder %s48_s24, 0  ;;  %p59_p2 = scmp.eq.s32.totalorder %s10488_s21, 0 }
   0xc   : > { %p10157_p3 = scmp.lt.s32.totalorder %s10488_s21, 2  ;;  %s10564_s26 = sand.u32 1, %s10484_s20  }
   0xd   : > { %s10561_s25 = scalar_select %p49_p1, %s10484_s20, %s51_s23  }
   0xe   : > { %p60_p4 = por %p59_p2, %p58_p0  ;;  %s217_s27 = sand.u32 1, %s10488_s21  }
   0xf   : > { %s8803_s28 = sshll.u32 %s10564_s26, 3  ;;  %s9918_s30 = sshll.u32 %s10488_s21, 7 }
  0x10   : > { %p10568_p5 = pnand %p10157_p3, %p60_p4  ;;  %s12080_s2 = sld [smem:[#allocation15_spill]] }
  0x11   : > { %s221_s9 = scalar_lea.vmem [#allocation5], %s8803_s28  ;;  %s10581_s12 = scalar_lea.sflag [#allocation6], %s217_s27 }
  0x12   : > { %s12079_s29 = scalar_select %p10568_p5, 1, 0 }
  0x13   : > { %s229_s10 = sshll.u32 %s221_s9, 4  ;;  %p10587_p7 = pneg %p10568_p5  ;;  %s10579_s10 = int_to_ptr.vmem [resolvable:$true] %s229_s10 }
  0x15   : > { %s12081_s14 = scalar_select %p10587_p7, 1, 0 }
  0x16   : > { %s10576_s8 = scalar_lea.hbm %s12080_s2, %s9918_s30  ;;  %s10303_s17 = scalar_lea.hbm %s12080_s2, 256 }
  0x17   : > { %s10298_s13 = scalar_lea.hbm %s10576_s8, 128  ;;  %p10304_p10 = scmp.lt.u32.totalorder %s10576_s8, %s12080_s2 }
  0x18   : > { %p10299_p6 = scmp.ne.s32.totalorder %s10576_s8, %s10298_s13  ;;  %p10305_p11 = scmp.lt.u32.totalorder %s10303_s17, %s10298_s13 }
  0x19   : > { %p10307_p13 = scmp.lt.u32.totalorder %s10298_s13, %s10576_s8 }
  0x1a   : > { %p10301_p8 = pnand %p10587_p7, %p10299_p6  ;;  %p10306_p12 = por %p10305_p11, %p10304_p10 }
  0x1c   : > { %p10302_p9 = pneg %p10301_p8  ;;  %p10308_p0 = por %p10307_p13, %p10306_p12 }
  0x1e   : > { %p10309_p1 = pnand %p10308_p0, %p10302_p9 }
  0x20   : > { %10312 = shalt.err (!%p10309_p1)
}
  0x21   : > { %s10313_s27 = scalar_lea.vmem %s10579_s10, 128  ;;  %s10490_s28 = smov [#allocation5]  }
  0x22   : > { %p10314_p2 = scmp.ne.s32.totalorder %s10579_s10, %s10313_s27  ;;  %s10318_s30 = sshll.u32 %s10490_s28, 4  ;;  %s10319_s30 = int_to_ptr.vmem [resolvable:$false] %s10318_s30 }
  0x23   : > { %s10320_s6 = scalar_lea.vmem %s10319_s30, 256  ;;  %p10321_p6 = scmp.lt.s32.totalorder %s10579_s10, %s10319_s30 }
  0x24   : > { %p10316_p3 = pnand %p10314_p2, %p10587_p7  ;;  %p10322_p8 = scmp.lt.s32.totalorder %s10320_s6, %s10313_s27 }
  0x26   : > { %p10317_p4 = pneg %p10316_p3  ;;  %p10323_p10 = por %p10322_p8, %p10321_p6 }
  0x28   : > { %p10324_p11 = pnand %p10323_p10, %p10317_p4 }
  0x2a   : > { %10327 = shalt.err (!%p10324_p11)
}
  0x2b   : > { %10152 = dma.hbm_to_vmem [thread:$0]  (!%p10568_p5), %s10576_s8, 128, %s10579_s10, %s10581_s12  }
  0x2c   : > { %s10612_s7 = sadd.s32 4294967295, %s10488_s21   ;;  %p64_p9 = scmp.ne.s32.totalorder %s10480_s19, %s10476_s18 }
  0x2d   : > { %p12071_p12 = scmp.eq.s32.totalorder %s10612_s7, 0  ;;  %p8797_p13 = scmp.ge.s32.totalorder %s10488_s21, 1 }
  0x2e   : > { %p169_p0 = scmp.lt.s32.totalorder %s10488_s21, 3  ;;  %s10491_s8 = smov [#allocation8]  }
  0x2f   : > { %p10621_p1 = por %p12071_p12, %p64_p9  ;;  %s185_s10 = sshll.u32 %s10491_s8, 4  ;;  %s186_s10 = int_to_ptr.vmem [resolvable:$true] %s185_s10 }
  0x30   : > { %p10626_p3 = pnand %p8797_p13, %p169_p0  ;;  %s8800_s18 = sshll.u32 %s10564_s26, 13 }
  0x31   : > { %s12082_s9 = scalar_select %p10621_p1, 1, 0 }
  0x32   : > { %s12083_s13 = scalar_select %p10626_p3, 1, 0 }
  0x33   : > { %p10142_p4 = pneg %p10626_p3  ;;  %s9917_s15 = sshll.u32 %s10488_s21, 17 }
  0x34   : > { %s10643_s24 = scalar_lea.hbm %s12066_s1, %s9917_s15  ;;  %s200_s27 = scalar_lea.vmem [#allocation2], %s8800_s18 }
  0x35   : > { %p10636_p6 = pnand %p10142_p4, %p12071_p12  ;;  %s207_s28 = sshll.u32 %s200_s27, 4  ;;  %s10645_s28 = int_to_ptr.vmem [resolvable:$true] %s207_s28 }
  0x36   : > { %s10328_s8 = scalar_lea.hbm %s12069_s4, 16 }
  0x37   : > { %p10329_p8 = scmp.ne.s32.totalorder %s12069_s4, %s10328_s8  ;;  %p10330_p10 = pneg %p10636_p6 }
  0x38   : > { %p10335_p13 = scmp.lt.u32.totalorder %s10328_s8, %s12069_s4 }
  0x39   : > { %p10331_p11 = pnand %p10330_p10, %p10329_p8 }
  0x3b   : > { %p10332_p9 = pneg %p10331_p11 }
  0x3d   : > { %p10337_p0 = pnand %p10335_p13, %p10332_p9 }
  0x3f   : > { %10340 = shalt.err (!%p10337_p0)
}
  0x40   : > { %s10341_s18 = scalar_lea.vmem %s186_s10, 16  ;;  %s10348_s15 = scalar_lea.vmem %s186_s10, 32 }
  0x41   : > { %p10342_p4 = scmp.ne.s32.totalorder %s186_s10, %s10341_s18  ;;  %p10349_p1 = scmp.lt.s32.totalorder %s186_s10, %s186_s10 }
  0x42   : > { %p10350_p3 = scmp.lt.s32.totalorder %s10348_s15, %s10341_s18 }
  0x43   : > { %p10344_p2 = pnand %p10342_p4, %p10330_p10 }
  0x44   : > { %p10351_p5 = por %p10350_p3, %p10349_p1 }
  0x45   : > { %p10345_p12 = pneg %p10344_p2 }
  0x47   : > { %p10352_p7 = pnand %p10351_p5, %p10345_p12 }
  0x49   : > { %10355 = shalt.err (!%p10352_p7)
}
  0x4a   : > { %10145 = dma.hbm_to_vmem [thread:$0]  (!%p10636_p6), %s12069_s4, 16, %s186_s10, [#allocation9]  }
  0x4b   : > { %s197_s27 = scalar_lea.sflag [#allocation3], %s10564_s26  ;;  %s10356_s30 = scalar_lea.hbm %s10643_s24, 131072 }
  0x4c   : > { %p10357_p2 = scmp.ne.s32.totalorder %s10643_s24, %s10356_s30  ;;  %p12085_p8 = scmp.ne.s32.totalorder %s12081_s14, 0 }
  0x4d   : > { %s10361_s16 = scalar_lea.hbm %s12066_s1, 262144  ;;  %p10362_p5 = scmp.lt.u32.totalorder %s10643_s24, %s12066_s1 }
  0x4e   : > { %p10359_p10 = pnand %p10357_p2, %p12085_p8  ;;  %p10363_p7 = scmp.lt.u32.totalorder %s10361_s16, %s10356_s30 }
  0x4f   : > { %p10365_p3 = scmp.lt.u32.totalorder %s10356_s30, %s10643_s24 }
  0x50   : > { %p10360_p1 = pneg %p10359_p10  ;;  %p10364_p12 = por %p10363_p7, %p10362_p5 }
  0x52   : > { %p10366_p11 = por %p10365_p3, %p10364_p12 }
  0x54   : > { %p10367_p9 = pnand %p10366_p11, %p10360_p1 }
  0x56   : > { %10370 = shalt.err (!%p10367_p9)
}
  0x57   : > { %s10371_s10 = scalar_lea.vmem %s10645_s28, 131072  ;;  %s10492_s18 = smov [#allocation2]  }
  0x58   : > { %p10372_p6 = scmp.ne.s32.totalorder %s10645_s28, %s10371_s10  ;;  %s10376_s15 = sshll.u32 %s10492_s18, 4  ;;  %s10377_s15 = int_to_ptr.vmem [resolvable:$false] %s10376_s15 }
  0x59   : > { %s10378_s2 = scalar_lea.vmem %s10377_s15, 262144  ;;  %p10379_p4 = scmp.lt.s32.totalorder %s10645_s28, %s10377_s15 }
  0x5a   : > { %p10374_p13 = pnand %p10372_p6, %p12085_p8  ;;  %p10380_p2 = scmp.lt.s32.totalorder %s10378_s2, %s10371_s10 }
  0x5c   : > { %p10375_p0 = pneg %p10374_p13  ;;  %p10381_p10 = por %p10380_p2, %p10379_p4 }
  0x5e   : > { %p10382_p5 = pnand %p10381_p10, %p10375_p0 }
  0x60   : > { %10385 = shalt.err (!%p10382_p5)
}
  0x61   : > { %s10493_s11 = smov 512   ;;  %s10494_s30 = smov 32  }
  0x62   : > { %p12086_p1 = scmp.ne.s32.totalorder %s12079_s29, 0  ;;  %s9919_s6 = sshll.u32 %s10488_s21, 13 }
  0x63   : > { %s10691_s17 = scalar_lea.hbm %s12068_s3, %s9919_s6  ;;  %s12087_s23 = sshll.u32 %s10564_s26, 9 }
  0x64   : > { %10149 = dma.hbm_to_vmem [thread:$0]  (!%p12086_p1), %s10643_s24, 131072, %s10645_s28, %s197_s27, %s10493_s11, %s10493_s11, %s10494_s30  }
  0x65   : > { %s240_s10 = scalar_lea.vmem [#allocation7], %s12087_s23  ;;  %s10386_s15 = scalar_lea.hbm %s10691_s17, 8192 }
  0x66   : > { %s247_s18 = sshll.u32 %s240_s10, 4  ;;  %p10387_p7 = scmp.ne.s32.totalorder %s10691_s17, %s10386_s15  ;;  %s10695_s18 = int_to_ptr.vmem [resolvable:$true] %s247_s18 }
  0x67   : > { %s10391_s28 = scalar_lea.hbm %s12068_s3, 16384  ;;  %p10392_p11 = scmp.lt.u32.totalorder %s10691_s17, %s12068_s3 }
  0x68   : > { %p10389_p12 = pnand %p10387_p7, %p12085_p8  ;;  %p10393_p9 = scmp.lt.u32.totalorder %s10391_s28, %s10386_s15 }
  0x69   : > { %p10395_p13 = scmp.lt.u32.totalorder %s10386_s15, %s10691_s17 }
  0x6a   : > { %p10390_p3 = pneg %p10389_p12  ;;  %p10394_p6 = por %p10393_p9, %p10392_p11 }
  0x6c   : > { %p10396_p0 = por %p10395_p13, %p10394_p6 }
  0x6e   : > { %p10397_p4 = pnand %p10396_p0, %p10390_p3 }
  0x70   : > { %10400 = shalt.err (!%p10397_p4)
}
  0x71   : > { %s10401_s26 = scalar_lea.vmem %s10695_s18, 8192  ;;  %s10495_s11 = smov [#allocation7]  }
  0x72   : > { %p10402_p2 = scmp.ne.s32.totalorder %s10695_s18, %s10401_s26  ;;  %s10406_s30 = sshll.u32 %s10495_s11, 4  ;;  %s10407_s30 = int_to_ptr.vmem [resolvable:$false] %s10406_s30 }
  0x73   : > { %s10408_s6 = scalar_lea.vmem %s10407_s30, 16384  ;;  %p10409_p7 = scmp.lt.s32.totalorder %s10695_s18, %s10407_s30 }
  0x74   : > { %p10404_p10 = pnand %p10402_p2, %p12085_p8  ;;  %p10410_p12 = scmp.lt.s32.totalorder %s10408_s6, %s10401_s26 }
  0x76   : > { %p10405_p5 = pneg %p10404_p10  ;;  %p10411_p11 = por %p10410_p12, %p10409_p7 }
  0x78   : > { %p10412_p9 = pnand %p10411_p11, %p10405_p5 }
  0x7a   : > { %10415 = shalt.err (!%p10412_p9)
}
  0x7b   : > { %s10496_s8 = smov 64   ;;  %s10497_s16 = smov 4  }
  0x7c   : > { %10155 = dma.hbm_to_vmem [thread:$0]  (!%p12086_p1), %s10691_s17, 8192, %s10695_s18, %s10581_s12, %s10496_s8, %s10496_s8, %s10497_s16  }
  0x7d   : > { %p12088_p8 = scmp.ne.s32.totalorder %s12083_s13, 0 }
  0x7e   : > { %s261_s14 = sand.u32 (!%p12088_p8), 1, %s10480_s19   ;;  %p12089_p3 = scmp.ne.s32.totalorder (!%p12088_p8), %s12082_s9, 0 }
  0x7f   : > { %259 = sbr.rel (%p12088_p8) target bundleno = 1671 (0x687), region = 40  ;;  %s8810_s23 = sshll.u32 (!%p12088_p8), %s261_s14, 13 }
  0x80   : > { %s262_s10 = scalar_lea.sflag (!%p12088_p8), [#allocation3], %s261_s14  ;;  %s10722_s15 = scalar_lea.vmem (!%p12088_p8), [#allocation2], %s8810_s23 }
  0x86   : > { %10459 = dma.done.wait (%p12089_p3), %s262_s10, 131072  }
  0x87   : > { %10461 = vsyncadd (%p12089_p3), %s262_s10, 4294836224  ;;  %s270_s21 = sand.u32 1, %s10612_s7   ;;  %s8811_s29 = sshll.u32 %s261_s14, 3 }
  0x88   : > { %s271_s12 = scalar_lea.sflag [#allocation6], %s270_s21  ;;  %s10729_s17 = scalar_lea.vmem [#allocation5], %s8811_s29 }
  0x89   : > { %10463 = dma.done.wait (%p12089_p3), %s271_s12, 8320  }
  0x8a   : > { %10465 = vsyncadd (%p12089_p3), %s271_s12, 4294958976  ;;  %s8812_s13 = sshll.u32 %s261_s14, 9  ;;  %p12090_p1 = scmp.eq.s32.totalorder %s10612_s7, 0 }
  0x8b   : > { %s10735_s18 = scalar_lea.vmem [#allocation7], %s8812_s13 }
  0x8c   : > { %10467 = dma.done.wait (%p12090_p1), [#allocation9], 16   ;;  %p12091_p6 = pmov %p12090_p1 }
  0x8d   : > { %v324_v0 = vld [vmem:[%s10722_s15] sm:$0xff]  ;;  %v325_v2 = vld [vmem:[%s10722_s15 + $0x8] sm:$0xff]  ;;  %v1350_v32 = vlaneseq  ;;  %v10498_v33 = vmov 1966171168   ;;  %p12092_p13 = scmp.ne.s32.totalorder %s10612_s7, 0 }
  0x8e   : > { %10469 = vsyncadd (%p12091_p6), [#allocation9], 4294967280  ;;  %v328_v1 = vld [vmem:[%s10722_s15 + $0x20] sm:$0xff]  ;;  %v329_v4 = vld [vmem:[%s10722_s15 + $0x28] sm:$0xff]  ;;  %v1394_v34 = vunpack.c.l.s4 %v10498_v33 }
  0x8f   : > { %v8815_v3 = vcombine.high %v324_v0, %v328_v1  ;;  %v8814_v5 = vcombine.low %v324_v0, %v328_v1  ;;  %v332_v6 = vld [vmem:[%s10722_s15 + $0x40] sm:$0xff]  ;;  %v8817_v8 = vcombine.high %v325_v2, %v329_v4  ;;  %v8816_v9 = vcombine.low %v325_v2, %v329_v4  ;;  %v333_v11 = vld [vmem:[%s10722_s15 + $0x48] sm:$0xff] }
  0x90   : > { %v336_v7 = vld [vmem:[%s10722_s15 + $0x60] sm:$0xff]  ;;  %v337_v12 = vld [vmem:[%s10722_s15 + $0x68] sm:$0xff]  ;;  %v10763_v43 = vshrl.u32 %v1350_v32, 7  ;;  %v1395_v44 = vunpack.c.0.s8 %v1394_v34 }
  0x91   : > { %v8823_v10 = vcombine.high %v332_v6, %v336_v7  ;;  %v340_v13 = vld [vmem:[%s10722_s15 + $0x80] sm:$0xff]  ;;  %6626 = vmatprep.subr.bf16.mxu0 %v8815_v3  ;;  %v8825_v14 = vcombine.high %v333_v11, %v337_v12  ;;  %v341_v16 = vld [vmem:[%s10722_s15 + $0x88] sm:$0xff]  ;;  %6954 = vmatprep.subr.bf16.mxu1 %v8817_v8  ;;  %v8822_v18 = vcombine.low %v332_v6, %v336_v7 }
  0x92   : > { %v344_v15 = vld [vmem:[%s10722_s15 + $0xa0] sm:$0xff]  ;;  %v345_v17 = vld [vmem:[%s10722_s15 + $0xa8] sm:$0xff]  ;;  %6627 = vmatpush1.bf16.msra.mxu0 %v8814_v5  ;;  %6955 = vmatpush1.bf16.msra.mxu1 %v8816_v9  ;;  %v8824_v19 = vcombine.low %v333_v11, %v337_v12  ;;  %v10770_v53 = vsub.s32 %v1395_v44, %v10763_v43 }
  0x93   : > { %6628 = vmatprep.subr.bf16.mxu0 %v8823_v10  ;;  %v8831_v20 = vcombine.high %v340_v13, %v344_v15  ;;  %6956 = vmatprep.subr.bf16.mxu1 %v8825_v14  ;;  %v8833_v21 = vcombine.high %v341_v16, %v345_v17  ;;  %v348_v22 = vld [vmem:[%s10722_s15 + $0xc0] sm:$0xff]  ;;  %v349_v24 = vld [vmem:[%s10722_s15 + $0xc8] sm:$0xff]  ;;  %v8830_v26 = vcombine.low %v340_v13, %v344_v15 }
  0x94   : > { %v352_v23 = vld [vmem:[%s10722_s15 + $0xe0] sm:$0xff]  ;;  %v353_v25 = vld [vmem:[%s10722_s15 + $0xe8] sm:$0xff]  ;;  %v8832_v27 = vcombine.low %v341_v16, %v345_v17 }
  0x95   : > { %v8839_v28 = vcombine.high %v348_v22, %v352_v23  ;;  %v8841_v29 = vcombine.high %v349_v24, %v353_v25  ;;  %v356_v30 = vld [vmem:[%s10722_s15 + $0x100] sm:$0xff]  ;;  %v357_v35 = vld [vmem:[%s10722_s15 + $0x108] sm:$0xff]  ;;  %v8838_v37 = vcombine.low %v348_v22, %v352_v23  ;;  %v8840_v38 = vcombine.low %v349_v24, %v353_v25 }
  0x96   : > { %6629 = vmatpush1.bf16.msra.mxu0 %v8822_v18  ;;  %6957 = vmatpush1.bf16.msra.mxu1 %v8824_v19  ;;  %v360_v31 = vld [vmem:[%s10722_s15 + $0x120] sm:$0xff]  ;;  %v361_v36 = vld [vmem:[%s10722_s15 + $0x128] sm:$0xff] }
  0x97   : > { %6630 = vmatprep.subr.bf16.mxu0 %v8831_v20  ;;  %6958 = vmatprep.subr.bf16.mxu1 %v8833_v21  ;;  %v8847_v39 = vcombine.high %v356_v30, %v360_v31  ;;  %v8849_v40 = vcombine.high %v357_v35, %v361_v36  ;;  %v364_v41 = vld [vmem:[%s10722_s15 + $0x140] sm:$0xff]  ;;  %v365_v45 = vld [vmem:[%s10722_s15 + $0x148] sm:$0xff]  ;;  %v8846_v47 = vcombine.low %v356_v30, %v360_v31 }
  0x98   : > { %v368_v42 = vld [vmem:[%s10722_s15 + $0x160] sm:$0xff]  ;;  %v369_v46 = vld [vmem:[%s10722_s15 + $0x168] sm:$0xff]  ;;  %v8848_v48 = vcombine.low %v357_v35, %v361_v36 }
  0x99   : > { %v8855_v49 = vcombine.high %v364_v41, %v368_v42  ;;  %v8857_v50 = vcombine.high %v365_v45, %v369_v46  ;;  %v372_v51 = vld [vmem:[%s10722_s15 + $0x180] sm:$0xff]  ;;  %v373_v54 = vld [vmem:[%s10722_s15 + $0x188] sm:$0xff]  ;;  %v8854_v56 = vcombine.low %v364_v41, %v368_v42  ;;  %v8856_v57 = vcombine.low %v365_v45, %v369_v46 }
  0x9a   : > { %6631 = vmatpush1.bf16.msra.mxu0 %v8830_v26  ;;  %6959 = vmatpush1.bf16.msra.mxu1 %v8832_v27  ;;  %v376_v52 = vld [vmem:[%s10722_s15 + $0x1a0] sm:$0xff]  ;;  %v377_v55 = vld [vmem:[%s10722_s15 + $0x1a8] sm:$0xff] }
  0x9b   : > { %6632 = vmatprep.subr.bf16.mxu0 %v8839_v28  ;;  %6960 = vmatprep.subr.bf16.mxu1 %v8841_v29  ;;  %v8863_v58 = vcombine.high %v372_v51, %v376_v52  ;;  %v10777_v59 = vld [vmem:[%s12065_s0] sm:$0xff]  ;;  %v8865_v60 = vcombine.high %v373_v54, %v377_v55  ;;  %v381_v0 = vld [vmem:[%s10722_s15 + $0x1c8] sm:$0xff]  ;;  %v8862_v2 = vcombine.low %v372_v51, %v376_v52 }
  0x9c   : > { %v380_v61 = vld [vmem:[%s10722_s15 + $0x1c0] sm:$0xff]  ;;  %v10783_v63 = vrot.slane %v10777_v59, %v10770_v53  ;;  %v385_v1 = vld [vmem:[%s10722_s15 + $0x1e8] sm:$0xff]  ;;  %v8864_v4 = vcombine.low %v373_v54, %v377_v55 }
  0x9d   : > { %v384_v62 = vld [vmem:[%s10722_s15 + $0x1e0] sm:$0xff]  ;;  %v8873_v6 = vcombine.high %v381_v0, %v385_v1  ;;  %v389_v10 = vld [vmem:[%s10722_s15 + $0x208] sm:$0xff]  ;;  %v8872_v13 = vcombine.low %v381_v0, %v385_v1 }
  0x9e   : > { %6633 = vmatpush1.bf16.msra.mxu0 %v8838_v37  ;;  %6961 = vmatpush1.bf16.msra.mxu1 %v8840_v38  ;;  %v1407_v3 = vcombine.high %v10783_v63, %v10783_v63  ;;  %v8871_v5 = vcombine.high %v380_v61, %v384_v62  ;;  %v388_v7 = vld [vmem:[%s10722_s15 + $0x200] sm:$0xff]  ;;  %v393_v11 = vld [vmem:[%s10722_s15 + $0x228] sm:$0xff]  ;;  %v8870_v12 = vcombine.low %v380_v61, %v384_v62 }
  0x9f   : > { %6634 = vmatprep.subr.bf16.mxu0 %v8847_v39  ;;  %6962 = vmatprep.subr.bf16.mxu1 %v8849_v40  ;;  %v392_v8 = vld [vmem:[%s10722_s15 + $0x220] sm:$0xff]  ;;  %v8881_v15 = vcombine.high %v389_v10, %v393_v11  ;;  %v397_v18 = vld [vmem:[%s10722_s15 + $0x248] sm:$0xff]  ;;  %v8880_v21 = vcombine.low %v389_v10, %v393_v11 }
  0xa0   : > { %v10792_v9 = vrot.slane %v1407_v3, %v10770_v53  ;;  %v8879_v14 = vcombine.high %v388_v7, %v392_v8  ;;  %v396_v16 = vld [vmem:[%s10722_s15 + $0x240] sm:$0xff]  ;;  %v401_v19 = vld [vmem:[%s10722_s15 + $0x268] sm:$0xff]  ;;  %v8878_v20 = vcombine.low %v388_v7, %v392_v8 }
  0xa1   : > { %v400_v17 = vld [vmem:[%s10722_s15 + $0x260] sm:$0xff]  ;;  %v8889_v23 = vcombine.high %v397_v18, %v401_v19  ;;  %v405_v26 = vld [vmem:[%s10722_s15 + $0x288] sm:$0xff]  ;;  %v8888_v29 = vcombine.low %v397_v18, %v401_v19 }
  0xa2   : > { %6635 = vmatpush1.bf16.msra.mxu0 %v8846_v47  ;;  %6963 = vmatpush1.bf16.msra.mxu1 %v8848_v48  ;;  %v8887_v22 = vcombine.high %v396_v16, %v400_v17  ;;  %v404_v24 = vld [vmem:[%s10722_s15 + $0x280] sm:$0xff]  ;;  %v409_v27 = vld [vmem:[%s10722_s15 + $0x2a8] sm:$0xff]  ;;  %v8886_v28 = vcombine.low %v396_v16, %v400_v17 }
  0xa3   : > { %6636 = vmatprep.subr.bf16.mxu0 %v8855_v49  ;;  %6964 = vmatprep.subr.bf16.mxu1 %v8857_v50  ;;  %v408_v25 = vld [vmem:[%s10722_s15 + $0x2a0] sm:$0xff]  ;;  %v8897_v31 = vcombine.high %v405_v26, %v409_v27  ;;  %v413_v34 = vld [vmem:[%s10722_s15 + $0x2c8] sm:$0xff]  ;;  %v8896_v37 = vcombine.low %v405_v26, %v409_v27 }
  0xa4   : > { %6658 = vmatprep.mubr.bf16.mxu0 %v10792_v9  ;;  %6986 = vmatprep.mubr.bf16.mxu1 %v10792_v9  ;;  %v8895_v30 = vcombine.high %v404_v24, %v408_v25  ;;  %v412_v32 = vld [vmem:[%s10722_s15 + $0x2c0] sm:$0xff]  ;;  %v417_v35 = vld [vmem:[%s10722_s15 + $0x2e8] sm:$0xff]  ;;  %v8894_v36 = vcombine.low %v404_v24, %v408_v25 }
  0xa5   : > { %v416_v33 = vld [vmem:[%s10722_s15 + $0x2e0] sm:$0xff]  ;;  %v8905_v39 = vcombine.high %v413_v34, %v417_v35  ;;  %v421_v42 = vld [vmem:[%s10722_s15 + $0x308] sm:$0xff]  ;;  %v8904_v46 = vcombine.low %v413_v34, %v417_v35 }
  0xa6   : > { %6637 = vmatpush1.bf16.msra.mxu0 %v8854_v56  ;;  %6965 = vmatpush1.bf16.msra.mxu1 %v8856_v57  ;;  %v8903_v38 = vcombine.high %v412_v32, %v416_v33  ;;  %v420_v40 = vld [vmem:[%s10722_s15 + $0x300] sm:$0xff]  ;;  %v425_v44 = vld [vmem:[%s10722_s15 + $0x328] sm:$0xff]  ;;  %v8902_v45 = vcombine.low %v412_v32, %v416_v33 }
  0xa7   : > { %6638 = vmatprep.subr.bf16.mxu0 %v8863_v58  ;;  %6966 = vmatprep.subr.bf16.mxu1 %v8865_v60  ;;  %v424_v41 = vld [vmem:[%s10722_s15 + $0x320] sm:$0xff]  ;;  %v8913_v48 = vcombine.high %v421_v42, %v425_v44  ;;  %v429_v51 = vld [vmem:[%s10722_s15 + $0x348] sm:$0xff]  ;;  %v8912_v55 = vcombine.low %v421_v42, %v425_v44 }
  0xa8   : > { %v8911_v47 = vcombine.high %v420_v40, %v424_v41  ;;  %v428_v49 = vld [vmem:[%s10722_s15 + $0x340] sm:$0xff]  ;;  %v433_v52 = vld [vmem:[%s10722_s15 + $0x368] sm:$0xff]  ;;  %v8910_v54 = vcombine.low %v420_v40, %v424_v41 }
  0xa9   : > { %v432_v50 = vld [vmem:[%s10722_s15 + $0x360] sm:$0xff]  ;;  %v8921_v57 = vcombine.high %v429_v51, %v433_v52  ;;  %v437_v61 = vld [vmem:[%s10722_s15 + $0x388] sm:$0xff]  ;;  %v8920_v1 = vcombine.low %v429_v51, %v433_v52 }
  0xaa   : > { %6639 = vmatpush1.bf16.msra.mxu0 %v8862_v2  ;;  %6967 = vmatpush1.bf16.msra.mxu1 %v8864_v4  ;;  %v8919_v56 = vcombine.high %v428_v49, %v432_v50  ;;  %v436_v58 = vld [vmem:[%s10722_s15 + $0x380] sm:$0xff]  ;;  %v441_v62 = vld [vmem:[%s10722_s15 + $0x3a8] sm:$0xff]  ;;  %v8918_v0 = vcombine.low %v428_v49, %v432_v50 }
  0xab   : > { %6640 = vmatprep.subr.bf16.mxu0 %v8871_v5  ;;  %6968 = vmatprep.subr.bf16.mxu1 %v8873_v6  ;;  %v440_v60 = vld [vmem:[%s10722_s15 + $0x3a0] sm:$0xff]  ;;  %v8929_v3 = vcombine.high %v437_v61, %v441_v62  ;;  %v445_v6 = vld [vmem:[%s10722_s15 + $0x3c8] sm:$0xff]  ;;  %v8928_v10 = vcombine.low %v437_v61, %v441_v62 }
  0xac   : > { %v8927_v2 = vcombine.high %v436_v58, %v440_v60  ;;  %v444_v4 = vld [vmem:[%s10722_s15 + $0x3c0] sm:$0xff]  ;;  %v449_v7 = vld [vmem:[%s10722_s15 + $0x3e8] sm:$0xff]  ;;  %v8926_v8 = vcombine.low %v436_v58, %v440_v60 }
  0xad   : > { %v448_v5 = vld [vmem:[%s10722_s15 + $0x3e0] sm:$0xff]  ;;  %v457_v16 = vld [vmem:[%s10722_s15 + $0x428] sm:$0xff]  ;;  %v8936_v18 = vcombine.low %v445_v6, %v449_v7 }
  0xae   : > { %6641 = vmatpush1.bf16.msra.mxu0 %v8870_v12  ;;  %6969 = vmatpush1.bf16.msra.mxu1 %v8872_v13  ;;  %v8935_v11 = vcombine.high %v444_v4, %v448_v5  ;;  %v8937_v12 = vcombine.high %v445_v6, %v449_v7  ;;  %v452_v13 = vld [vmem:[%s10722_s15 + $0x400] sm:$0xff]  ;;  %v8934_v17 = vcombine.low %v444_v4, %v448_v5  ;;  %v461_v24 = vld [vmem:[%s10722_s15 + $0x448] sm:$0xff] }
  0xaf   : > { %6642 = vmatprep.subr.bf16.mxu0 %v8879_v14  ;;  %6970 = vmatprep.subr.bf16.mxu1 %v8881_v15  ;;  %v456_v14 = vld [vmem:[%s10722_s15 + $0x420] sm:$0xff]  ;;  %v453_v15 = vld [vmem:[%s10722_s15 + $0x408] sm:$0xff] }
  0xb0   : > { %v8943_v19 = vcombine.high %v452_v13, %v456_v14  ;;  %v465_v25 = vld [vmem:[%s10722_s15 + $0x468] sm:$0xff]  ;;  %v8942_v26 = vcombine.low %v452_v13, %v456_v14  ;;  %v8944_v27 = vcombine.low %v453_v15, %v457_v16 }
  0xb1   : > { %v8953_v32 = vcombine.high %v461_v24, %v465_v25  ;;  %v473_v33 = vld [vmem:[%s10722_s15 + $0x4a8] sm:$0xff]  ;;  %v8952_v35 = vcombine.low %v461_v24, %v465_v25 }
  0xb2   : > { %6643 = vmatpush1.bf16.msra.mxu0 %v8878_v20  ;;  %6971 = vmatpush1.bf16.msra.mxu1 %v8880_v21  ;;  %v8945_v20 = vcombine.high %v453_v15, %v457_v16  ;;  %v460_v21 = vld [vmem:[%s10722_s15 + $0x440] sm:$0xff]  ;;  %v481_v41 = vld [vmem:[%s10722_s15 + $0x4e8] sm:$0xff] }
  0xb3   : > { %6644 = vmatprep.subr.bf16.mxu0 %v8887_v22  ;;  %6972 = vmatprep.subr.bf16.mxu1 %v8889_v23  ;;  %v464_v22 = vld [vmem:[%s10722_s15 + $0x460] sm:$0xff]  ;;  %v10834_v23 = vrot.slane %v10783_v63, %v10770_v53  ;;  %v10844_v63 = vcombine.high %v10792_v9, %v10792_v9  ;;  %v489_v50 = vld [vmem:[%s10722_s15 + $0x528] sm:$0xff] }
  0xb4   : > { %v8950_v34 = vcombine.low %v460_v21, %v464_v22  ;;  %v497_v60 = vld [vmem:[%s10722_s15 + $0x568] sm:$0xff] }
  0xb5   : > { %v505_v5 = vld [vmem:[%s10722_s15 + $0x5a8] sm:$0xff] }
  0xb6   : > { %6645 = vmatpush1.bf16.msra.mxu0 %v8886_v28  ;;  %6973 = vmatpush1.bf16.msra.mxu1 %v8888_v29  ;;  %v8951_v28 = vcombine.high %v460_v21, %v464_v22  ;;  %v468_v29 = vld [vmem:[%s10722_s15 + $0x480] sm:$0xff]  ;;  %v513_v14 = vld [vmem:[%s10722_s15 + $0x5e8] sm:$0xff] }
  0xb7   : > { %6646 = vmatprep.subr.bf16.mxu0 %v8895_v30  ;;  %6974 = vmatprep.subr.bf16.mxu1 %v8897_v31  ;;  %v472_v30 = vld [vmem:[%s10722_s15 + $0x4a0] sm:$0xff]  ;;  %v469_v31 = vld [vmem:[%s10722_s15 + $0x488] sm:$0xff] }
  0xb8   : > { %v8961_v40 = vcombine.high %v469_v31, %v473_v33  ;;  %v8958_v42 = vcombine.low %v468_v29, %v472_v30  ;;  %v8960_v44 = vcombine.low %v469_v31, %v473_v33  ;;  %v521_v22 = vld [vmem:[%s10722_s15 + $0x628] sm:$0xff] }
  0xb9   : > { %v529_v31 = vld [vmem:[%s10722_s15 + $0x668] sm:$0xff] }
  0xba   : > { %6647 = vmatpush1.bf16.msra.mxu0 %v8894_v36  ;;  %6975 = vmatpush1.bf16.msra.mxu1 %v8896_v37  ;;  %v8959_v36 = vcombine.high %v468_v29, %v472_v30  ;;  %v476_v37 = vld [vmem:[%s10722_s15 + $0x4c0] sm:$0xff]  ;;  %v525_v29 = vld [vmem:[%s10722_s15 + $0x648] sm:$0xff] }
  0xbb   : > { %6648 = vmatprep.subr.bf16.mxu0 %v8903_v38  ;;  %6976 = vmatprep.subr.bf16.mxu1 %v8905_v39  ;;  %v480_v38 = vld [vmem:[%s10722_s15 + $0x4e0] sm:$0xff]  ;;  %v477_v39 = vld [vmem:[%s10722_s15 + $0x4c8] sm:$0xff] }
  0xbc   : > { %v8969_v49 = vcombine.high %v477_v39, %v481_v41  ;;  %v8966_v51 = vcombine.low %v476_v37, %v480_v38  ;;  %v8968_v52 = vcombine.low %v477_v39, %v481_v41  ;;  %v537_v39 = vld [vmem:[%s10722_s15 + $0x6a8] sm:$0xff]  ;;  %v9016_v41 = vcombine.low %v525_v29, %v529_v31 }
  0xbe   : > { %6649 = vmatpush1.bf16.msra.mxu0 %v8902_v45  ;;  %6977 = vmatpush1.bf16.msra.mxu1 %v8904_v46  ;;  %v8967_v45 = vcombine.high %v476_v37, %v480_v38  ;;  %v484_v46 = vld [vmem:[%s10722_s15 + $0x500] sm:$0xff]  ;;  %v533_v37 = vld [vmem:[%s10722_s15 + $0x688] sm:$0xff]  ;;  %v9017_v38 = vcombine.high %v525_v29, %v529_v31 }
  0xbf   : > { %6650 = vmatprep.subr.bf16.mxu0 %v8911_v47  ;;  %6978 = vmatprep.subr.bf16.mxu1 %v8913_v48  ;;  %v488_v47 = vld [vmem:[%s10722_s15 + $0x520] sm:$0xff]  ;;  %v485_v48 = vld [vmem:[%s10722_s15 + $0x508] sm:$0xff] }
  0xc0   : > { %v8977_v58 = vcombine.high %v485_v48, %v489_v50  ;;  %v8974_v61 = vcombine.low %v484_v46, %v488_v47  ;;  %v8976_v62 = vcombine.low %v485_v48, %v489_v50  ;;  %v545_v48 = vld [vmem:[%s10722_s15 + $0x6e8] sm:$0xff]  ;;  %v9024_v50 = vcombine.low %v533_v37, %v537_v39 }
  0xc2   : > { %6651 = vmatpush1.bf16.msra.mxu0 %v8910_v54  ;;  %6979 = vmatpush1.bf16.msra.mxu1 %v8912_v55  ;;  %v8975_v54 = vcombine.high %v484_v46, %v488_v47  ;;  %v492_v55 = vld [vmem:[%s10722_s15 + $0x540] sm:$0xff]  ;;  %v541_v46 = vld [vmem:[%s10722_s15 + $0x6c8] sm:$0xff]  ;;  %v9025_v47 = vcombine.high %v533_v37, %v537_v39 }
  0xc3   : > { %6652 = vmatprep.subr.bf16.mxu0 %v8919_v56  ;;  %6980 = vmatprep.subr.bf16.mxu1 %v8921_v57  ;;  %v496_v56 = vld [vmem:[%s10722_s15 + $0x560] sm:$0xff]  ;;  %v493_v57 = vld [vmem:[%s10722_s15 + $0x548] sm:$0xff] }
  0xc4   : > { %v8985_v4 = vcombine.high %v493_v57, %v497_v60  ;;  %v8982_v6 = vcombine.low %v492_v55, %v496_v56  ;;  %v8984_v7 = vcombine.low %v493_v57, %v497_v60  ;;  %v553_v57 = vld [vmem:[%s10722_s15 + $0x728] sm:$0xff]  ;;  %v9032_v60 = vcombine.low %v541_v46, %v545_v48 }
  0xc6   : > { %6653 = vmatpush1.bf16.msra.mxu0 %v8918_v0  ;;  %6981 = vmatpush1.bf16.msra.mxu1 %v8920_v1  ;;  %v8983_v0 = vcombine.high %v492_v55, %v496_v56  ;;  %v500_v1 = vld [vmem:[%s10722_s15 + $0x580] sm:$0xff]  ;;  %v549_v55 = vld [vmem:[%s10722_s15 + $0x708] sm:$0xff]  ;;  %v9033_v56 = vcombine.high %v541_v46, %v545_v48 }
  0xc7   : > { %6654 = vmatprep.subr.bf16.mxu0 %v8927_v2  ;;  %6982 = vmatprep.subr.bf16.mxu1 %v8929_v3  ;;  %v504_v2 = vld [vmem:[%s10722_s15 + $0x5a0] sm:$0xff]  ;;  %v501_v3 = vld [vmem:[%s10722_s15 + $0x588] sm:$0xff] }
  0xc8   : > { %v8993_v13 = vcombine.high %v501_v3, %v505_v5  ;;  %v8990_v15 = vcombine.low %v500_v1, %v504_v2  ;;  %v8992_v16 = vcombine.low %v501_v3, %v505_v5  ;;  %v561_v3 = vld [vmem:[%s10722_s15 + $0x768] sm:$0xff]  ;;  %v9040_v5 = vcombine.low %v549_v55, %v553_v57  ;;  %v596_v46 = vld [vmem:[%s10722_s15 + $0x880] sm:$0xff] }
  0xca   : > { %6655 = vmatpush1.bf16.msra.mxu0 %v8926_v8  ;;  %6983 = vmatpush1.bf16.msra.mxu1 %v8928_v10  ;;  %v8991_v8 = vcombine.high %v500_v1, %v504_v2  ;;  %v508_v10 = vld [vmem:[%s10722_s15 + $0x5c0] sm:$0xff]  ;;  %v557_v1 = vld [vmem:[%s10722_s15 + $0x748] sm:$0xff]  ;;  %v9041_v2 = vcombine.high %v549_v55, %v553_v57 }
  0xcb   : > { %6656 = vmatprep.subr.bf16.mxu0 %v8935_v11  ;;  %6984 = vmatprep.subr.bf16.mxu1 %v8937_v12  ;;  %v512_v11 = vld [vmem:[%s10722_s15 + $0x5e0] sm:$0xff]  ;;  %v509_v12 = vld [vmem:[%s10722_s15 + $0x5c8] sm:$0xff] }
  0xcc   : > { %v9001_v21 = vcombine.high %v509_v12, %v513_v14  ;;  %v8998_v24 = vcombine.low %v508_v10, %v512_v11  ;;  %v9000_v25 = vcombine.low %v509_v12, %v513_v14  ;;  %v569_v12 = vld [vmem:[%s10722_s15 + $0x7a8] sm:$0xff]  ;;  %v9048_v14 = vcombine.low %v557_v1, %v561_v3  ;;  %v608_v57 = vld [vmem:[%s10722_s15 + $0x8e0] sm:$0xff] }
  0xce   : > { %6657 = vmatpush1.bf16.msra.mxu0 %v8934_v17  ;;  %6985 = vmatpush1.bf16.msra.mxu1 %v8936_v18  ;;  %v8999_v17 = vcombine.high %v508_v10, %v512_v11  ;;  %v516_v18 = vld [vmem:[%s10722_s15 + $0x600] sm:$0xff]  ;;  %v565_v10 = vld [vmem:[%s10722_s15 + $0x788] sm:$0xff]  ;;  %v9049_v11 = vcombine.high %v557_v1, %v561_v3 }
  0xcf   : > { %6667 = vmatprep.subr.bf16.mxu0 %v8943_v19  ;;  %6995 = vmatprep.subr.bf16.mxu1 %v8945_v20  ;;  %v520_v19 = vld [vmem:[%s10722_s15 + $0x620] sm:$0xff]  ;;  %v517_v20 = vld [vmem:[%s10722_s15 + $0x608] sm:$0xff] }
  0xd0   : > { %v9009_v30 = vcombine.high %v517_v20, %v521_v22  ;;  %v9008_v33 = vcombine.low %v517_v20, %v521_v22  ;;  %v577_v20 = vld [vmem:[%s10722_s15 + $0x7e8] sm:$0xff]  ;;  %v616_v3 = vld [vmem:[%s10722_s15 + $0x920] sm:$0xff] }
  0xd1   : > { %6659 = vmatmul.mubr.bf16.vlgmr.msra.gmra.mrb[0].mxu0 %v10834_v23  ;;  %6987 = vmatmul.mubr.bf16.vlgmr.msra.gmra.mrb[0].mxu1 %v10834_v23 }
  0xd2   : > { %6668 = vmatpush1.bf16.msra.mxu0 %v8942_v26  ;;  %6996 = vmatpush1.bf16.msra.mxu1 %v8944_v27  ;;  %v9007_v26 = vcombine.high %v516_v18, %v520_v19  ;;  %v524_v27 = vld [vmem:[%s10722_s15 + $0x640] sm:$0xff] }
  0xd3   : > { %6669 = vmatprep.subr.bf16.mxu0 %v8951_v28  ;;  %6997 = vmatprep.subr.bf16.mxu1 %v8953_v32  ;;  %v528_v28 = vld [vmem:[%s10722_s15 + $0x660] sm:$0xff]  ;;  %v9006_v32 = vcombine.low %v516_v18, %v520_v19  ;;  %v573_v18 = vld [vmem:[%s10722_s15 + $0x7c8] sm:$0xff]  ;;  %v9057_v19 = vcombine.high %v565_v10, %v569_v12 }
  0xd4   : > { %6699 = vmatprep.mubr.bf16.mxu0 %v10844_v63  ;;  %7027 = vmatprep.mubr.bf16.mxu1 %v10844_v63  ;;  %v9065_v29 = vcombine.high %v573_v18, %v577_v20 }
  0xd6   : > { %6670 = vmatpush1.bf16.msra.mxu0 %v8950_v34  ;;  %6998 = vmatpush1.bf16.msra.mxu1 %v8952_v35  ;;  %v9015_v34 = vcombine.high %v524_v27, %v528_v28  ;;  %v532_v35 = vld [vmem:[%s10722_s15 + $0x680] sm:$0xff] }
  0xd7   : > { %6671 = vmatprep.subr.bf16.mxu0 %v8959_v36  ;;  %6999 = vmatprep.subr.bf16.mxu1 %v8961_v40  ;;  %v536_v36 = vld [vmem:[%s10722_s15 + $0x6a0] sm:$0xff]  ;;  %v9014_v40 = vcombine.low %v524_v27, %v528_v28  ;;  %v581_v28 = vld [vmem:[%s10722_s15 + $0x808] sm:$0xff] }
  0xd8   : > { %v584_v27 = vld [vmem:[%s10722_s15 + $0x820] sm:$0xff] }
  0xda   : > { %6672 = vmatpush1.bf16.msra.mxu0 %v8958_v42  ;;  %7000 = vmatpush1.bf16.msra.mxu1 %v8960_v44  ;;  %v9023_v42 = vcombine.high %v532_v35, %v536_v36  ;;  %v540_v44 = vld [vmem:[%s10722_s15 + $0x6c0] sm:$0xff] }
  0xdb   : > { %6673 = vmatprep.subr.bf16.mxu0 %v8967_v45  ;;  %7001 = vmatprep.subr.bf16.mxu1 %v8969_v49  ;;  %v544_v45 = vld [vmem:[%s10722_s15 + $0x6e0] sm:$0xff]  ;;  %v9022_v49 = vcombine.low %v532_v35, %v536_v36  ;;  %v589_v36 = vld [vmem:[%s10722_s15 + $0x848] sm:$0xff] }
  0xdc   : > { %v592_v35 = vld [vmem:[%s10722_s15 + $0x860] sm:$0xff] }
  0xde   : > { %6674 = vmatpush1.bf16.msra.mxu0 %v8966_v51  ;;  %7002 = vmatpush1.bf16.msra.mxu1 %v8968_v52  ;;  %v9031_v51 = vcombine.high %v540_v44, %v544_v45  ;;  %v548_v52 = vld [vmem:[%s10722_s15 + $0x700] sm:$0xff] }
  0xdf   : > { %6675 = vmatprep.subr.bf16.mxu0 %v8975_v54  ;;  %7003 = vmatprep.subr.bf16.mxu1 %v8977_v58  ;;  %v552_v54 = vld [vmem:[%s10722_s15 + $0x720] sm:$0xff]  ;;  %v9030_v58 = vcombine.low %v540_v44, %v544_v45 }
  0xe2   : > { %6676 = vmatpush1.bf16.msra.mxu0 %v8974_v61  ;;  %7004 = vmatpush1.bf16.msra.mxu1 %v8976_v62  ;;  %v9039_v61 = vcombine.high %v548_v52, %v552_v54  ;;  %v556_v62 = vld [vmem:[%s10722_s15 + $0x740] sm:$0xff] }
  0xe3   : > { %6677 = vmatprep.subr.bf16.mxu0 %v8983_v0  ;;  %7005 = vmatprep.subr.bf16.mxu1 %v8985_v4  ;;  %v560_v0 = vld [vmem:[%s10722_s15 + $0x760] sm:$0xff]  ;;  %v9038_v4 = vcombine.low %v548_v52, %v552_v54 }
  0xe6   : > { %6678 = vmatpush1.bf16.msra.mxu0 %v8982_v6  ;;  %7006 = vmatpush1.bf16.msra.mxu1 %v8984_v7  ;;  %v9047_v6 = vcombine.high %v556_v62, %v560_v0  ;;  %v564_v7 = vld [vmem:[%s10722_s15 + $0x780] sm:$0xff] }
  0xe7   : > { %6679 = vmatprep.subr.bf16.mxu0 %v8991_v8  ;;  %7007 = vmatprep.subr.bf16.mxu1 %v8993_v13  ;;  %v568_v8 = vld [vmem:[%s10722_s15 + $0x7a0] sm:$0xff]  ;;  %v9046_v13 = vcombine.low %v556_v62, %v560_v0 }
  0xe8   : > { %v9054_v22 = vcombine.low %v564_v7, %v568_v8 }
  0xea   : > { %6680 = vmatpush1.bf16.msra.mxu0 %v8990_v15  ;;  %7008 = vmatpush1.bf16.msra.mxu1 %v8992_v16  ;;  %v9055_v15 = vcombine.high %v564_v7, %v568_v8  ;;  %v572_v16 = vld [vmem:[%s10722_s15 + $0x7c0] sm:$0xff] }
  0xeb   : > { %6681 = vmatprep.subr.bf16.mxu0 %v8999_v17  ;;  %7009 = vmatprep.subr.bf16.mxu1 %v9001_v21  ;;  %v576_v17 = vld [vmem:[%s10722_s15 + $0x7e0] sm:$0xff]  ;;  %v1392_v21 = vcombine.high %v10777_v59, %v10777_v59 }
  0xec   : > { %v9062_v59 = vcombine.low %v572_v16, %v576_v17 }
  0xed   : > { %v10909_v31 = vrot.slane %v1392_v21, %v10770_v53  ;;  %v629_v21 = vld [vmem:[%s10722_s15 + $0x988] sm:$0xff] }
  0xee   : > { %6682 = vmatpush1.bf16.msra.mxu0 %v8998_v24  ;;  %7010 = vmatpush1.bf16.msra.mxu1 %v9000_v25  ;;  %v9056_v24 = vcombine.low %v565_v10, %v569_v12  ;;  %v9063_v25 = vcombine.high %v572_v16, %v576_v17  ;;  %v624_v12 = vld [vmem:[%s10722_s15 + $0x960] sm:$0xff] }
  0xef   : > { %6683 = vmatprep.subr.bf16.mxu0 %v9007_v26  ;;  %7011 = vmatprep.subr.bf16.mxu1 %v9009_v30  ;;  %v580_v26 = vld [vmem:[%s10722_s15 + $0x800] sm:$0xff]  ;;  %v585_v30 = vld [vmem:[%s10722_s15 + $0x828] sm:$0xff]  ;;  %v1408_v39 = vcombine.high %v10909_v31, %v10909_v31 }
  0xf0   : > { %v9073_v37 = vcombine.high %v581_v28, %v585_v30 }
  0xf1   : > { %v10924_v48 = vrot.slane %v1408_v39, %v10770_v53  ;;  %v649_v39 = vld [vmem:[%s10722_s15 + $0xa28] sm:$0xff] }
  0xf2   : > { %6684 = vmatpush1.bf16.msra.mxu0 %v9006_v32  ;;  %7012 = vmatpush1.bf16.msra.mxu1 %v9008_v33  ;;  %v9064_v32 = vcombine.low %v573_v18, %v577_v20  ;;  %v9071_v33 = vcombine.high %v580_v26, %v584_v27  ;;  %v632_v20 = vld [vmem:[%s10722_s15 + $0x9a0] sm:$0xff] }
  0xf3   : > { %6685 = vmatprep.subr.bf16.mxu0 %v9015_v34  ;;  %7013 = vmatprep.subr.bf16.mxu1 %v9017_v38  ;;  %v588_v34 = vld [vmem:[%s10722_s15 + $0x840] sm:$0xff]  ;;  %v593_v38 = vld [vmem:[%s10722_s15 + $0x868] sm:$0xff] }
  0xf4   : > { %v9079_v44 = vcombine.high %v588_v34, %v592_v35  ;;  %v9081_v45 = vcombine.high %v589_v36, %v593_v38  ;;  %v9080_v52 = vcombine.low %v589_v36, %v593_v38  ;;  %v644_v36 = vld [vmem:[%s10722_s15 + $0xa00] sm:$0xff]  ;;  %v645_v38 = vld [vmem:[%s10722_s15 + $0xa08] sm:$0xff] }
  0xf6   : > { %6686 = vmatpush1.bf16.msra.mxu0 %v9014_v40  ;;  %7014 = vmatpush1.bf16.msra.mxu1 %v9016_v41  ;;  %v10919_v40 = vcombine.high %v10834_v23, %v10834_v23  ;;  %v9070_v41 = vcombine.low %v580_v26, %v584_v27 }
  0xf7   : > { %6687 = vmatprep.subr.bf16.mxu0 %v9023_v42  ;;  %7015 = vmatprep.subr.bf16.mxu1 %v9025_v47  ;;  %v9072_v42 = vcombine.low %v581_v28, %v585_v30  ;;  %v600_v47 = vld [vmem:[%s10722_s15 + $0x8a0] sm:$0xff]  ;;  %v637_v30 = vld [vmem:[%s10722_s15 + $0x9c8] sm:$0xff] }
  0xf8   : > { %v9087_v54 = vcombine.high %v596_v46, %v600_v47  ;;  %v636_v28 = vld [vmem:[%s10722_s15 + $0x9c0] sm:$0xff] }
  0xfa   : > { %6688 = vmatpush1.bf16.msra.mxu0 %v9022_v49  ;;  %7016 = vmatpush1.bf16.msra.mxu1 %v9024_v50  ;;  %v597_v49 = vld [vmem:[%s10722_s15 + $0x888] sm:$0xff] }
  0xfb   : > { %6689 = vmatprep.subr.bf16.mxu0 %v9031_v51  ;;  %7017 = vmatprep.subr.bf16.mxu1 %v9033_v56  ;;  %v601_v50 = vld [vmem:[%s10722_s15 + $0x8a8] sm:$0xff]  ;;  %v9078_v51 = vcombine.low %v588_v34, %v592_v35  ;;  %v604_v56 = vld [vmem:[%s10722_s15 + $0x8c0] sm:$0xff] }
  0xfc   : > { %v9089_v55 = vcombine.high %v597_v49, %v601_v50  ;;  %v9088_v62 = vcombine.low %v597_v49, %v601_v50  ;;  %v9095_v0 = vcombine.high %v604_v56, %v608_v57  ;;  %v653_v49 = vld [vmem:[%s10722_s15 + $0xa48] sm:$0xff] }
  0xfd   : > { %v657_v50 = vld [vmem:[%s10722_s15 + $0xa68] sm:$0xff] }
  0xfe   : > { %6690 = vmatpush1.bf16.msra.mxu0 %v9030_v58  ;;  %7018 = vmatpush1.bf16.msra.mxu1 %v9032_v60  ;;  %v605_v58 = vld [vmem:[%s10722_s15 + $0x8c8] sm:$0xff] }
  0xff   : > { %6691 = vmatprep.subr.bf16.mxu0 %v9039_v61  ;;  %7019 = vmatprep.subr.bf16.mxu1 %v9041_v2  ;;  %v609_v60 = vld [vmem:[%s10722_s15 + $0x8e8] sm:$0xff]  ;;  %v9086_v61 = vcombine.low %v596_v46, %v600_v47  ;;  %v612_v2 = vld [vmem:[%s10722_s15 + $0x900] sm:$0xff] }
 0x100   : > { %v9097_v1 = vcombine.high %v605_v58, %v609_v60  ;;  %v9096_v7 = vcombine.low %v605_v58, %v609_v60  ;;  %v9103_v8 = vcombine.high %v612_v2, %v616_v3  ;;  %v652_v46 = vld [vmem:[%s10722_s15 + $0xa40] sm:$0xff]  ;;  %v661_v58 = vld [vmem:[%s10722_s15 + $0xa88] sm:$0xff] }
 0x101   : > { %v656_v47 = vld [vmem:[%s10722_s15 + $0xa60] sm:$0xff]  ;;  %v665_v60 = vld [vmem:[%s10722_s15 + $0xaa8] sm:$0xff] }
 0x102   : > { %6692 = vmatpush1.bf16.msra.mxu0 %v9038_v4  ;;  %7020 = vmatpush1.bf16.msra.mxu1 %v9040_v5  ;;  %v613_v4 = vld [vmem:[%s10722_s15 + $0x908] sm:$0xff] }
 0x103   : > { %6693 = vmatprep.subr.bf16.mxu0 %v9047_v6  ;;  %7021 = vmatprep.subr.bf16.mxu1 %v9049_v11  ;;  %v617_v5 = vld [vmem:[%s10722_s15 + $0x928] sm:$0xff]  ;;  %v9094_v6 = vcombine.low %v604_v56, %v608_v57  ;;  %v620_v11 = vld [vmem:[%s10722_s15 + $0x940] sm:$0xff] }
 0x104   : > { %v9105_v10 = vcombine.high %v613_v4, %v617_v5  ;;  %v9104_v16 = vcombine.low %v613_v4, %v617_v5  ;;  %v9111_v17 = vcombine.high %v620_v11, %v624_v12  ;;  %v660_v56 = vld [vmem:[%s10722_s15 + $0xa80] sm:$0xff]  ;;  %v669_v4 = vld [vmem:[%s10722_s15 + $0xac8] sm:$0xff] }
 0x105   : > { %v664_v57 = vld [vmem:[%s10722_s15 + $0xaa0] sm:$0xff]  ;;  %v673_v5 = vld [vmem:[%s10722_s15 + $0xae8] sm:$0xff] }
 0x106   : > { %6694 = vmatpush1.bf16.msra.mxu0 %v9046_v13  ;;  %7022 = vmatpush1.bf16.msra.mxu1 %v9048_v14  ;;  %v621_v13 = vld [vmem:[%s10722_s15 + $0x948] sm:$0xff] }
 0x107   : > { %6695 = vmatprep.subr.bf16.mxu0 %v9055_v15  ;;  %7023 = vmatprep.subr.bf16.mxu1 %v9057_v19  ;;  %v625_v14 = vld [vmem:[%s10722_s15 + $0x968] sm:$0xff]  ;;  %v9102_v15 = vcombine.low %v612_v2, %v616_v3  ;;  %v628_v19 = vld [vmem:[%s10722_s15 + $0x980] sm:$0xff] }
 0x108   : > { %v9113_v18 = vcombine.high %v621_v13, %v625_v14  ;;  %v9119_v26 = vcombine.high %v628_v19, %v632_v20  ;;  %v668_v2 = vld [vmem:[%s10722_s15 + $0xac0] sm:$0xff] }
 0x109   : > { %v672_v3 = vld [vmem:[%s10722_s15 + $0xae0] sm:$0xff] }
 0x10a   : > { %6696 = vmatpush1.bf16.msra.mxu0 %v9054_v22  ;;  %7024 = vmatpush1.bf16.msra.mxu1 %v9056_v24  ;;  %v633_v22 = vld [vmem:[%s10722_s15 + $0x9a8] sm:$0xff]  ;;  %v9110_v24 = vcombine.low %v620_v11, %v624_v12  ;;  %v676_v11 = vld [vmem:[%s10722_s15 + $0xb00] sm:$0xff] }
 0x10b   : > { %6697 = vmatprep.subr.bf16.mxu0 %v9063_v25  ;;  %7025 = vmatprep.subr.bf16.mxu1 %v9065_v29  ;;  %v9112_v25 = vcombine.low %v621_v13, %v625_v14  ;;  %v9121_v27 = vcombine.high %v629_v21, %v633_v22  ;;  %v640_v29 = vld [vmem:[%s10722_s15 + $0x9e0] sm:$0xff]  ;;  %v677_v13 = vld [vmem:[%s10722_s15 + $0xb08] sm:$0xff] }
 0x10c   : > { %v9127_v34 = vcombine.high %v636_v28, %v640_v29  ;;  %v680_v12 = vld [vmem:[%s10722_s15 + $0xb20] sm:$0xff]  ;;  %v681_v14 = vld [vmem:[%s10722_s15 + $0xb28] sm:$0xff] }
 0x10e   : > { %6698 = vmatpush1.bf16.msra.mxu0 %v9062_v59  ;;  %7026 = vmatpush1.bf16.msra.mxu1 %v9064_v32  ;;  %v641_v59 = vld [vmem:[%s10722_s15 + $0x9e8] sm:$0xff]  ;;  %v9118_v32 = vcombine.low %v628_v19, %v632_v20  ;;  %v684_v19 = vld [vmem:[%s10722_s15 + $0xb40] sm:$0xff] }
 0x10f   : > { %6708 = vmatprep.subr.bf16.mxu0 %v9071_v33  ;;  %7036 = vmatprep.subr.bf16.mxu1 %v9073_v37  ;;  %v9120_v33 = vcombine.low %v629_v21, %v633_v22  ;;  %v9129_v35 = vcombine.high %v637_v30, %v641_v59  ;;  %v648_v37 = vld [vmem:[%s10722_s15 + $0xa20] sm:$0xff]  ;;  %v685_v21 = vld [vmem:[%s10722_s15 + $0xb48] sm:$0xff] }
 0x110   : > { %v688_v20 = vld [vmem:[%s10722_s15 + $0xb60] sm:$0xff]  ;;  %v689_v22 = vld [vmem:[%s10722_s15 + $0xb68] sm:$0xff] }
 0x111   : > { %6700 = vmatmul.mubr.bf16.vlgmr.msra.gmra.mrb[0].mxu0 %v10919_v40  ;;  %7028 = vmatmul.mubr.bf16.vlgmr.msra.gmra.mrb[0].mxu1 %v10919_v40 }
 0x112   : > { %6709 = vmatpush1.bf16.msra.mxu0 %v9070_v41  ;;  %7037 = vmatpush1.bf16.msra.mxu1 %v9072_v42  ;;  %v9126_v41 = vcombine.low %v636_v28, %v640_v29  ;;  %v9128_v42 = vcombine.low %v637_v30, %v641_v59  ;;  %v692_v28 = vld [vmem:[%s10722_s15 + $0xb80] sm:$0xff]  ;;  %v693_v30 = vld [vmem:[%s10722_s15 + $0xb88] sm:$0xff] }
 0x113   : > { %6710 = vmatprep.subr.bf16.mxu0 %v9079_v44  ;;  %7038 = vmatprep.subr.bf16.mxu1 %v9081_v45  ;;  %v9135_v44 = vcombine.high %v644_v36, %v648_v37  ;;  %v9137_v45 = vcombine.high %v645_v38, %v649_v39  ;;  %v696_v29 = vld [vmem:[%s10722_s15 + $0xba0] sm:$0xff]  ;;  %v697_v59 = vld [vmem:[%s10722_s15 + $0xba8] sm:$0xff] }
 0x114   : > { %6740 = vmatprep.mubr.bf16.mxu0 %v10924_v48  ;;  %7068 = vmatprep.mubr.bf16.mxu1 %v10924_v48 }
 0x116   : > { %6711 = vmatpush1.bf16.msra.mxu0 %v9078_v51  ;;  %7039 = vmatpush1.bf16.msra.mxu1 %v9080_v52  ;;  %v9134_v51 = vcombine.low %v644_v36, %v648_v37  ;;  %v9136_v52 = vcombine.low %v645_v38, %v649_v39  ;;  %v700_v36 = vld [vmem:[%s10722_s15 + $0xbc0] sm:$0xff]  ;;  %v701_v38 = vld [vmem:[%s10722_s15 + $0xbc8] sm:$0xff] }
 0x117   : > { %6712 = vmatprep.subr.bf16.mxu0 %v9087_v54  ;;  %7040 = vmatprep.subr.bf16.mxu1 %v9089_v55  ;;  %v9143_v54 = vcombine.high %v652_v46, %v656_v47  ;;  %v9145_v55 = vcombine.high %v653_v49, %v657_v50  ;;  %v704_v37 = vld [vmem:[%s10722_s15 + $0xbe0] sm:$0xff]  ;;  %v705_v39 = vld [vmem:[%s10722_s15 + $0xbe8] sm:$0xff] }
 0x11a   : > { %6713 = vmatpush1.bf16.msra.mxu0 %v9086_v61  ;;  %7041 = vmatpush1.bf16.msra.mxu1 %v9088_v62  ;;  %v9142_v61 = vcombine.low %v652_v46, %v656_v47  ;;  %v9144_v62 = vcombine.low %v653_v49, %v657_v50  ;;  %v708_v46 = vld [vmem:[%s10722_s15 + $0xc00] sm:$0xff]  ;;  %v709_v49 = vld [vmem:[%s10722_s15 + $0xc08] sm:$0xff] }
 0x11b   : > { %6714 = vmatprep.subr.bf16.mxu0 %v9095_v0  ;;  %7042 = vmatprep.subr.bf16.mxu1 %v9097_v1  ;;  %v9151_v0 = vcombine.high %v660_v56, %v664_v57  ;;  %v9153_v1 = vcombine.high %v661_v58, %v665_v60  ;;  %v712_v47 = vld [vmem:[%s10722_s15 + $0xc20] sm:$0xff]  ;;  %v713_v50 = vld [vmem:[%s10722_s15 + $0xc28] sm:$0xff] }
 0x11e   : > { %6715 = vmatpush1.bf16.msra.mxu0 %v9094_v6  ;;  %7043 = vmatpush1.bf16.msra.mxu1 %v9096_v7  ;;  %v9150_v6 = vcombine.low %v660_v56, %v664_v57  ;;  %v9152_v7 = vcombine.low %v661_v58, %v665_v60  ;;  %v716_v56 = vld [vmem:[%s10722_s15 + $0xc40] sm:$0xff]  ;;  %v10992_v58 = vrot.slane %v10909_v31, %v10770_v53  ;;  %v717_v60 = vld [vmem:[%s10722_s15 + $0xc48] sm:$0xff] }
 0x11f   : > { %6716 = vmatprep.subr.bf16.mxu0 %v9103_v8  ;;  %7044 = vmatprep.subr.bf16.mxu1 %v9105_v10  ;;  %v9159_v8 = vcombine.high %v668_v2, %v672_v3  ;;  %v9161_v10 = vcombine.high %v669_v4, %v673_v5  ;;  %v720_v57 = vld [vmem:[%s10722_s15 + $0xc60] sm:$0xff]  ;;  %v725_v31 = vld [vmem:[%s10722_s15 + $0xc88] sm:$0xff] }
 0x122   : > { %6717 = vmatpush1.bf16.msra.mxu0 %v9102_v15  ;;  %7045 = vmatpush1.bf16.msra.mxu1 %v9104_v16  ;;  %v9158_v15 = vcombine.low %v668_v2, %v672_v3  ;;  %v9160_v16 = vcombine.low %v669_v4, %v673_v5  ;;  %v724_v3 = vld [vmem:[%s10722_s15 + $0xc80] sm:$0xff]  ;;  %v11000_v5 = vcombine.high %v10924_v48, %v10924_v48 }
 0x123   : > { %6718 = vmatprep.subr.bf16.mxu0 %v9111_v17  ;;  %7046 = vmatprep.subr.bf16.mxu1 %v9113_v18  ;;  %v9167_v17 = vcombine.high %v676_v11, %v680_v12  ;;  %v9169_v18 = vcombine.high %v677_v13, %v681_v14  ;;  %v728_v4 = vld [vmem:[%s10722_s15 + $0xca0] sm:$0xff] }
 0x126   : > { %6719 = vmatpush1.bf16.msra.mxu0 %v9110_v24  ;;  %7047 = vmatpush1.bf16.msra.mxu1 %v9112_v25  ;;  %v9166_v24 = vcombine.low %v676_v11, %v680_v12  ;;  %v9168_v25 = vcombine.low %v677_v13, %v681_v14  ;;  %v732_v12 = vld [vmem:[%s10722_s15 + $0xcc0] sm:$0xff]  ;;  %v733_v14 = vld [vmem:[%s10722_s15 + $0xcc8] sm:$0xff] }
 0x127   : > { %6720 = vmatprep.subr.bf16.mxu0 %v9119_v26  ;;  %7048 = vmatprep.subr.bf16.mxu1 %v9121_v27  ;;  %v9175_v26 = vcombine.high %v684_v19, %v688_v20  ;;  %v9177_v27 = vcombine.high %v685_v21, %v689_v22  ;;  %v736_v13 = vld [vmem:[%s10722_s15 + $0xce0] sm:$0xff] }
 0x12a   : > { %6721 = vmatpush1.bf16.msra.mxu0 %v9118_v32  ;;  %7049 = vmatpush1.bf16.msra.mxu1 %v9120_v33  ;;  %v9174_v32 = vcombine.low %v684_v19, %v688_v20  ;;  %v9176_v33 = vcombine.low %v685_v21, %v689_v22  ;;  %v740_v20 = vld [vmem:[%s10722_s15 + $0xd00] sm:$0xff]  ;;  %v741_v22 = vld [vmem:[%s10722_s15 + $0xd08] sm:$0xff] }
 0x12b   : > { %6722 = vmatprep.subr.bf16.mxu0 %v9127_v34  ;;  %7050 = vmatprep.subr.bf16.mxu1 %v9129_v35  ;;  %v9183_v34 = vcombine.high %v692_v28, %v696_v29  ;;  %v9185_v35 = vcombine.high %v693_v30, %v697_v59  ;;  %v744_v21 = vld [vmem:[%s10722_s15 + $0xd20] sm:$0xff] }
 0x12e   : > { %6723 = vmatpush1.bf16.msra.mxu0 %v9126_v41  ;;  %7051 = vmatpush1.bf16.msra.mxu1 %v9128_v42  ;;  %v9182_v41 = vcombine.low %v692_v28, %v696_v29  ;;  %v9184_v42 = vcombine.low %v693_v30, %v697_v59  ;;  %v748_v29 = vld [vmem:[%s10722_s15 + $0xd40] sm:$0xff]  ;;  %v749_v59 = vld [vmem:[%s10722_s15 + $0xd48] sm:$0xff] }
 0x12f   : > { %6724 = vmatprep.subr.bf16.mxu0 %v9135_v44  ;;  %7052 = vmatprep.subr.bf16.mxu1 %v9137_v45  ;;  %v9191_v44 = vcombine.high %v700_v36, %v704_v37  ;;  %v9193_v45 = vcombine.high %v701_v38, %v705_v39  ;;  %v752_v30 = vld [vmem:[%s10722_s15 + $0xd60] sm:$0xff] }
 0x132   : > { %6725 = vmatpush1.bf16.msra.mxu0 %v9134_v51  ;;  %7053 = vmatpush1.bf16.msra.mxu1 %v9136_v52  ;;  %v9190_v51 = vcombine.low %v700_v36, %v704_v37  ;;  %v9192_v52 = vcombine.low %v701_v38, %v705_v39  ;;  %v756_v37 = vld [vmem:[%s10722_s15 + $0xd80] sm:$0xff]  ;;  %v757_v39 = vld [vmem:[%s10722_s15 + $0xd88] sm:$0xff] }
 0x133   : > { %6726 = vmatprep.subr.bf16.mxu0 %v9143_v54  ;;  %7054 = vmatprep.subr.bf16.mxu1 %v9145_v55  ;;  %v9199_v54 = vcombine.high %v708_v46, %v712_v47  ;;  %v9201_v55 = vcombine.high %v709_v49, %v713_v50  ;;  %v760_v38 = vld [vmem:[%s10722_s15 + $0xda0] sm:$0xff] }
 0x136   : > { %6727 = vmatpush1.bf16.msra.mxu0 %v9142_v61  ;;  %7055 = vmatpush1.bf16.msra.mxu1 %v9144_v62  ;;  %v721_v61 = vld [vmem:[%s10722_s15 + $0xc68] sm:$0xff]  ;;  %v9198_v62 = vcombine.low %v708_v46, %v712_v47  ;;  %v764_v47 = vld [vmem:[%s10722_s15 + $0xdc0] sm:$0xff] }
 0x137   : > { %6728 = vmatprep.subr.bf16.mxu0 %v9151_v0  ;;  %7056 = vmatprep.subr.bf16.mxu1 %v9153_v1  ;;  %v9200_v0 = vcombine.low %v709_v49, %v713_v50  ;;  %v9207_v1 = vcombine.high %v716_v56, %v720_v57  ;;  %v9209_v2 = vcombine.high %v717_v60, %v721_v61  ;;  %v768_v49 = vld [vmem:[%s10722_s15 + $0xde0] sm:$0xff]  ;;  %v765_v50 = vld [vmem:[%s10722_s15 + $0xdc8] sm:$0xff] }
 0x13a   : > { %6729 = vmatpush1.bf16.msra.mxu0 %v9150_v6  ;;  %7057 = vmatpush1.bf16.msra.mxu1 %v9152_v7  ;;  %v729_v6 = vld [vmem:[%s10722_s15 + $0xca8] sm:$0xff]  ;;  %v9206_v7 = vcombine.low %v716_v56, %v720_v57  ;;  %v772_v57 = vld [vmem:[%s10722_s15 + $0xe00] sm:$0xff] }
 0x13b   : > { %6730 = vmatprep.subr.bf16.mxu0 %v9159_v8  ;;  %7058 = vmatprep.subr.bf16.mxu1 %v9161_v10  ;;  %v9208_v8 = vcombine.low %v717_v60, %v721_v61  ;;  %v9215_v10 = vcombine.high %v724_v3, %v728_v4  ;;  %v9217_v11 = vcombine.high %v725_v31, %v729_v6  ;;  %v776_v60 = vld [vmem:[%s10722_s15 + $0xe20] sm:$0xff]  ;;  %v773_v61 = vld [vmem:[%s10722_s15 + $0xe08] sm:$0xff] }
 0x13e   : > { %6731 = vmatpush1.bf16.msra.mxu0 %v9158_v15  ;;  %7059 = vmatpush1.bf16.msra.mxu1 %v9160_v16  ;;  %v737_v15 = vld [vmem:[%s10722_s15 + $0xce8] sm:$0xff]  ;;  %v9214_v16 = vcombine.low %v724_v3, %v728_v4  ;;  %v780_v4 = vld [vmem:[%s10722_s15 + $0xe40] sm:$0xff] }
 0x13f   : > { %6732 = vmatprep.subr.bf16.mxu0 %v9167_v17  ;;  %7060 = vmatprep.subr.bf16.mxu1 %v9169_v18  ;;  %v9216_v17 = vcombine.low %v725_v31, %v729_v6  ;;  %v9223_v18 = vcombine.high %v732_v12, %v736_v13  ;;  %v9225_v19 = vcombine.high %v733_v14, %v737_v15  ;;  %v784_v31 = vld [vmem:[%s10722_s15 + $0xe60] sm:$0xff]  ;;  %v781_v6 = vld [vmem:[%s10722_s15 + $0xe48] sm:$0xff] }
 0x142   : > { %6733 = vmatpush1.bf16.msra.mxu0 %v9166_v24  ;;  %7061 = vmatpush1.bf16.msra.mxu1 %v9168_v25  ;;  %v745_v24 = vld [vmem:[%s10722_s15 + $0xd28] sm:$0xff]  ;;  %v9222_v25 = vcombine.low %v732_v12, %v736_v13  ;;  %v788_v13 = vld [vmem:[%s10722_s15 + $0xe80] sm:$0xff] }
 0x143   : > { %6734 = vmatprep.subr.bf16.mxu0 %v9175_v26  ;;  %7062 = vmatprep.subr.bf16.mxu1 %v9177_v27  ;;  %v9224_v26 = vcombine.low %v733_v14, %v737_v15  ;;  %v9231_v27 = vcombine.high %v740_v20, %v744_v21  ;;  %v9233_v28 = vcombine.high %v741_v22, %v745_v24  ;;  %v792_v14 = vld [vmem:[%s10722_s15 + $0xea0] sm:$0xff]  ;;  %v789_v15 = vld [vmem:[%s10722_s15 + $0xe88] sm:$0xff] }
 0x146   : > { %6735 = vmatpush1.bf16.msra.mxu0 %v9174_v32  ;;  %7063 = vmatpush1.bf16.msra.mxu1 %v9176_v33  ;;  %v753_v32 = vld [vmem:[%s10722_s15 + $0xd68] sm:$0xff]  ;;  %v9230_v33 = vcombine.low %v740_v20, %v744_v21  ;;  %v796_v21 = vld [vmem:[%s10722_s15 + $0xec0] sm:$0xff] }
 0x147   : > { %6736 = vmatprep.subr.bf16.mxu0 %v9183_v34  ;;  %7064 = vmatprep.subr.bf16.mxu1 %v9185_v35  ;;  %v9232_v34 = vcombine.low %v741_v22, %v745_v24  ;;  %v9239_v35 = vcombine.high %v748_v29, %v752_v30  ;;  %v9241_v36 = vcombine.high %v749_v59, %v753_v32  ;;  %v800_v22 = vld [vmem:[%s10722_s15 + $0xee0] sm:$0xff]  ;;  %v797_v24 = vld [vmem:[%s10722_s15 + $0xec8] sm:$0xff] }
 0x14a   : > { %6737 = vmatpush1.bf16.msra.mxu0 %v9182_v41  ;;  %7065 = vmatpush1.bf16.msra.mxu1 %v9184_v42  ;;  %v761_v41 = vld [vmem:[%s10722_s15 + $0xda8] sm:$0xff]  ;;  %v9238_v42 = vcombine.low %v748_v29, %v752_v30  ;;  %v804_v30 = vld [vmem:[%s10722_s15 + $0xf00] sm:$0xff] }
 0x14b   : > { %6738 = vmatprep.subr.bf16.mxu0 %v9191_v44  ;;  %7066 = vmatprep.subr.bf16.mxu1 %v9193_v45  ;;  %v9240_v44 = vcombine.low %v749_v59, %v753_v32  ;;  %v9247_v45 = vcombine.high %v756_v37, %v760_v38  ;;  %v9249_v46 = vcombine.high %v757_v39, %v761_v41  ;;  %v808_v59 = vld [vmem:[%s10722_s15 + $0xf20] sm:$0xff]  ;;  %v805_v32 = vld [vmem:[%s10722_s15 + $0xf08] sm:$0xff] }
 0x14e   : > { %6739 = vmatpush1.bf16.msra.mxu0 %v9190_v51  ;;  %7067 = vmatpush1.bf16.msra.mxu1 %v9192_v52  ;;  %v769_v51 = vld [vmem:[%s10722_s15 + $0xde8] sm:$0xff]  ;;  %v9246_v52 = vcombine.low %v756_v37, %v760_v38  ;;  %v812_v38 = vld [vmem:[%s10722_s15 + $0xf40] sm:$0xff] }
 0x14f   : > { %6749 = vmatprep.subr.bf16.mxu0 %v9199_v54  ;;  %7077 = vmatprep.subr.bf16.mxu1 %v9201_v55  ;;  %v9248_v54 = vcombine.low %v757_v39, %v761_v41  ;;  %v9255_v55 = vcombine.high %v764_v47, %v768_v49  ;;  %v9257_v56 = vcombine.high %v765_v50, %v769_v51  ;;  %v816_v39 = vld [vmem:[%s10722_s15 + $0xf60] sm:$0xff]  ;;  %v813_v41 = vld [vmem:[%s10722_s15 + $0xf48] sm:$0xff] }
 0x151   : > { %6741 = vmatmul.mubr.bf16.vlgmr.msra.gmra.mrb[0].mxu0 %v10992_v58  ;;  %7069 = vmatmul.mubr.bf16.vlgmr.msra.gmra.mrb[0].mxu1 %v10992_v58 }
 0x152   : > { %6750 = vmatpush1.bf16.msra.mxu0 %v9198_v62  ;;  %7078 = vmatpush1.bf16.msra.mxu1 %v9200_v0  ;;  %v777_v62 = vld [vmem:[%s10722_s15 + $0xe28] sm:$0xff]  ;;  %v9254_v0 = vcombine.low %v764_v47, %v768_v49  ;;  %v820_v49 = vld [vmem:[%s10722_s15 + $0xf80] sm:$0xff] }
 0x153   : > { %6751 = vmatprep.subr.bf16.mxu0 %v9207_v1  ;;  %7079 = vmatprep.subr.bf16.mxu1 %v9209_v2  ;;  %v9256_v1 = vcombine.low %v765_v50, %v769_v51  ;;  %v9263_v2 = vcombine.high %v772_v57, %v776_v60  ;;  %v9265_v3 = vcombine.high %v773_v61, %v777_v62  ;;  %v824_v50 = vld [vmem:[%s10722_s15 + $0xfa0] sm:$0xff]  ;;  %v821_v51 = vld [vmem:[%s10722_s15 + $0xf88] sm:$0xff] }
 0x154   : > { %6781 = vmatprep.mubr.bf16.mxu0 %v11000_v5  ;;  %7109 = vmatprep.mubr.bf16.mxu1 %v11000_v5 }
 0x156   : > { %6752 = vmatpush1.bf16.msra.mxu0 %v9206_v7  ;;  %7080 = vmatpush1.bf16.msra.mxu1 %v9208_v8  ;;  %v785_v7 = vld [vmem:[%s10722_s15 + $0xe68] sm:$0xff]  ;;  %v9262_v8 = vcombine.low %v772_v57, %v776_v60  ;;  %v828_v60 = vld [vmem:[%s10722_s15 + $0xfc0] sm:$0xff] }
 0x157   : > { %6753 = vmatprep.subr.bf16.mxu0 %v9215_v10  ;;  %7081 = vmatprep.subr.bf16.mxu1 %v9217_v11  ;;  %v9264_v10 = vcombine.low %v773_v61, %v777_v62  ;;  %v9271_v11 = vcombine.high %v780_v4, %v784_v31  ;;  %v9273_v12 = vcombine.high %v781_v6, %v785_v7  ;;  %v832_v61 = vld [vmem:[%s10722_s15 + $0xfe0] sm:$0xff]  ;;  %v829_v62 = vld [vmem:[%s10722_s15 + $0xfc8] sm:$0xff] }
 0x15a   : > { %6754 = vmatpush1.bf16.msra.mxu0 %v9214_v16  ;;  %7082 = vmatpush1.bf16.msra.mxu1 %v9216_v17  ;;  %v793_v16 = vld [vmem:[%s10722_s15 + $0xea8] sm:$0xff]  ;;  %v9270_v17 = vcombine.low %v780_v4, %v784_v31  ;;  %v9319_v4 = vcombine.high %v828_v60, %v832_v61 }
 0x15b   : > { %6755 = vmatprep.subr.bf16.mxu0 %v9223_v18  ;;  %7083 = vmatprep.subr.bf16.mxu1 %v9225_v19  ;;  %v9272_v18 = vcombine.low %v781_v6, %v785_v7  ;;  %v9279_v19 = vcombine.high %v788_v13, %v792_v14  ;;  %v9281_v20 = vcombine.high %v789_v15, %v793_v16  ;;  %v836_v6 = vld [vmem:[%s10722_s15 + $0x1000] sm:$0xff] }
 0x15c   : > { %v840_v7 = vld [vmem:[%s10722_s15 + $0x1020] sm:$0xff] }
 0x15e   : > { %6756 = vmatpush1.bf16.msra.mxu0 %v9222_v25  ;;  %7084 = vmatpush1.bf16.msra.mxu1 %v9224_v26  ;;  %v801_v25 = vld [vmem:[%s10722_s15 + $0xee8] sm:$0xff]  ;;  %v9278_v26 = vcombine.low %v788_v13, %v792_v14  ;;  %v9327_v14 = vcombine.high %v836_v6, %v840_v7 }
 0x15f   : > { %6757 = vmatprep.subr.bf16.mxu0 %v9231_v27  ;;  %7085 = vmatprep.subr.bf16.mxu1 %v9233_v28  ;;  %v9280_v27 = vcombine.low %v789_v15, %v793_v16  ;;  %v9287_v28 = vcombine.high %v796_v21, %v800_v22  ;;  %v9289_v29 = vcombine.high %v797_v24, %v801_v25  ;;  %v844_v16 = vld [vmem:[%s10722_s15 + $0x1040] sm:$0xff] }
 0x162   : > { %6758 = vmatpush1.bf16.msra.mxu0 %v9230_v33  ;;  %7086 = vmatpush1.bf16.msra.mxu1 %v9232_v34  ;;  %v809_v33 = vld [vmem:[%s10722_s15 + $0xf28] sm:$0xff]  ;;  %v9286_v34 = vcombine.low %v796_v21, %v800_v22  ;;  %v9326_v22 = vcombine.low %v836_v6, %v840_v7 }
 0x163   : > { %6759 = vmatprep.subr.bf16.mxu0 %v9239_v35  ;;  %7087 = vmatprep.subr.bf16.mxu1 %v9241_v36  ;;  %v9288_v35 = vcombine.low %v797_v24, %v801_v25  ;;  %v9295_v36 = vcombine.high %v804_v30, %v808_v59  ;;  %v9297_v37 = vcombine.high %v805_v32, %v809_v33  ;;  %v849_v21 = vld [vmem:[%s10722_s15 + $0x1068] sm:$0xff] }
 0x164   : > { %v885_v6 = vld [vmem:[%s10722_s15 + $0x1188] sm:$0xff] }
 0x165   : > { %v889_v7 = vld [vmem:[%s10722_s15 + $0x11a8] sm:$0xff] }
 0x166   : > { %6760 = vmatpush1.bf16.msra.mxu0 %v9238_v42  ;;  %7088 = vmatpush1.bf16.msra.mxu1 %v9240_v44  ;;  %v817_v42 = vld [vmem:[%s10722_s15 + $0xf68] sm:$0xff]  ;;  %v9294_v44 = vcombine.low %v804_v30, %v808_v59 }
 0x167   : > { %6761 = vmatprep.subr.bf16.mxu0 %v9247_v45  ;;  %7089 = vmatprep.subr.bf16.mxu1 %v9249_v46  ;;  %v9296_v45 = vcombine.low %v805_v32, %v809_v33  ;;  %v9303_v46 = vcombine.high %v812_v38, %v816_v39  ;;  %v9305_v47 = vcombine.high %v813_v41, %v817_v42  ;;  %v853_v30 = vld [vmem:[%s10722_s15 + $0x1088] sm:$0xff] }
 0x168   : > { %v857_v59 = vld [vmem:[%s10722_s15 + $0x10a8] sm:$0xff] }
 0x16a   : > { %6762 = vmatpush1.bf16.msra.mxu0 %v9246_v52  ;;  %7090 = vmatpush1.bf16.msra.mxu1 %v9248_v54  ;;  %v825_v52 = vld [vmem:[%s10722_s15 + $0xfa8] sm:$0xff]  ;;  %v9302_v54 = vcombine.low %v812_v38, %v816_v39 }
 0x16b   : > { %6763 = vmatprep.subr.bf16.mxu0 %v9255_v55  ;;  %7091 = vmatprep.subr.bf16.mxu1 %v9257_v56  ;;  %v9304_v55 = vcombine.low %v813_v41, %v817_v42  ;;  %v9311_v56 = vcombine.high %v820_v49, %v824_v50  ;;  %v9313_v57 = vcombine.high %v821_v51, %v825_v52  ;;  %v861_v38 = vld [vmem:[%s10722_s15 + $0x10c8] sm:$0xff] }
 0x16c   : > { %v865_v39 = vld [vmem:[%s10722_s15 + $0x10e8] sm:$0xff]  ;;  %v9344_v42 = vcombine.low %v853_v30, %v857_v59 }
 0x16e   : > { %6764 = vmatpush1.bf16.msra.mxu0 %v9254_v0  ;;  %7092 = vmatpush1.bf16.msra.mxu1 %v9256_v1  ;;  %v833_v0 = vld [vmem:[%s10722_s15 + $0xfe8] sm:$0xff] }
 0x16f   : > { %6765 = vmatprep.subr.bf16.mxu0 %v9263_v2  ;;  %7093 = vmatprep.subr.bf16.mxu1 %v9265_v3  ;;  %v11063_v1 = vld [vmem:[%s12065_s0 + $0x8] sm:$0xff]  ;;  %v9310_v2 = vcombine.low %v820_v49, %v824_v50  ;;  %v9312_v3 = vcombine.low %v821_v51, %v825_v52  ;;  %v9321_v31 = vcombine.high %v829_v62, %v833_v0 }
 0x170   : > { %v9320_v13 = vcombine.low %v829_v62, %v833_v0  ;;  %v869_v49 = vld [vmem:[%s10722_s15 + $0x1108] sm:$0xff]  ;;  %v9352_v52 = vcombine.low %v861_v38, %v865_v39 }
 0x171   : > { %v873_v50 = vld [vmem:[%s10722_s15 + $0x1128] sm:$0xff] }
 0x172   : > { %6766 = vmatpush1.bf16.msra.mxu0 %v9262_v8  ;;  %7094 = vmatpush1.bf16.msra.mxu1 %v9264_v10  ;;  %v11069_v8 = vrot.slane %v11063_v1, %v10770_v53  ;;  %v837_v10 = vld [vmem:[%s10722_s15 + $0x1008] sm:$0xff]  ;;  %v9360_v0 = vcombine.low %v869_v49, %v873_v50 }
 0x173   : > { %6767 = vmatprep.subr.bf16.mxu0 %v9271_v11  ;;  %7095 = vmatprep.subr.bf16.mxu1 %v9273_v12  ;;  %v841_v11 = vld [vmem:[%s10722_s15 + $0x1028] sm:$0xff]  ;;  %v9318_v12 = vcombine.low %v828_v60, %v832_v61 }
 0x174   : > { %v9329_v15 = vcombine.high %v837_v10, %v841_v11  ;;  %v9328_v24 = vcombine.low %v837_v10, %v841_v11  ;;  %v877_v60 = vld [vmem:[%s10722_s15 + $0x1148] sm:$0xff] }
 0x175   : > { %v881_v61 = vld [vmem:[%s10722_s15 + $0x1168] sm:$0xff] }
 0x176   : > { %6768 = vmatpush1.bf16.msra.mxu0 %v9270_v17  ;;  %7096 = vmatpush1.bf16.msra.mxu1 %v9272_v18  ;;  %v848_v17 = vld [vmem:[%s10722_s15 + $0x1060] sm:$0xff]  ;;  %v1456_v18 = vcombine.high %v11069_v8, %v11069_v8  ;;  %v9368_v11 = vcombine.low %v877_v60, %v881_v61 }
 0x177   : > { %6769 = vmatprep.subr.bf16.mxu0 %v9279_v19  ;;  %7097 = vmatprep.subr.bf16.mxu1 %v9281_v20  ;;  %v11079_v19 = vcombine.high %v10992_v58, %v10992_v58  ;;  %v845_v20 = vld [vmem:[%s10722_s15 + $0x1048] sm:$0xff]  ;;  %v9335_v25 = vcombine.high %v844_v16, %v848_v17  ;;  %v9334_v32 = vcombine.low %v844_v16, %v848_v17 }
 0x178   : > { %v9336_v33 = vcombine.low %v845_v20, %v849_v21  ;;  %v893_v16 = vld [vmem:[%s10722_s15 + $0x11c8] sm:$0xff] }
 0x179   : > { %v897_v17 = vld [vmem:[%s10722_s15 + $0x11e8] sm:$0xff] }
 0x17a   : > { %6770 = vmatpush1.bf16.msra.mxu0 %v9278_v26  ;;  %7098 = vmatpush1.bf16.msra.mxu1 %v9280_v27  ;;  %v9337_v26 = vcombine.high %v845_v20, %v849_v21  ;;  %v852_v27 = vld [vmem:[%s10722_s15 + $0x1080] sm:$0xff]  ;;  %v9376_v20 = vcombine.low %v885_v6, %v889_v7 }
 0x17b   : > { %6771 = vmatprep.subr.bf16.mxu0 %v9287_v28  ;;  %7099 = vmatprep.subr.bf16.mxu1 %v9289_v29  ;;  %v856_v28 = vld [vmem:[%s10722_s15 + $0x10a0] sm:$0xff]  ;;  %v11086_v29 = vrot.slane %v1456_v18, %v10770_v53 }
 0x17c   : > { %v9342_v41 = vcombine.low %v852_v27, %v856_v28 }
 0x17e   : > { %6772 = vmatpush1.bf16.msra.mxu0 %v9286_v34  ;;  %7100 = vmatpush1.bf16.msra.mxu1 %v9288_v35  ;;  %v9343_v34 = vcombine.high %v852_v27, %v856_v28  ;;  %v9345_v35 = vcombine.high %v853_v30, %v857_v59  ;;  %v905_v27 = vld [vmem:[%s10722_s15 + $0x1228] sm:$0xff]  ;;  %v9384_v30 = vcombine.low %v893_v16, %v897_v17 }
 0x17f   : > { %6773 = vmatprep.subr.bf16.mxu0 %v9295_v36  ;;  %7101 = vmatprep.subr.bf16.mxu1 %v9297_v37  ;;  %v860_v36 = vld [vmem:[%s10722_s15 + $0x10c0] sm:$0xff] }
 0x180   : > { %v864_v37 = vld [vmem:[%s10722_s15 + $0x10e0] sm:$0xff] }
 0x181   : > { %v9350_v51 = vcombine.low %v860_v36, %v864_v37 }
 0x182   : > { %6774 = vmatpush1.bf16.msra.mxu0 %v9294_v44  ;;  %7102 = vmatpush1.bf16.msra.mxu1 %v9296_v45  ;;  %v9351_v44 = vcombine.high %v860_v36, %v864_v37  ;;  %v9353_v45 = vcombine.high %v861_v38, %v865_v39  ;;  %v913_v36 = vld [vmem:[%s10722_s15 + $0x1268] sm:$0xff] }
 0x183   : > { %6775 = vmatprep.subr.bf16.mxu0 %v9303_v46  ;;  %7103 = vmatprep.subr.bf16.mxu1 %v9305_v47  ;;  %v868_v46 = vld [vmem:[%s10722_s15 + $0x1100] sm:$0xff] }
 0x184   : > { %v872_v47 = vld [vmem:[%s10722_s15 + $0x1120] sm:$0xff] }
 0x185   : > { %v9358_v62 = vcombine.low %v868_v46, %v872_v47 }
 0x186   : > { %6776 = vmatpush1.bf16.msra.mxu0 %v9302_v54  ;;  %7104 = vmatpush1.bf16.msra.mxu1 %v9304_v55  ;;  %v9359_v54 = vcombine.high %v868_v46, %v872_v47  ;;  %v9361_v55 = vcombine.high %v869_v49, %v873_v50  ;;  %v921_v46 = vld [vmem:[%s10722_s15 + $0x12a8] sm:$0xff] }
 0x187   : > { %6777 = vmatprep.subr.bf16.mxu0 %v9311_v56  ;;  %7105 = vmatprep.subr.bf16.mxu1 %v9313_v57  ;;  %v876_v56 = vld [vmem:[%s10722_s15 + $0x1140] sm:$0xff] }
 0x188   : > { %v880_v57 = vld [vmem:[%s10722_s15 + $0x1160] sm:$0xff] }
 0x189   : > { %v9366_v10 = vcombine.low %v876_v56, %v880_v57 }
 0x18a   : > { %6778 = vmatpush1.bf16.msra.mxu0 %v9310_v2  ;;  %7106 = vmatpush1.bf16.msra.mxu1 %v9312_v3  ;;  %v9367_v2 = vcombine.high %v876_v56, %v880_v57  ;;  %v9369_v3 = vcombine.high %v877_v60, %v881_v61  ;;  %v929_v56 = vld [vmem:[%s10722_s15 + $0x12e8] sm:$0xff] }
 0x18b   : > { %6779 = vmatprep.subr.bf16.mxu0 %v9319_v4  ;;  %7107 = vmatprep.subr.bf16.mxu1 %v9321_v31  ;;  %v884_v4 = vld [vmem:[%s10722_s15 + $0x1180] sm:$0xff] }
 0x18c   : > { %v888_v31 = vld [vmem:[%s10722_s15 + $0x11a0] sm:$0xff] }
 0x18d   : > { %v9374_v18 = vcombine.low %v884_v4, %v888_v31 }
 0x18e   : > { %6780 = vmatpush1.bf16.msra.mxu0 %v9318_v12  ;;  %7108 = vmatpush1.bf16.msra.mxu1 %v9320_v13  ;;  %v9375_v12 = vcombine.high %v884_v4, %v888_v31  ;;  %v9377_v13 = vcombine.high %v885_v6, %v889_v7  ;;  %v937_v4 = vld [vmem:[%s10722_s15 + $0x1328] sm:$0xff] }
 0x18f   : > { %6790 = vmatprep.subr.bf16.mxu0 %v9327_v14  ;;  %7118 = vmatprep.subr.bf16.mxu1 %v9329_v15  ;;  %v892_v14 = vld [vmem:[%s10722_s15 + $0x11c0] sm:$0xff] }
 0x190   : > { %v896_v15 = vld [vmem:[%s10722_s15 + $0x11e0] sm:$0xff] }
 0x191   : > { %6782 = vmatmul.mubr.bf16.vlgmr.msra.gmra.mrb[0].mxu0 %v11079_v19  ;;  %7110 = vmatmul.mubr.bf16.vlgmr.msra.gmra.mrb[0].mxu1 %v11079_v19  ;;  %v9383_v21 = vcombine.high %v892_v14, %v896_v15  ;;  %v9382_v28 = vcombine.low %v892_v14, %v896_v15  ;;  %v945_v14 = vld [vmem:[%s10722_s15 + $0x1368] sm:$0xff] }
 0x192   : > { %6791 = vmatpush1.bf16.msra.mxu0 %v9326_v22  ;;  %7119 = vmatpush1.bf16.msra.mxu1 %v9328_v24  ;;  %v9385_v22 = vcombine.high %v893_v16, %v897_v17  ;;  %v900_v24 = vld [vmem:[%s10722_s15 + $0x1200] sm:$0xff] }
 0x193   : > { %6792 = vmatprep.subr.bf16.mxu0 %v9335_v25  ;;  %7120 = vmatprep.subr.bf16.mxu1 %v9337_v26  ;;  %v904_v25 = vld [vmem:[%s10722_s15 + $0x1220] sm:$0xff]  ;;  %v901_v26 = vld [vmem:[%s10722_s15 + $0x1208] sm:$0xff] }
 0x194   : > { %6822 = vmatprep.mubr.bf16.mxu0 %v11086_v29  ;;  %7150 = vmatprep.mubr.bf16.mxu1 %v11086_v29  ;;  %v9391_v59 = vcombine.high %v900_v24, %v904_v25  ;;  %v9390_v37 = vcombine.low %v900_v24, %v904_v25  ;;  %v9392_v38 = vcombine.low %v901_v26, %v905_v27  ;;  %v953_v24 = vld [vmem:[%s10722_s15 + $0x13a8] sm:$0xff] }
 0x196   : > { %6793 = vmatpush1.bf16.msra.mxu0 %v9334_v32  ;;  %7121 = vmatpush1.bf16.msra.mxu1 %v9336_v33  ;;  %v9393_v32 = vcombine.high %v901_v26, %v905_v27  ;;  %v908_v33 = vld [vmem:[%s10722_s15 + $0x1240] sm:$0xff] }
 0x197   : > { %6794 = vmatprep.subr.bf16.mxu0 %v9343_v34  ;;  %7122 = vmatprep.subr.bf16.mxu1 %v9345_v35  ;;  %v912_v34 = vld [vmem:[%s10722_s15 + $0x1260] sm:$0xff]  ;;  %v909_v35 = vld [vmem:[%s10722_s15 + $0x1248] sm:$0xff] }
 0x198   : > { %v9399_v39 = vcombine.high %v908_v33, %v912_v34  ;;  %v9398_v47 = vcombine.low %v908_v33, %v912_v34  ;;  %v9400_v49 = vcombine.low %v909_v35, %v913_v36  ;;  %v961_v33 = vld [vmem:[%s10722_s15 + $0x13e8] sm:$0xff] }
 0x19a   : > { %6795 = vmatpush1.bf16.msra.mxu0 %v9342_v41  ;;  %7123 = vmatpush1.bf16.msra.mxu1 %v9344_v42  ;;  %v9401_v41 = vcombine.high %v909_v35, %v913_v36  ;;  %v916_v42 = vld [vmem:[%s10722_s15 + $0x1280] sm:$0xff] }
 0x19b   : > { %6796 = vmatprep.subr.bf16.mxu0 %v9351_v44  ;;  %7124 = vmatprep.subr.bf16.mxu1 %v9353_v45  ;;  %v920_v44 = vld [vmem:[%s10722_s15 + $0x12a0] sm:$0xff]  ;;  %v917_v45 = vld [vmem:[%s10722_s15 + $0x1288] sm:$0xff] }
 0x19c   : > { %v9407_v50 = vcombine.high %v916_v42, %v920_v44  ;;  %v9406_v57 = vcombine.low %v916_v42, %v920_v44  ;;  %v9408_v60 = vcombine.low %v917_v45, %v921_v46  ;;  %v969_v42 = vld [vmem:[%s10722_s15 + $0x1428] sm:$0xff] }
 0x19e   : > { %6797 = vmatpush1.bf16.msra.mxu0 %v9350_v51  ;;  %7125 = vmatpush1.bf16.msra.mxu1 %v9352_v52  ;;  %v9409_v51 = vcombine.high %v917_v45, %v921_v46  ;;  %v924_v52 = vld [vmem:[%s10722_s15 + $0x12c0] sm:$0xff] }
 0x19f   : > { %6798 = vmatprep.subr.bf16.mxu0 %v9359_v54  ;;  %7126 = vmatprep.subr.bf16.mxu1 %v9361_v55  ;;  %v928_v54 = vld [vmem:[%s10722_s15 + $0x12e0] sm:$0xff]  ;;  %v925_v55 = vld [vmem:[%s10722_s15 + $0x12c8] sm:$0xff] }
 0x1a0   : > { %v9415_v61 = vcombine.high %v924_v52, %v928_v54  ;;  %v9414_v31 = vcombine.low %v924_v52, %v928_v54  ;;  %v9416_v6 = vcombine.low %v925_v55, %v929_v56  ;;  %v973_v52 = vld [vmem:[%s10722_s15 + $0x1448] sm:$0xff] }
 0x1a1   : > { %v977_v54 = vld [vmem:[%s10722_s15 + $0x1468] sm:$0xff] }
 0x1a2   : > { %6799 = vmatpush1.bf16.msra.mxu0 %v9358_v62  ;;  %7127 = vmatpush1.bf16.msra.mxu1 %v9360_v0  ;;  %v9417_v62 = vcombine.high %v925_v55, %v929_v56  ;;  %v932_v0 = vld [vmem:[%s10722_s15 + $0x1300] sm:$0xff] }
 0x1a3   : > { %6800 = vmatprep.subr.bf16.mxu0 %v9367_v2  ;;  %7128 = vmatprep.subr.bf16.mxu1 %v9369_v3  ;;  %v936_v2 = vld [vmem:[%s10722_s15 + $0x1320] sm:$0xff]  ;;  %v933_v3 = vld [vmem:[%s10722_s15 + $0x1308] sm:$0xff] }
 0x1a4   : > { %v9423_v7 = vcombine.high %v932_v0, %v936_v2  ;;  %v9422_v15 = vcombine.low %v932_v0, %v936_v2  ;;  %v9424_v16 = vcombine.low %v933_v3, %v937_v4  ;;  %v11162_v0 = vcombine.high %v11086_v29, %v11086_v29  ;;  %v985_v2 = vld [vmem:[%s10722_s15 + $0x14a8] sm:$0xff] }
 0x1a6   : > { %6801 = vmatpush1.bf16.msra.mxu0 %v9366_v10  ;;  %7129 = vmatpush1.bf16.msra.mxu1 %v9368_v11  ;;  %v9425_v10 = vcombine.high %v933_v3, %v937_v4  ;;  %v940_v11 = vld [vmem:[%s10722_s15 + $0x1340] sm:$0xff]  ;;  %v9464_v4 = vcombine.low %v973_v52, %v977_v54 }
 0x1a7   : > { %6802 = vmatprep.subr.bf16.mxu0 %v9375_v12  ;;  %7130 = vmatprep.subr.bf16.mxu1 %v9377_v13  ;;  %v944_v12 = vld [vmem:[%s10722_s15 + $0x1360] sm:$0xff]  ;;  %v941_v13 = vld [vmem:[%s10722_s15 + $0x1348] sm:$0xff] }
 0x1a8   : > { %v9431_v17 = vcombine.high %v940_v11, %v944_v12  ;;  %v9430_v25 = vcombine.low %v940_v11, %v944_v12  ;;  %v9432_v26 = vcombine.low %v941_v13, %v945_v14  ;;  %v989_v11 = vld [vmem:[%s10722_s15 + $0x14c8] sm:$0xff] }
 0x1a9   : > { %v993_v12 = vld [vmem:[%s10722_s15 + $0x14e8] sm:$0xff] }
 0x1aa   : > { %6803 = vmatpush1.bf16.msra.mxu0 %v9374_v18  ;;  %7131 = vmatpush1.bf16.msra.mxu1 %v9376_v20  ;;  %v9433_v18 = vcombine.high %v941_v13, %v945_v14  ;;  %v948_v20 = vld [vmem:[%s10722_s15 + $0x1380] sm:$0xff] }
 0x1ab   : > { %6804 = vmatprep.subr.bf16.mxu0 %v9383_v21  ;;  %7132 = vmatprep.subr.bf16.mxu1 %v9385_v22  ;;  %v952_v21 = vld [vmem:[%s10722_s15 + $0x13a0] sm:$0xff]  ;;  %v949_v22 = vld [vmem:[%s10722_s15 + $0x1388] sm:$0xff] }
 0x1ac   : > { %v9439_v27 = vcombine.high %v948_v20, %v952_v21  ;;  %v9438_v34 = vcombine.low %v948_v20, %v952_v21  ;;  %v9440_v35 = vcombine.low %v949_v22, %v953_v24  ;;  %v997_v20 = vld [vmem:[%s10722_s15 + $0x1508] sm:$0xff] }
 0x1ad   : > { %v1001_v21 = vld [vmem:[%s10722_s15 + $0x1528] sm:$0xff] }
 0x1ae   : > { %6805 = vmatpush1.bf16.msra.mxu0 %v9382_v28  ;;  %7133 = vmatpush1.bf16.msra.mxu1 %v9384_v30  ;;  %v9441_v28 = vcombine.high %v949_v22, %v953_v24  ;;  %v956_v30 = vld [vmem:[%s10722_s15 + $0x13c0] sm:$0xff]  ;;  %v9480_v24 = vcombine.low %v989_v11, %v993_v12 }
 0x1af   : > { %6806 = vmatprep.subr.bf16.mxu0 %v9391_v59  ;;  %7134 = vmatprep.subr.bf16.mxu1 %v9393_v32  ;;  %v960_v59 = vld [vmem:[%s10722_s15 + $0x13e0] sm:$0xff]  ;;  %v957_v32 = vld [vmem:[%s10722_s15 + $0x13c8] sm:$0xff] }
 0x1b0   : > { %v9447_v36 = vcombine.high %v956_v30, %v960_v59  ;;  %v9446_v44 = vcombine.low %v956_v30, %v960_v59  ;;  %v9448_v45 = vcombine.low %v957_v32, %v961_v33  ;;  %v1005_v30 = vld [vmem:[%s10722_s15 + $0x1548] sm:$0xff] }
 0x1b1   : > { %v1009_v59 = vld [vmem:[%s10722_s15 + $0x1568] sm:$0xff] }
 0x1b2   : > { %6807 = vmatpush1.bf16.msra.mxu0 %v9390_v37  ;;  %7135 = vmatpush1.bf16.msra.mxu1 %v9392_v38  ;;  %v9449_v37 = vcombine.high %v957_v32, %v961_v33  ;;  %v964_v38 = vld [vmem:[%s10722_s15 + $0x1400] sm:$0xff]  ;;  %v9488_v33 = vcombine.low %v997_v20, %v1001_v21 }
 0x1b3   : > { %6808 = vmatprep.subr.bf16.mxu0 %v9399_v39  ;;  %7136 = vmatprep.subr.bf16.mxu1 %v9401_v41  ;;  %v968_v39 = vld [vmem:[%s10722_s15 + $0x1420] sm:$0xff]  ;;  %v965_v41 = vld [vmem:[%s10722_s15 + $0x1408] sm:$0xff] }
 0x1b4   : > { %v9455_v46 = vcombine.high %v964_v38, %v968_v39  ;;  %v9454_v55 = vcombine.low %v964_v38, %v968_v39  ;;  %v9456_v56 = vcombine.low %v965_v41, %v969_v42  ;;  %v1013_v38 = vld [vmem:[%s10722_s15 + $0x1588] sm:$0xff] }
 0x1b5   : > { %v1017_v39 = vld [vmem:[%s10722_s15 + $0x15a8] sm:$0xff] }
 0x1b6   : > { %6809 = vmatpush1.bf16.msra.mxu0 %v9398_v47  ;;  %7137 = vmatpush1.bf16.msra.mxu1 %v9400_v49  ;;  %v9457_v47 = vcombine.high %v965_v41, %v969_v42  ;;  %v972_v49 = vld [vmem:[%s10722_s15 + $0x1440] sm:$0xff]  ;;  %v9496_v42 = vcombine.low %v1005_v30, %v1009_v59 }
 0x1b7   : > { %6810 = vmatprep.subr.bf16.mxu0 %v9407_v50  ;;  %7138 = vmatprep.subr.bf16.mxu1 %v9409_v51  ;;  %v976_v50 = vld [vmem:[%s10722_s15 + $0x1460] sm:$0xff]  ;;  %v11154_v51 = vrot.slane %v11069_v8, %v10770_v53  ;;  %v981_v8 = vld [vmem:[%s10722_s15 + $0x1488] sm:$0xff] }
 0x1b8   : > { %v9462_v3 = vcombine.low %v972_v49, %v976_v50  ;;  %v9472_v14 = vcombine.low %v981_v8, %v985_v2 }
 0x1ba   : > { %6811 = vmatpush1.bf16.msra.mxu0 %v9406_v57  ;;  %7139 = vmatpush1.bf16.msra.mxu1 %v9408_v60  ;;  %v9463_v57 = vcombine.high %v972_v49, %v976_v50  ;;  %v9465_v60 = vcombine.high %v973_v52, %v977_v54  ;;  %v1021_v49 = vld [vmem:[%s10722_s15 + $0x15c8] sm:$0xff]  ;;  %v9504_v54 = vcombine.low %v1013_v38, %v1017_v39 }
 0x1bb   : > { %6812 = vmatprep.subr.bf16.mxu0 %v9415_v61  ;;  %7140 = vmatprep.subr.bf16.mxu1 %v9417_v62  ;;  %v980_v61 = vld [vmem:[%s10722_s15 + $0x1480] sm:$0xff]  ;;  %v1025_v50 = vld [vmem:[%s10722_s15 + $0x15e8] sm:$0xff] }
 0x1bc   : > { %v984_v62 = vld [vmem:[%s10722_s15 + $0x14a0] sm:$0xff] }
 0x1bd   : > { %v9470_v13 = vcombine.low %v980_v61, %v984_v62 }
 0x1be   : > { %6813 = vmatpush1.bf16.msra.mxu0 %v9414_v31  ;;  %7141 = vmatpush1.bf16.msra.mxu1 %v9416_v6  ;;  %v9471_v31 = vcombine.high %v980_v61, %v984_v62  ;;  %v9473_v6 = vcombine.high %v981_v8, %v985_v2  ;;  %v1029_v61 = vld [vmem:[%s10722_s15 + $0x1608] sm:$0xff]  ;;  %v9512_v2 = vcombine.low %v1021_v49, %v1025_v50 }
 0x1bf   : > { %6814 = vmatprep.subr.bf16.mxu0 %v9423_v7  ;;  %7142 = vmatprep.subr.bf16.mxu1 %v9425_v10  ;;  %v988_v7 = vld [vmem:[%s10722_s15 + $0x14c0] sm:$0xff]  ;;  %v1033_v62 = vld [vmem:[%s10722_s15 + $0x1628] sm:$0xff] }
 0x1c0   : > { %v992_v10 = vld [vmem:[%s10722_s15 + $0x14e0] sm:$0xff] }
 0x1c1   : > { %v9478_v22 = vcombine.low %v988_v7, %v992_v10 }
 0x1c2   : > { %6815 = vmatpush1.bf16.msra.mxu0 %v9422_v15  ;;  %7143 = vmatpush1.bf16.msra.mxu1 %v9424_v16  ;;  %v9479_v15 = vcombine.high %v988_v7, %v992_v10  ;;  %v9481_v16 = vcombine.high %v989_v11, %v993_v12  ;;  %v1037_v7 = vld [vmem:[%s10722_s15 + $0x1648] sm:$0xff]  ;;  %v9520_v12 = vcombine.low %v1029_v61, %v1033_v62 }
 0x1c3   : > { %6816 = vmatprep.subr.bf16.mxu0 %v9431_v17  ;;  %7144 = vmatprep.subr.bf16.mxu1 %v9433_v18  ;;  %v996_v17 = vld [vmem:[%s10722_s15 + $0x1500] sm:$0xff]  ;;  %v1041_v10 = vld [vmem:[%s10722_s15 + $0x1668] sm:$0xff] }
 0x1c4   : > { %v1000_v18 = vld [vmem:[%s10722_s15 + $0x1520] sm:$0xff] }
 0x1c5   : > { %v9486_v32 = vcombine.low %v996_v17, %v1000_v18 }
 0x1c6   : > { %6817 = vmatpush1.bf16.msra.mxu0 %v9430_v25  ;;  %7145 = vmatpush1.bf16.msra.mxu1 %v9432_v26  ;;  %v9487_v25 = vcombine.high %v996_v17, %v1000_v18  ;;  %v9489_v26 = vcombine.high %v997_v20, %v1001_v21  ;;  %v1045_v17 = vld [vmem:[%s10722_s15 + $0x1688] sm:$0xff]  ;;  %v9528_v21 = vcombine.low %v1037_v7, %v1041_v10 }
 0x1c7   : > { %6818 = vmatprep.subr.bf16.mxu0 %v9439_v27  ;;  %7146 = vmatprep.subr.bf16.mxu1 %v9441_v28  ;;  %v1004_v27 = vld [vmem:[%s10722_s15 + $0x1540] sm:$0xff]  ;;  %v1049_v18 = vld [vmem:[%s10722_s15 + $0x16a8] sm:$0xff] }
 0x1c8   : > { %v1008_v28 = vld [vmem:[%s10722_s15 + $0x1560] sm:$0xff] }
 0x1c9   : > { %v9494_v41 = vcombine.low %v1004_v27, %v1008_v28 }
 0x1ca   : > { %6819 = vmatpush1.bf16.msra.mxu0 %v9438_v34  ;;  %7147 = vmatpush1.bf16.msra.mxu1 %v9440_v35  ;;  %v9495_v34 = vcombine.high %v1004_v27, %v1008_v28  ;;  %v9497_v35 = vcombine.high %v1005_v30, %v1009_v59  ;;  %v1053_v27 = vld [vmem:[%s10722_s15 + $0x16c8] sm:$0xff]  ;;  %v9536_v59 = vcombine.low %v1045_v17, %v1049_v18 }
 0x1cb   : > { %6820 = vmatprep.subr.bf16.mxu0 %v9447_v36  ;;  %7148 = vmatprep.subr.bf16.mxu1 %v9449_v37  ;;  %v1012_v36 = vld [vmem:[%s10722_s15 + $0x1580] sm:$0xff]  ;;  %v1057_v28 = vld [vmem:[%s10722_s15 + $0x16e8] sm:$0xff] }
 0x1cc   : > { %v1016_v37 = vld [vmem:[%s10722_s15 + $0x15a0] sm:$0xff] }
 0x1cd   : > { %v9502_v52 = vcombine.low %v1012_v36, %v1016_v37 }
 0x1ce   : > { %6821 = vmatpush1.bf16.msra.mxu0 %v9446_v44  ;;  %7149 = vmatpush1.bf16.msra.mxu1 %v9448_v45  ;;  %v9503_v44 = vcombine.high %v1012_v36, %v1016_v37  ;;  %v9505_v45 = vcombine.high %v1013_v38, %v1017_v39  ;;  %v1061_v36 = vld [vmem:[%s10722_s15 + $0x1708] sm:$0xff]  ;;  %v9544_v39 = vcombine.low %v1053_v27, %v1057_v28 }
 0x1cf   : > { %6831 = vmatprep.subr.bf16.mxu0 %v9455_v46  ;;  %7159 = vmatprep.subr.bf16.mxu1 %v9457_v47  ;;  %v1020_v46 = vld [vmem:[%s10722_s15 + $0x15c0] sm:$0xff]  ;;  %v1065_v37 = vld [vmem:[%s10722_s15 + $0x1728] sm:$0xff] }
 0x1d0   : > { %v1024_v47 = vld [vmem:[%s10722_s15 + $0x15e0] sm:$0xff] }
 0x1d1   : > { %6823 = vmatmul.mubr.bf16.vlgmr.msra.gmra.mrb[0].mxu0 %v11154_v51  ;;  %7151 = vmatmul.mubr.bf16.vlgmr.msra.gmra.mrb[0].mxu1 %v11154_v51  ;;  %v9510_v8 = vcombine.low %v1020_v46, %v1024_v47 }
 0x1d2   : > { %6832 = vmatpush1.bf16.msra.mxu0 %v9454_v55  ;;  %7160 = vmatpush1.bf16.msra.mxu1 %v9456_v56  ;;  %v9511_v55 = vcombine.high %v1020_v46, %v1024_v47  ;;  %v9513_v56 = vcombine.high %v1021_v49, %v1025_v50  ;;  %v1069_v46 = vld [vmem:[%s10722_s15 + $0x1748] sm:$0xff]  ;;  %v9552_v50 = vcombine.low %v1061_v36, %v1065_v37 }
 0x1d3   : > { %6833 = vmatprep.subr.bf16.mxu0 %v9463_v57  ;;  %7161 = vmatprep.subr.bf16.mxu1 %v9465_v60  ;;  %v1028_v57 = vld [vmem:[%s10722_s15 + $0x1600] sm:$0xff]  ;;  %v1073_v47 = vld [vmem:[%s10722_s15 + $0x1768] sm:$0xff] }
 0x1d4   : > { %6863 = vmatprep.mubr.bf16.mxu0 %v11162_v0  ;;  %7191 = vmatprep.mubr.bf16.mxu1 %v11162_v0  ;;  %v1032_v60 = vld [vmem:[%s10722_s15 + $0x1620] sm:$0xff] }
 0x1d5   : > { %v9518_v11 = vcombine.low %v1028_v57, %v1032_v60 }
 0x1d6   : > { %6834 = vmatpush1.bf16.msra.mxu0 %v9462_v3  ;;  %7162 = vmatpush1.bf16.msra.mxu1 %v9464_v4  ;;  %v9519_v3 = vcombine.high %v1028_v57, %v1032_v60  ;;  %v9521_v4 = vcombine.high %v1029_v61, %v1033_v62  ;;  %v1077_v57 = vld [vmem:[%s10722_s15 + $0x1788] sm:$0xff]  ;;  %v9560_v62 = vcombine.low %v1069_v46, %v1073_v47 }
 0x1d7   : > { %6835 = vmatprep.subr.bf16.mxu0 %v9471_v31  ;;  %7163 = vmatprep.subr.bf16.mxu1 %v9473_v6  ;;  %v1036_v31 = vld [vmem:[%s10722_s15 + $0x1640] sm:$0xff]  ;;  %v1081_v60 = vld [vmem:[%s10722_s15 + $0x17a8] sm:$0xff] }
 0x1d8   : > { %v1040_v6 = vld [vmem:[%s10722_s15 + $0x1660] sm:$0xff] }
 0x1d9   : > { %v9526_v20 = vcombine.low %v1036_v31, %v1040_v6 }
 0x1da   : > { %6836 = vmatpush1.bf16.msra.mxu0 %v9470_v13  ;;  %7164 = vmatpush1.bf16.msra.mxu1 %v9472_v14  ;;  %v9527_v13 = vcombine.high %v1036_v31, %v1040_v6  ;;  %v9529_v14 = vcombine.high %v1037_v7, %v1041_v10  ;;  %v1441_v31 = vcombine.high %v11063_v1, %v11063_v1  ;;  %v1085_v6 = vld [vmem:[%s10722_s15 + $0x17c8] sm:$0xff] }
 0x1db   : > { %6837 = vmatprep.subr.bf16.mxu0 %v9479_v15  ;;  %7165 = vmatprep.subr.bf16.mxu1 %v9481_v16  ;;  %v1044_v15 = vld [vmem:[%s10722_s15 + $0x1680] sm:$0xff]  ;;  %v1089_v7 = vld [vmem:[%s10722_s15 + $0x17e8] sm:$0xff] }
 0x1dc   : > { %v1048_v16 = vld [vmem:[%s10722_s15 + $0x16a0] sm:$0xff]  ;;  %v1093_v1 = vld [vmem:[%s10722_s15 + $0x1808] sm:$0xff] }
 0x1dd   : > { %v9534_v30 = vcombine.low %v1044_v15, %v1048_v16 }
 0x1de   : > { %6838 = vmatpush1.bf16.msra.mxu0 %v9478_v22  ;;  %7166 = vmatpush1.bf16.msra.mxu1 %v9480_v24  ;;  %v9535_v22 = vcombine.high %v1044_v15, %v1048_v16  ;;  %v9537_v24 = vcombine.high %v1045_v17, %v1049_v18  ;;  %v1096_v15 = vld [vmem:[%s10722_s15 + $0x1820] sm:$0xff]  ;;  %v11227_v16 = vrot.slane %v1441_v31, %v10770_v53  ;;  %v1097_v17 = vld [vmem:[%s10722_s15 + $0x1828] sm:$0xff] }
 0x1df   : > { %6839 = vmatprep.subr.bf16.mxu0 %v9487_v25  ;;  %7167 = vmatprep.subr.bf16.mxu1 %v9489_v26  ;;  %v1052_v25 = vld [vmem:[%s10722_s15 + $0x16c0] sm:$0xff] }
 0x1e0   : > { %v1056_v26 = vld [vmem:[%s10722_s15 + $0x16e0] sm:$0xff] }
 0x1e1   : > { %v9542_v38 = vcombine.low %v1052_v25, %v1056_v26  ;;  %v1132_v31 = vld [vmem:[%s10722_s15 + $0x1940] sm:$0xff] }
 0x1e2   : > { %6840 = vmatpush1.bf16.msra.mxu0 %v9486_v32  ;;  %7168 = vmatpush1.bf16.msra.mxu1 %v9488_v33  ;;  %v9543_v32 = vcombine.high %v1052_v25, %v1056_v26  ;;  %v9545_v33 = vcombine.high %v1053_v27, %v1057_v28  ;;  %v1104_v25 = vld [vmem:[%s10722_s15 + $0x1860] sm:$0xff]  ;;  %v1457_v26 = vcombine.high %v11227_v16, %v11227_v16  ;;  %v1101_v28 = vld [vmem:[%s10722_s15 + $0x1848] sm:$0xff] }
 0x1e3   : > { %6841 = vmatprep.subr.bf16.mxu0 %v9495_v34  ;;  %7169 = vmatprep.subr.bf16.mxu1 %v9497_v35  ;;  %v1060_v34 = vld [vmem:[%s10722_s15 + $0x1700] sm:$0xff]  ;;  %v11237_v27 = vcombine.high %v11154_v51, %v11154_v51 }
 0x1e4   : > { %v1064_v35 = vld [vmem:[%s10722_s15 + $0x1720] sm:$0xff] }
 0x1e5   : > { %v9550_v49 = vcombine.low %v1060_v34, %v1064_v35 }
 0x1e6   : > { %6842 = vmatpush1.bf16.msra.mxu0 %v9494_v41  ;;  %7170 = vmatpush1.bf16.msra.mxu1 %v9496_v42  ;;  %v9551_v41 = vcombine.high %v1060_v34, %v1064_v35  ;;  %v9553_v42 = vcombine.high %v1061_v36, %v1065_v37  ;;  %v1108_v35 = vld [vmem:[%s10722_s15 + $0x1880] sm:$0xff]  ;;  %v11244_v37 = vrot.slane %v1457_v26, %v10770_v53 }
 0x1e7   : > { %6843 = vmatprep.subr.bf16.mxu0 %v9503_v44  ;;  %7171 = vmatprep.subr.bf16.mxu1 %v9505_v45  ;;  %v1068_v44 = vld [vmem:[%s10722_s15 + $0x1740] sm:$0xff] }
 0x1e8   : > { %v1072_v45 = vld [vmem:[%s10722_s15 + $0x1760] sm:$0xff] }
 0x1e9   : > { %v9558_v61 = vcombine.low %v1068_v44, %v1072_v45  ;;  %v1112_v36 = vld [vmem:[%s10722_s15 + $0x18a0] sm:$0xff] }
 0x1ea   : > { %6844 = vmatpush1.bf16.msra.mxu0 %v9502_v52  ;;  %7172 = vmatpush1.bf16.msra.mxu1 %v9504_v54  ;;  %v9559_v52 = vcombine.high %v1068_v44, %v1072_v45  ;;  %v9561_v54 = vcombine.high %v1069_v46, %v1073_v47  ;;  %v9599_v44 = vcombine.high %v1108_v35, %v1112_v36  ;;  %v1116_v46 = vld [vmem:[%s10722_s15 + $0x18c0] sm:$0xff] }
 0x1eb   : > { %6845 = vmatprep.subr.bf16.mxu0 %v9511_v55  ;;  %7173 = vmatprep.subr.bf16.mxu1 %v9513_v56  ;;  %v1076_v55 = vld [vmem:[%s10722_s15 + $0x1780] sm:$0xff] }
 0x1ec   : > { %v1080_v56 = vld [vmem:[%s10722_s15 + $0x17a0] sm:$0xff] }
 0x1ed   : > { %v9566_v10 = vcombine.low %v1076_v55, %v1080_v56  ;;  %v1120_v47 = vld [vmem:[%s10722_s15 + $0x18e0] sm:$0xff] }
 0x1ee   : > { %6846 = vmatpush1.bf16.msra.mxu0 %v9510_v8  ;;  %7174 = vmatpush1.bf16.msra.mxu1 %v9512_v2  ;;  %v9567_v8 = vcombine.high %v1076_v55, %v1080_v56  ;;  %v9569_v2 = vcombine.high %v1077_v57, %v1081_v60  ;;  %v9607_v55 = vcombine.high %v1116_v46, %v1120_v47  ;;  %v1152_v26 = vld [vmem:[%s10722_s15 + $0x19e0] sm:$0xff] }
 0x1ef   : > { %6847 = vmatprep.subr.bf16.mxu0 %v9519_v3  ;;  %7175 = vmatprep.subr.bf16.mxu1 %v9521_v4  ;;  %v1084_v3 = vld [vmem:[%s10722_s15 + $0x17c0] sm:$0xff] }
 0x1f0   : > { %v1088_v4 = vld [vmem:[%s10722_s15 + $0x17e0] sm:$0xff] }
 0x1f1   : > { %v9574_v18 = vcombine.low %v1084_v3, %v1088_v4 }
 0x1f2   : > { %6848 = vmatpush1.bf16.msra.mxu0 %v9518_v11  ;;  %7176 = vmatpush1.bf16.msra.mxu1 %v9520_v12  ;;  %v9568_v11 = vcombine.low %v1077_v57, %v1081_v60  ;;  %v9575_v12 = vcombine.high %v1084_v3, %v1088_v4  ;;  %v1124_v57 = vld [vmem:[%s10722_s15 + $0x1900] sm:$0xff] }
 0x1f3   : > { %6849 = vmatprep.subr.bf16.mxu0 %v9527_v13  ;;  %7177 = vmatprep.subr.bf16.mxu1 %v9529_v14  ;;  %v9577_v13 = vcombine.high %v1085_v6, %v1089_v7  ;;  %v1092_v14 = vld [vmem:[%s10722_s15 + $0x1800] sm:$0xff] }
 0x1f4   : > { %v1128_v60 = vld [vmem:[%s10722_s15 + $0x1920] sm:$0xff] }
 0x1f5   : > { %v9615_v3 = vcombine.high %v1124_v57, %v1128_v60 }
 0x1f6   : > { %6850 = vmatpush1.bf16.msra.mxu0 %v9526_v20  ;;  %7178 = vmatpush1.bf16.msra.mxu1 %v9528_v21  ;;  %v9576_v20 = vcombine.low %v1085_v6, %v1089_v7  ;;  %v9583_v21 = vcombine.high %v1092_v14, %v1096_v15  ;;  %v1136_v6 = vld [vmem:[%s10722_s15 + $0x1960] sm:$0xff]  ;;  %v1133_v7 = vld [vmem:[%s10722_s15 + $0x1948] sm:$0xff] }
 0x1f7   : > { %6851 = vmatprep.subr.bf16.mxu0 %v9535_v22  ;;  %7179 = vmatprep.subr.bf16.mxu1 %v9537_v24  ;;  %v9585_v22 = vcombine.high %v1093_v1, %v1097_v17  ;;  %v1100_v24 = vld [vmem:[%s10722_s15 + $0x1840] sm:$0xff] }
 0x1fa   : > { %6852 = vmatpush1.bf16.msra.mxu0 %v9534_v30  ;;  %7180 = vmatpush1.bf16.msra.mxu1 %v9536_v59  ;;  %v1105_v30 = vld [vmem:[%s10722_s15 + $0x1868] sm:$0xff]  ;;  %v9582_v59 = vcombine.low %v1092_v14, %v1096_v15  ;;  %v1140_v15 = vld [vmem:[%s10722_s15 + $0x1980] sm:$0xff] }
 0x1fb   : > { %6853 = vmatprep.subr.bf16.mxu0 %v9543_v32  ;;  %7181 = vmatprep.subr.bf16.mxu1 %v9545_v33  ;;  %v9584_v32 = vcombine.low %v1093_v1, %v1097_v17  ;;  %v9591_v33 = vcombine.high %v1100_v24, %v1104_v25  ;;  %v9593_v34 = vcombine.high %v1101_v28, %v1105_v30  ;;  %v1144_v1 = vld [vmem:[%s10722_s15 + $0x19a0] sm:$0xff]  ;;  %v1141_v17 = vld [vmem:[%s10722_s15 + $0x1988] sm:$0xff] }
 0x1fe   : > { %6854 = vmatpush1.bf16.msra.mxu0 %v9542_v38  ;;  %7182 = vmatpush1.bf16.msra.mxu1 %v9544_v39  ;;  %v1109_v38 = vld [vmem:[%s10722_s15 + $0x1888] sm:$0xff] }
 0x1ff   : > { %6855 = vmatprep.subr.bf16.mxu0 %v9551_v41  ;;  %7183 = vmatprep.subr.bf16.mxu1 %v9553_v42  ;;  %v1113_v39 = vld [vmem:[%s10722_s15 + $0x18a8] sm:$0xff]  ;;  %v9590_v41 = vcombine.low %v1100_v24, %v1104_v25  ;;  %v9592_v42 = vcombine.low %v1101_v28, %v1105_v30  ;;  %v1148_v25 = vld [vmem:[%s10722_s15 + $0x19c0] sm:$0xff] }
 0x200   : > { %v9601_v45 = vcombine.high %v1109_v38, %v1113_v39  ;;  %v1149_v28 = vld [vmem:[%s10722_s15 + $0x19c8] sm:$0xff] }
 0x201   : > { %v1153_v30 = vld [vmem:[%s10722_s15 + $0x19e8] sm:$0xff] }
 0x202   : > { %6856 = vmatpush1.bf16.msra.mxu0 %v9550_v49  ;;  %7184 = vmatpush1.bf16.msra.mxu1 %v9552_v50  ;;  %v1117_v49 = vld [vmem:[%s10722_s15 + $0x18c8] sm:$0xff] }
 0x203   : > { %6857 = vmatprep.subr.bf16.mxu0 %v9559_v52  ;;  %7185 = vmatprep.subr.bf16.mxu1 %v9561_v54  ;;  %v1121_v50 = vld [vmem:[%s10722_s15 + $0x18e8] sm:$0xff]  ;;  %v9598_v52 = vcombine.low %v1108_v35, %v1112_v36  ;;  %v9600_v54 = vcombine.low %v1109_v38, %v1113_v39  ;;  %v1156_v35 = vld [vmem:[%s10722_s15 + $0x1a00] sm:$0xff] }
 0x204   : > { %v9609_v56 = vcombine.high %v1117_v49, %v1121_v50  ;;  %v1160_v36 = vld [vmem:[%s10722_s15 + $0x1a20] sm:$0xff]  ;;  %v1157_v38 = vld [vmem:[%s10722_s15 + $0x1a08] sm:$0xff] }
 0x205   : > { %v1161_v39 = vld [vmem:[%s10722_s15 + $0x1a28] sm:$0xff] }
 0x206   : > { %6858 = vmatpush1.bf16.msra.mxu0 %v9558_v61  ;;  %7186 = vmatpush1.bf16.msra.mxu1 %v9560_v62  ;;  %v1125_v61 = vld [vmem:[%s10722_s15 + $0x1908] sm:$0xff] }
 0x207   : > { %6859 = vmatprep.subr.bf16.mxu0 %v9567_v8  ;;  %7187 = vmatprep.subr.bf16.mxu1 %v9569_v2  ;;  %v1129_v62 = vld [vmem:[%s10722_s15 + $0x1928] sm:$0xff]  ;;  %v9606_v8 = vcombine.low %v1116_v46, %v1120_v47  ;;  %v9608_v2 = vcombine.low %v1117_v49, %v1121_v50  ;;  %v1164_v46 = vld [vmem:[%s10722_s15 + $0x1a40] sm:$0xff] }
 0x208   : > { %v9617_v4 = vcombine.high %v1125_v61, %v1129_v62  ;;  %v1168_v47 = vld [vmem:[%s10722_s15 + $0x1a60] sm:$0xff]  ;;  %v1165_v49 = vld [vmem:[%s10722_s15 + $0x1a48] sm:$0xff] }
 0x209   : > { %v1169_v50 = vld [vmem:[%s10722_s15 + $0x1a68] sm:$0xff] }
 0x20a   : > { %6860 = vmatpush1.bf16.msra.mxu0 %v9566_v10  ;;  %7188 = vmatpush1.bf16.msra.mxu1 %v9568_v11  ;;  %v1137_v10 = vld [vmem:[%s10722_s15 + $0x1968] sm:$0xff]  ;;  %v9614_v11 = vcombine.low %v1124_v57, %v1128_v60  ;;  %v1172_v57 = vld [vmem:[%s10722_s15 + $0x1a80] sm:$0xff] }
 0x20b   : > { %6861 = vmatprep.subr.bf16.mxu0 %v9575_v12  ;;  %7189 = vmatprep.subr.bf16.mxu1 %v9577_v13  ;;  %v9616_v12 = vcombine.low %v1125_v61, %v1129_v62  ;;  %v9623_v13 = vcombine.high %v1132_v31, %v1136_v6  ;;  %v9625_v14 = vcombine.high %v1133_v7, %v1137_v10  ;;  %v1176_v60 = vld [vmem:[%s10722_s15 + $0x1aa0] sm:$0xff]  ;;  %v1173_v61 = vld [vmem:[%s10722_s15 + $0x1a88] sm:$0xff] }
 0x20c   : > { %v1177_v62 = vld [vmem:[%s10722_s15 + $0x1aa8] sm:$0xff] }
 0x20e   : > { %6862 = vmatpush1.bf16.msra.mxu0 %v9574_v18  ;;  %7190 = vmatpush1.bf16.msra.mxu1 %v9576_v20  ;;  %v1145_v18 = vld [vmem:[%s10722_s15 + $0x19a8] sm:$0xff]  ;;  %v9622_v20 = vcombine.low %v1132_v31, %v1136_v6  ;;  %v1180_v31 = vld [vmem:[%s10722_s15 + $0x1ac0] sm:$0xff] }
 0x20f   : > { %6872 = vmatprep.subr.bf16.mxu0 %v9583_v21  ;;  %7200 = vmatprep.subr.bf16.mxu1 %v9585_v22  ;;  %v9624_v21 = vcombine.low %v1133_v7, %v1137_v10  ;;  %v9631_v22 = vcombine.high %v1140_v15, %v1144_v1  ;;  %v9633_v24 = vcombine.high %v1141_v17, %v1145_v18  ;;  %v1184_v6 = vld [vmem:[%s10722_s15 + $0x1ae0] sm:$0xff]  ;;  %v1181_v7 = vld [vmem:[%s10722_s15 + $0x1ac8] sm:$0xff] }
 0x210   : > { %v1185_v10 = vld [vmem:[%s10722_s15 + $0x1ae8] sm:$0xff] }
 0x211   : > { %6864 = vmatmul.mubr.bf16.vlgmr.msra.gmra.mrb[0].mxu0 %v11237_v27  ;;  %7192 = vmatmul.mubr.bf16.vlgmr.msra.gmra.mrb[0].mxu1 %v11237_v27 }
 0x212   : > { %6873 = vmatpush1.bf16.msra.mxu0 %v9582_v59  ;;  %7201 = vmatpush1.bf16.msra.mxu1 %v9584_v32  ;;  %v9630_v59 = vcombine.low %v1140_v15, %v1144_v1  ;;  %v9632_v32 = vcombine.low %v1141_v17, %v1145_v18  ;;  %v1188_v15 = vld [vmem:[%s10722_s15 + $0x1b00] sm:$0xff]  ;;  %v1189_v17 = vld [vmem:[%s10722_s15 + $0x1b08] sm:$0xff] }
 0x213   : > { %6874 = vmatprep.subr.bf16.mxu0 %v9591_v33  ;;  %7202 = vmatprep.subr.bf16.mxu1 %v9593_v34  ;;  %v9639_v33 = vcombine.high %v1148_v25, %v1152_v26  ;;  %v9641_v34 = vcombine.high %v1149_v28, %v1153_v30  ;;  %v1192_v1 = vld [vmem:[%s10722_s15 + $0x1b20] sm:$0xff]  ;;  %v1193_v18 = vld [vmem:[%s10722_s15 + $0x1b28] sm:$0xff] }
 0x214   : > { %6904 = vmatprep.mubr.bf16.mxu0 %v11244_v37  ;;  %7232 = vmatprep.mubr.bf16.mxu1 %v11244_v37 }
 0x216   : > { %6875 = vmatpush1.bf16.msra.mxu0 %v9590_v41  ;;  %7203 = vmatpush1.bf16.msra.mxu1 %v9592_v42  ;;  %v9638_v41 = vcombine.low %v1148_v25, %v1152_v26  ;;  %v9640_v42 = vcombine.low %v1149_v28, %v1153_v30  ;;  %v1196_v25 = vld [vmem:[%s10722_s15 + $0x1b40] sm:$0xff]  ;;  %v1197_v28 = vld [vmem:[%s10722_s15 + $0x1b48] sm:$0xff] }
 0x217   : > { %6876 = vmatprep.subr.bf16.mxu0 %v9599_v44  ;;  %7204 = vmatprep.subr.bf16.mxu1 %v9601_v45  ;;  %v9647_v44 = vcombine.high %v1156_v35, %v1160_v36  ;;  %v9649_v45 = vcombine.high %v1157_v38, %v1161_v39  ;;  %v1200_v26 = vld [vmem:[%s10722_s15 + $0x1b60] sm:$0xff]  ;;  %v1201_v30 = vld [vmem:[%s10722_s15 + $0x1b68] sm:$0xff] }
 0x21a   : > { %6877 = vmatpush1.bf16.msra.mxu0 %v9598_v52  ;;  %7205 = vmatpush1.bf16.msra.mxu1 %v9600_v54  ;;  %v9646_v52 = vcombine.low %v1156_v35, %v1160_v36  ;;  %v9648_v54 = vcombine.low %v1157_v38, %v1161_v39  ;;  %v1204_v35 = vld [vmem:[%s10722_s15 + $0x1b80] sm:$0xff]  ;;  %v1205_v38 = vld [vmem:[%s10722_s15 + $0x1b88] sm:$0xff] }
 0x21b   : > { %6878 = vmatprep.subr.bf16.mxu0 %v9607_v55  ;;  %7206 = vmatprep.subr.bf16.mxu1 %v9609_v56  ;;  %v9655_v55 = vcombine.high %v1164_v46, %v1168_v47  ;;  %v9657_v56 = vcombine.high %v1165_v49, %v1169_v50  ;;  %v1208_v36 = vld [vmem:[%s10722_s15 + $0x1ba0] sm:$0xff]  ;;  %v1209_v39 = vld [vmem:[%s10722_s15 + $0x1ba8] sm:$0xff] }
 0x21e   : > { %6879 = vmatpush1.bf16.msra.mxu0 %v9606_v8  ;;  %7207 = vmatpush1.bf16.msra.mxu1 %v9608_v2  ;;  %v9654_v8 = vcombine.low %v1164_v46, %v1168_v47  ;;  %v9656_v2 = vcombine.low %v1165_v49, %v1169_v50  ;;  %v1212_v46 = vld [vmem:[%s10722_s15 + $0x1bc0] sm:$0xff]  ;;  %v1213_v49 = vld [vmem:[%s10722_s15 + $0x1bc8] sm:$0xff] }
 0x21f   : > { %6880 = vmatprep.subr.bf16.mxu0 %v9615_v3  ;;  %7208 = vmatprep.subr.bf16.mxu1 %v9617_v4  ;;  %v9663_v3 = vcombine.high %v1172_v57, %v1176_v60  ;;  %v9665_v4 = vcombine.high %v1173_v61, %v1177_v62  ;;  %v1216_v47 = vld [vmem:[%s10722_s15 + $0x1be0] sm:$0xff]  ;;  %v1217_v50 = vld [vmem:[%s10722_s15 + $0x1be8] sm:$0xff] }
 0x222   : > { %6881 = vmatpush1.bf16.msra.mxu0 %v9614_v11  ;;  %7209 = vmatpush1.bf16.msra.mxu1 %v9616_v12  ;;  %v9662_v11 = vcombine.low %v1172_v57, %v1176_v60  ;;  %v9664_v12 = vcombine.low %v1173_v61, %v1177_v62  ;;  %v1220_v57 = vld [vmem:[%s10722_s15 + $0x1c00] sm:$0xff]  ;;  %v1221_v61 = vld [vmem:[%s10722_s15 + $0x1c08] sm:$0xff] }
 0x223   : > { %6882 = vmatprep.subr.bf16.mxu0 %v9623_v13  ;;  %7210 = vmatprep.subr.bf16.mxu1 %v9625_v14  ;;  %v9671_v13 = vcombine.high %v1180_v31, %v1184_v6  ;;  %v9673_v14 = vcombine.high %v1181_v7, %v1185_v10  ;;  %v1224_v60 = vld [vmem:[%s10722_s15 + $0x1c20] sm:$0xff]  ;;  %v1225_v62 = vld [vmem:[%s10722_s15 + $0x1c28] sm:$0xff] }
 0x226   : > { %6883 = vmatpush1.bf16.msra.mxu0 %v9622_v20  ;;  %7211 = vmatpush1.bf16.msra.mxu1 %v9624_v21  ;;  %v9670_v20 = vcombine.low %v1180_v31, %v1184_v6  ;;  %v9672_v21 = vcombine.low %v1181_v7, %v1185_v10  ;;  %v1228_v31 = vld [vmem:[%s10722_s15 + $0x1c40] sm:$0xff]  ;;  %v11312_v7 = vrot.slane %v11227_v16, %v10770_v53  ;;  %v1229_v10 = vld [vmem:[%s10722_s15 + $0x1c48] sm:$0xff] }
 0x227   : > { %6884 = vmatprep.subr.bf16.mxu0 %v9631_v22  ;;  %7212 = vmatprep.subr.bf16.mxu1 %v9633_v24  ;;  %v9679_v22 = vcombine.high %v1188_v15, %v1192_v1  ;;  %v9681_v24 = vcombine.high %v1189_v17, %v1193_v18  ;;  %v1232_v6 = vld [vmem:[%s10722_s15 + $0x1c60] sm:$0xff]  ;;  %v1237_v53 = vld [vmem:[%s10722_s15 + $0x1c88] sm:$0xff] }
 0x228   : > { %v1241_v16 = vld [vmem:[%s10722_s15 + $0x1ca8] sm:$0xff] }
 0x22a   : > { %6885 = vmatpush1.bf16.msra.mxu0 %v9630_v59  ;;  %7213 = vmatpush1.bf16.msra.mxu1 %v9632_v32  ;;  %v9678_v59 = vcombine.low %v1188_v15, %v1192_v1  ;;  %v9680_v32 = vcombine.low %v1189_v17, %v1193_v18  ;;  %v1236_v1 = vld [vmem:[%s10722_s15 + $0x1c80] sm:$0xff]  ;;  %v11320_v18 = vcombine.high %v11244_v37, %v11244_v37 }
 0x22b   : > { %6886 = vmatprep.subr.bf16.mxu0 %v9639_v33  ;;  %7214 = vmatprep.subr.bf16.mxu1 %v9641_v34  ;;  %v9687_v33 = vcombine.high %v1196_v25, %v1200_v26  ;;  %v9689_v34 = vcombine.high %v1197_v28, %v1201_v30  ;;  %v1240_v17 = vld [vmem:[%s10722_s15 + $0x1ca0] sm:$0xff] }
 0x22e   : > { %6887 = vmatpush1.bf16.msra.mxu0 %v9638_v41  ;;  %7215 = vmatpush1.bf16.msra.mxu1 %v9640_v42  ;;  %v9686_v41 = vcombine.low %v1196_v25, %v1200_v26  ;;  %v9688_v42 = vcombine.low %v1197_v28, %v1201_v30  ;;  %v1244_v25 = vld [vmem:[%s10722_s15 + $0x1cc0] sm:$0xff]  ;;  %v1245_v28 = vld [vmem:[%s10722_s15 + $0x1cc8] sm:$0xff] }
 0x22f   : > { %6888 = vmatprep.subr.bf16.mxu0 %v9647_v44  ;;  %7216 = vmatprep.subr.bf16.mxu1 %v9649_v45  ;;  %v9695_v44 = vcombine.high %v1204_v35, %v1208_v36  ;;  %v9697_v45 = vcombine.high %v1205_v38, %v1209_v39  ;;  %v1248_v26 = vld [vmem:[%s10722_s15 + $0x1ce0] sm:$0xff]  ;;  %v1249_v30 = vld [vmem:[%s10722_s15 + $0x1ce8] sm:$0xff] }
 0x232   : > { %6889 = vmatpush1.bf16.msra.mxu0 %v9646_v52  ;;  %7217 = vmatpush1.bf16.msra.mxu1 %v9648_v54  ;;  %v9694_v52 = vcombine.low %v1204_v35, %v1208_v36  ;;  %v9696_v54 = vcombine.low %v1205_v38, %v1209_v39  ;;  %v1252_v35 = vld [vmem:[%s10722_s15 + $0x1d00] sm:$0xff]  ;;  %v1253_v38 = vld [vmem:[%s10722_s15 + $0x1d08] sm:$0xff] }
 0x233   : > { %6890 = vmatprep.subr.bf16.mxu0 %v9655_v55  ;;  %7218 = vmatprep.subr.bf16.mxu1 %v9657_v56  ;;  %v9703_v55 = vcombine.high %v1212_v46, %v1216_v47  ;;  %v9705_v56 = vcombine.high %v1213_v49, %v1217_v50  ;;  %v1256_v36 = vld [vmem:[%s10722_s15 + $0x1d20] sm:$0xff]  ;;  %v1257_v39 = vld [vmem:[%s10722_s15 + $0x1d28] sm:$0xff] }
 0x236   : > { %6891 = vmatpush1.bf16.msra.mxu0 %v9654_v8  ;;  %7219 = vmatpush1.bf16.msra.mxu1 %v9656_v2  ;;  %v9702_v8 = vcombine.low %v1212_v46, %v1216_v47  ;;  %v9704_v2 = vcombine.low %v1213_v49, %v1217_v50  ;;  %v1260_v46 = vld [vmem:[%s10722_s15 + $0x1d40] sm:$0xff]  ;;  %v1261_v49 = vld [vmem:[%s10722_s15 + $0x1d48] sm:$0xff] }
 0x237   : > { %6892 = vmatprep.subr.bf16.mxu0 %v9663_v3  ;;  %7220 = vmatprep.subr.bf16.mxu1 %v9665_v4  ;;  %v9711_v3 = vcombine.high %v1220_v57, %v1224_v60  ;;  %v9713_v4 = vcombine.high %v1221_v61, %v1225_v62  ;;  %v1264_v47 = vld [vmem:[%s10722_s15 + $0x1d60] sm:$0xff]  ;;  %v1265_v50 = vld [vmem:[%s10722_s15 + $0x1d68] sm:$0xff] }
 0x23a   : > { %6893 = vmatpush1.bf16.msra.mxu0 %v9662_v11  ;;  %7221 = vmatpush1.bf16.msra.mxu1 %v9664_v12  ;;  %v1233_v11 = vld [vmem:[%s10722_s15 + $0x1c68] sm:$0xff]  ;;  %v9710_v12 = vcombine.low %v1220_v57, %v1224_v60  ;;  %v1268_v57 = vld [vmem:[%s10722_s15 + $0x1d80] sm:$0xff] }
 0x23b   : > { %6894 = vmatprep.subr.bf16.mxu0 %v9671_v13  ;;  %7222 = vmatprep.subr.bf16.mxu1 %v9673_v14  ;;  %v9712_v13 = vcombine.low %v1221_v61, %v1225_v62  ;;  %v9719_v14 = vcombine.high %v1228_v31, %v1232_v6  ;;  %v9721_v15 = vcombine.high %v1229_v10, %v1233_v11  ;;  %v1272_v60 = vld [vmem:[%s10722_s15 + $0x1da0] sm:$0xff]  ;;  %v1269_v61 = vld [vmem:[%s10722_s15 + $0x1d88] sm:$0xff] }
 0x23c   : > { %v1273_v62 = vld [vmem:[%s10722_s15 + $0x1da8] sm:$0xff] }
 0x23e   : > { %6895 = vmatpush1.bf16.msra.mxu0 %v9670_v20  ;;  %7223 = vmatpush1.bf16.msra.mxu1 %v9672_v21  ;;  %v9718_v20 = vcombine.low %v1228_v31, %v1232_v6  ;;  %v9720_v21 = vcombine.low %v1229_v10, %v1233_v11  ;;  %v1276_v31 = vld [vmem:[%s10722_s15 + $0x1dc0] sm:$0xff]  ;;  %v1277_v10 = vld [vmem:[%s10722_s15 + $0x1dc8] sm:$0xff] }
 0x23f   : > { %6896 = vmatprep.subr.bf16.mxu0 %v9679_v22  ;;  %7224 = vmatprep.subr.bf16.mxu1 %v9681_v24  ;;  %v9727_v22 = vcombine.high %v1236_v1, %v1240_v17  ;;  %v9729_v24 = vcombine.high %v1237_v53, %v1241_v16  ;;  %v1280_v6 = vld [vmem:[%s10722_s15 + $0x1de0] sm:$0xff]  ;;  %v1281_v11 = vld [vmem:[%s10722_s15 + $0x1de8] sm:$0xff] }
 0x242   : > { %6897 = vmatpush1.bf16.msra.mxu0 %v9678_v59  ;;  %7225 = vmatpush1.bf16.msra.mxu1 %v9680_v32  ;;  %v9726_v59 = vcombine.low %v1236_v1, %v1240_v17  ;;  %v9728_v32 = vcombine.low %v1237_v53, %v1241_v16  ;;  %v1284_v1 = vld [vmem:[%s10722_s15 + $0x1e00] sm:$0xff]  ;;  %v1285_v53 = vld [vmem:[%s10722_s15 + $0x1e08] sm:$0xff] }
 0x243   : > { %6898 = vmatprep.subr.bf16.mxu0 %v9687_v33  ;;  %7226 = vmatprep.subr.bf16.mxu1 %v9689_v34  ;;  %v9735_v33 = vcombine.high %v1244_v25, %v1248_v26  ;;  %v9737_v34 = vcombine.high %v1245_v28, %v1249_v30  ;;  %v1288_v17 = vld [vmem:[%s10722_s15 + $0x1e20] sm:$0xff]  ;;  %v1289_v16 = vld [vmem:[%s10722_s15 + $0x1e28] sm:$0xff] }
 0x246   : > { %6899 = vmatpush1.bf16.msra.mxu0 %v9686_v41  ;;  %7227 = vmatpush1.bf16.msra.mxu1 %v9688_v42  ;;  %v9734_v41 = vcombine.low %v1244_v25, %v1248_v26  ;;  %v9736_v42 = vcombine.low %v1245_v28, %v1249_v30  ;;  %v1292_v25 = vld [vmem:[%s10722_s15 + $0x1e40] sm:$0xff]  ;;  %v1293_v28 = vld [vmem:[%s10722_s15 + $0x1e48] sm:$0xff] }
 0x247   : > { %6900 = vmatprep.subr.bf16.mxu0 %v9695_v44  ;;  %7228 = vmatprep.subr.bf16.mxu1 %v9697_v45  ;;  %v9743_v44 = vcombine.high %v1252_v35, %v1256_v36  ;;  %v9745_v45 = vcombine.high %v1253_v38, %v1257_v39  ;;  %v1296_v26 = vld [vmem:[%s10722_s15 + $0x1e60] sm:$0xff]  ;;  %v1297_v30 = vld [vmem:[%s10722_s15 + $0x1e68] sm:$0xff] }
 0x24a   : > { %6901 = vmatpush1.bf16.msra.mxu0 %v9694_v52  ;;  %7229 = vmatpush1.bf16.msra.mxu1 %v9696_v54  ;;  %v9742_v52 = vcombine.low %v1252_v35, %v1256_v36  ;;  %v9744_v54 = vcombine.low %v1253_v38, %v1257_v39  ;;  %v1300_v35 = vld [vmem:[%s10722_s15 + $0x1e80] sm:$0xff]  ;;  %v1301_v38 = vld [vmem:[%s10722_s15 + $0x1e88] sm:$0xff] }
 0x24b   : > { %6902 = vmatprep.subr.bf16.mxu0 %v9703_v55  ;;  %7230 = vmatprep.subr.bf16.mxu1 %v9705_v56  ;;  %v9751_v55 = vcombine.high %v1260_v46, %v1264_v47  ;;  %v9753_v56 = vcombine.high %v1261_v49, %v1265_v50  ;;  %v1304_v36 = vld [vmem:[%s10722_s15 + $0x1ea0] sm:$0xff]  ;;  %v1305_v39 = vld [vmem:[%s10722_s15 + $0x1ea8] sm:$0xff] }
 0x24e   : > { %6903 = vmatpush1.bf16.msra.mxu0 %v9702_v8  ;;  %7231 = vmatpush1.bf16.msra.mxu1 %v9704_v2  ;;  %v9750_v8 = vcombine.low %v1260_v46, %v1264_v47  ;;  %v9752_v2 = vcombine.low %v1261_v49, %v1265_v50  ;;  %v1308_v46 = vld [vmem:[%s10722_s15 + $0x1ec0] sm:$0xff]  ;;  %v1309_v49 = vld [vmem:[%s10722_s15 + $0x1ec8] sm:$0xff] }
 0x24f   : > { %6913 = vmatprep.subr.bf16.mxu0 %v9711_v3  ;;  %7241 = vmatprep.subr.bf16.mxu1 %v9713_v4  ;;  %v9759_v3 = vcombine.high %v1268_v57, %v1272_v60  ;;  %v9761_v4 = vcombine.high %v1269_v61, %v1273_v62  ;;  %v1312_v47 = vld [vmem:[%s10722_s15 + $0x1ee0] sm:$0xff]  ;;  %v1313_v50 = vld [vmem:[%s10722_s15 + $0x1ee8] sm:$0xff] }
 0x251   : > { %6905 = vmatmul.mubr.bf16.vlgmr.msra.gmra.mrb[0].mxu0 %v11312_v7  ;;  %7233 = vmatmul.mubr.bf16.vlgmr.msra.gmra.mrb[0].mxu1 %v11312_v7 }
 0x252   : > { %6914 = vmatpush1.bf16.msra.mxu0 %v9710_v12  ;;  %7242 = vmatpush1.bf16.msra.mxu1 %v9712_v13  ;;  %v9758_v12 = vcombine.low %v1268_v57, %v1272_v60  ;;  %v9760_v13 = vcombine.low %v1269_v61, %v1273_v62  ;;  %v1316_v57 = vld [vmem:[%s10722_s15 + $0x1f00] sm:$0xff]  ;;  %v1317_v61 = vld [vmem:[%s10722_s15 + $0x1f08] sm:$0xff] }
 0x253   : > { %6915 = vmatprep.subr.bf16.mxu0 %v9719_v14  ;;  %7243 = vmatprep.subr.bf16.mxu1 %v9721_v15  ;;  %v9767_v14 = vcombine.high %v1276_v31, %v1280_v6  ;;  %v9769_v15 = vcombine.high %v1277_v10, %v1281_v11  ;;  %v1320_v60 = vld [vmem:[%s10722_s15 + $0x1f20] sm:$0xff]  ;;  %v1321_v62 = vld [vmem:[%s10722_s15 + $0x1f28] sm:$0xff] }
 0x254   : > { %6945 = vmatprep.mubr.bf16.mxu0 %v11320_v18  ;;  %7273 = vmatprep.mubr.bf16.mxu1 %v11320_v18 }
 0x256   : > { %6916 = vmatpush1.bf16.msra.mxu0 %v9718_v20  ;;  %7244 = vmatpush1.bf16.msra.mxu1 %v9720_v21  ;;  %v9766_v20 = vcombine.low %v1276_v31, %v1280_v6  ;;  %v9768_v21 = vcombine.low %v1277_v10, %v1281_v11  ;;  %v1324_v31 = vld [vmem:[%s10722_s15 + $0x1f40] sm:$0xff]  ;;  %v1325_v10 = vld [vmem:[%s10722_s15 + $0x1f48] sm:$0xff] }
 0x257   : > { %6917 = vmatprep.subr.bf16.mxu0 %v9727_v22  ;;  %7245 = vmatprep.subr.bf16.mxu1 %v9729_v24  ;;  %v9775_v22 = vcombine.high %v1284_v1, %v1288_v17  ;;  %v9777_v24 = vcombine.high %v1285_v53, %v1289_v16  ;;  %v1328_v6 = vld [vmem:[%s10722_s15 + $0x1f60] sm:$0xff]  ;;  %v1329_v11 = vld [vmem:[%s10722_s15 + $0x1f68] sm:$0xff] }
 0x25a   : > { %6918 = vmatpush1.bf16.msra.mxu0 %v9726_v59  ;;  %7246 = vmatpush1.bf16.msra.mxu1 %v9728_v32  ;;  %v9774_v59 = vcombine.low %v1284_v1, %v1288_v17  ;;  %v9776_v32 = vcombine.low %v1285_v53, %v1289_v16  ;;  %v1332_v1 = vld [vmem:[%s10722_s15 + $0x1f80] sm:$0xff]  ;;  %v1333_v53 = vld [vmem:[%s10722_s15 + $0x1f88] sm:$0xff] }
 0x25b   : > { %6919 = vmatprep.subr.bf16.mxu0 %v9735_v33  ;;  %7247 = vmatprep.subr.bf16.mxu1 %v9737_v34  ;;  %v9783_v33 = vcombine.high %v1292_v25, %v1296_v26  ;;  %v9785_v34 = vcombine.high %v1293_v28, %v1297_v30  ;;  %v1336_v17 = vld [vmem:[%s10722_s15 + $0x1fa0] sm:$0xff]  ;;  %v1337_v16 = vld [vmem:[%s10722_s15 + $0x1fa8] sm:$0xff] }
 0x25e   : > { %6920 = vmatpush1.bf16.msra.mxu0 %v9734_v41  ;;  %7248 = vmatpush1.bf16.msra.mxu1 %v9736_v42  ;;  %v9782_v41 = vcombine.low %v1292_v25, %v1296_v26  ;;  %v9784_v42 = vcombine.low %v1293_v28, %v1297_v30  ;;  %v1340_v25 = vld [vmem:[%s10722_s15 + $0x1fc0] sm:$0xff]  ;;  %v1341_v28 = vld [vmem:[%s10722_s15 + $0x1fc8] sm:$0xff] }
 0x25f   : > { %6921 = vmatprep.subr.bf16.mxu0 %v9743_v44  ;;  %7249 = vmatprep.subr.bf16.mxu1 %v9745_v45  ;;  %v9791_v44 = vcombine.high %v1300_v35, %v1304_v36  ;;  %v9793_v45 = vcombine.high %v1301_v38, %v1305_v39  ;;  %v1344_v26 = vld [vmem:[%s10722_s15 + $0x1fe0] sm:$0xff]  ;;  %v1345_v30 = vld [vmem:[%s10722_s15 + $0x1fe8] sm:$0xff] }
 0x262   : > { %6922 = vmatpush1.bf16.msra.mxu0 %v9742_v52  ;;  %7250 = vmatpush1.bf16.msra.mxu1 %v9744_v54  ;;  %v9790_v52 = vcombine.low %v1300_v35, %v1304_v36  ;;  %v9792_v54 = vcombine.low %v1301_v38, %v1305_v39  ;;  %v326_v35 = vld [vmem:[%s10722_s15 + $0x10] sm:$0xff]  ;;  %v327_v38 = vld [vmem:[%s10722_s15 + $0x18] sm:$0xff] }
 0x263   : > { %6923 = vmatprep.subr.bf16.mxu0 %v9751_v55  ;;  %7251 = vmatprep.subr.bf16.mxu1 %v9753_v56  ;;  %v9799_v55 = vcombine.high %v1308_v46, %v1312_v47  ;;  %v9801_v56 = vcombine.high %v1309_v49, %v1313_v50  ;;  %v330_v36 = vld [vmem:[%s10722_s15 + $0x30] sm:$0xff]  ;;  %v331_v39 = vld [vmem:[%s10722_s15 + $0x38] sm:$0xff] }
 0x266   : > { %6924 = vmatpush1.bf16.msra.mxu0 %v9750_v8  ;;  %7252 = vmatpush1.bf16.msra.mxu1 %v9752_v2  ;;  %v9798_v8 = vcombine.low %v1308_v46, %v1312_v47  ;;  %v9800_v2 = vcombine.low %v1309_v49, %v1313_v50  ;;  %v334_v46 = vld [vmem:[%s10722_s15 + $0x50] sm:$0xff]  ;;  %v11388_v49 = vcombine.high %v11312_v7, %v11312_v7  ;;  %v335_v50 = vld [vmem:[%s10722_s15 + $0x58] sm:$0xff] }
 0x267   : > { %6925 = vmatprep.subr.bf16.mxu0 %v9759_v3  ;;  %7253 = vmatprep.subr.bf16.mxu1 %v9761_v4  ;;  %v9807_v3 = vcombine.high %v1316_v57, %v1320_v60  ;;  %v9809_v4 = vcombine.high %v1317_v61, %v1321_v62  ;;  %v338_v47 = vld [vmem:[%s10722_s15 + $0x70] sm:$0xff] }
 0x26a   : > { %6926 = vmatpush1.bf16.msra.mxu0 %v9758_v12  ;;  %7254 = vmatpush1.bf16.msra.mxu1 %v9760_v13  ;;  %v9806_v12 = vcombine.low %v1316_v57, %v1320_v60  ;;  %v9808_v13 = vcombine.low %v1317_v61, %v1321_v62  ;;  %v342_v60 = vld [vmem:[%s10722_s15 + $0x90] sm:$0xff]  ;;  %v343_v62 = vld [vmem:[%s10722_s15 + $0x98] sm:$0xff] }
 0x26b   : > { %6927 = vmatprep.subr.bf16.mxu0 %v9767_v14  ;;  %7255 = vmatprep.subr.bf16.mxu1 %v9769_v15  ;;  %v9815_v14 = vcombine.high %v1324_v31, %v1328_v6  ;;  %v9817_v15 = vcombine.high %v1325_v10, %v1329_v11  ;;  %v346_v61 = vld [vmem:[%s10722_s15 + $0xb0] sm:$0xff] }
 0x26e   : > { %6928 = vmatpush1.bf16.msra.mxu0 %v9766_v20  ;;  %7256 = vmatpush1.bf16.msra.mxu1 %v9768_v21  ;;  %v9814_v20 = vcombine.low %v1324_v31, %v1328_v6  ;;  %v9816_v21 = vcombine.low %v1325_v10, %v1329_v11  ;;  %v350_v6 = vld [vmem:[%s10722_s15 + $0xd0] sm:$0xff]  ;;  %v351_v11 = vld [vmem:[%s10722_s15 + $0xd8] sm:$0xff] }
 0x26f   : > { %6929 = vmatprep.subr.bf16.mxu0 %v9775_v22  ;;  %7257 = vmatprep.subr.bf16.mxu1 %v9777_v24  ;;  %v9823_v22 = vcombine.high %v1332_v1, %v1336_v17  ;;  %v9825_v24 = vcombine.high %v1333_v53, %v1337_v16  ;;  %v354_v10 = vld [vmem:[%s10722_s15 + $0xf0] sm:$0xff] }
 0x272   : > { %6930 = vmatpush1.bf16.msra.mxu0 %v9774_v59  ;;  %7258 = vmatpush1.bf16.msra.mxu1 %v9776_v32  ;;  %v9822_v59 = vcombine.low %v1332_v1, %v1336_v17  ;;  %v9824_v32 = vcombine.low %v1333_v53, %v1337_v16  ;;  %v358_v17 = vld [vmem:[%s10722_s15 + $0x110] sm:$0xff]  ;;  %v359_v16 = vld [vmem:[%s10722_s15 + $0x118] sm:$0xff] }
 0x273   : > { %6931 = vmatprep.subr.bf16.mxu0 %v9783_v33  ;;  %7259 = vmatprep.subr.bf16.mxu1 %v9785_v34  ;;  %v9831_v33 = vcombine.high %v1340_v25, %v1344_v26  ;;  %v9833_v34 = vcombine.high %v1341_v28, %v1345_v30  ;;  %v362_v53 = vld [vmem:[%s10722_s15 + $0x130] sm:$0xff] }
 0x276   : > { %6932 = vmatpush1.bf16.msra.mxu0 %v9782_v41  ;;  %7260 = vmatpush1.bf16.msra.mxu1 %v9784_v42  ;;  %v9830_v41 = vcombine.low %v1340_v25, %v1344_v26  ;;  %v9832_v42 = vcombine.low %v1341_v28, %v1345_v30  ;;  %v366_v25 = vld [vmem:[%s10722_s15 + $0x150] sm:$0xff]  ;;  %v367_v28 = vld [vmem:[%s10722_s15 + $0x158] sm:$0xff] }
 0x277   : > { %6933 = vmatprep.subr.bf16.mxu0 %v9791_v44  ;;  %7261 = vmatprep.subr.bf16.mxu1 %v9793_v45  ;;  %v8819_v44 = vcombine.high %v326_v35, %v330_v36  ;;  %v8821_v45 = vcombine.high %v327_v38, %v331_v39  ;;  %v370_v26 = vld [vmem:[%s10722_s15 + $0x170] sm:$0xff]  ;;  %v371_v30 = vld [vmem:[%s10722_s15 + $0x178] sm:$0xff] }
 0x27a   : > { %6934 = vmatpush1.bf16.msra.mxu0 %v9790_v52  ;;  %7262 = vmatpush1.bf16.msra.mxu1 %v9792_v54  ;;  %v339_v52 = vld [vmem:[%s10722_s15 + $0x78] sm:$0xff]  ;;  %v8818_v54 = vcombine.low %v326_v35, %v330_v36  ;;  %v374_v35 = vld [vmem:[%s10722_s15 + $0x190] sm:$0xff] }
 0x27b   : > { %6935 = vmatprep.subr.bf16.mxu0 %v9799_v55  ;;  %7263 = vmatprep.subr.bf16.mxu1 %v9801_v56  ;;  %v8820_v55 = vcombine.low %v327_v38, %v331_v39  ;;  %v8827_v56 = vcombine.high %v334_v46, %v338_v47  ;;  %v8829_v57 = vcombine.high %v335_v50, %v339_v52  ;;  %v378_v36 = vld [vmem:[%s10722_s15 + $0x1b0] sm:$0xff]  ;;  %v375_v38 = vld [vmem:[%s10722_s15 + $0x198] sm:$0xff] }
 0x27c   : > { %v379_v39 = vld [vmem:[%s10722_s15 + $0x1b8] sm:$0xff] }
 0x27e   : > { %6936 = vmatpush1.bf16.msra.mxu0 %v9798_v8  ;;  %7264 = vmatpush1.bf16.msra.mxu1 %v9800_v2  ;;  %v347_v8 = vld [vmem:[%s10722_s15 + $0xb8] sm:$0xff]  ;;  %v8826_v2 = vcombine.low %v334_v46, %v338_v47  ;;  %v382_v46 = vld [vmem:[%s10722_s15 + $0x1d0] sm:$0xff] }
 0x27f   : > { %6937 = vmatprep.subr.bf16.mxu0 %v9807_v3  ;;  %7265 = vmatprep.subr.bf16.mxu1 %v9809_v4  ;;  %v8828_v3 = vcombine.low %v335_v50, %v339_v52  ;;  %v8835_v4 = vcombine.high %v342_v60, %v346_v61  ;;  %v8837_v31 = vcombine.high %v343_v62, %v347_v8  ;;  %v386_v47 = vld [vmem:[%s10722_s15 + $0x1f0] sm:$0xff]  ;;  %v383_v50 = vld [vmem:[%s10722_s15 + $0x1d8] sm:$0xff] }
 0x280   : > { %v387_v52 = vld [vmem:[%s10722_s15 + $0x1f8] sm:$0xff] }
 0x282   : > { %6938 = vmatpush1.bf16.msra.mxu0 %v9806_v12  ;;  %7266 = vmatpush1.bf16.msra.mxu1 %v9808_v13  ;;  %v355_v12 = vld [vmem:[%s10722_s15 + $0xf8] sm:$0xff]  ;;  %v8834_v13 = vcombine.low %v342_v60, %v346_v61  ;;  %v390_v60 = vld [vmem:[%s10722_s15 + $0x210] sm:$0xff] }
 0x283   : > { %6939 = vmatprep.subr.bf16.mxu0 %v9815_v14  ;;  %7267 = vmatprep.subr.bf16.mxu1 %v9817_v15  ;;  %v8836_v14 = vcombine.low %v343_v62, %v347_v8  ;;  %v8843_v15 = vcombine.high %v350_v6, %v354_v10  ;;  %v8845_v1 = vcombine.high %v351_v11, %v355_v12  ;;  %v394_v61 = vld [vmem:[%s10722_s15 + $0x230] sm:$0xff]  ;;  %v391_v62 = vld [vmem:[%s10722_s15 + $0x218] sm:$0xff] }
 0x284   : > { %v395_v8 = vld [vmem:[%s10722_s15 + $0x238] sm:$0xff] }
 0x286   : > { %6940 = vmatpush1.bf16.msra.mxu0 %v9814_v20  ;;  %7268 = vmatpush1.bf16.msra.mxu1 %v9816_v21  ;;  %v363_v20 = vld [vmem:[%s10722_s15 + $0x138] sm:$0xff]  ;;  %v8842_v21 = vcombine.low %v350_v6, %v354_v10  ;;  %v398_v6 = vld [vmem:[%s10722_s15 + $0x250] sm:$0xff] }
 0x287   : > { %6941 = vmatprep.subr.bf16.mxu0 %v9823_v22  ;;  %7269 = vmatprep.subr.bf16.mxu1 %v9825_v24  ;;  %v8851_v22 = vcombine.high %v358_v17, %v362_v53  ;;  %v8853_v24 = vcombine.high %v359_v16, %v363_v20  ;;  %v402_v10 = vld [vmem:[%s10722_s15 + $0x270] sm:$0xff] }
 0x28a   : > { %6942 = vmatpush1.bf16.msra.mxu0 %v9822_v59  ;;  %7270 = vmatpush1.bf16.msra.mxu1 %v9824_v32  ;;  %v8850_v59 = vcombine.low %v358_v17, %v362_v53  ;;  %v8852_v32 = vcombine.low %v359_v16, %v363_v20  ;;  %v406_v17 = vld [vmem:[%s10722_s15 + $0x290] sm:$0xff]  ;;  %v407_v16 = vld [vmem:[%s10722_s15 + $0x298] sm:$0xff] }
 0x28b   : > { %6943 = vmatprep.subr.bf16.mxu0 %v9831_v33  ;;  %7271 = vmatprep.subr.bf16.mxu1 %v9833_v34  ;;  %v8859_v33 = vcombine.high %v366_v25, %v370_v26  ;;  %v8861_v34 = vcombine.high %v367_v28, %v371_v30  ;;  %v410_v53 = vld [vmem:[%s10722_s15 + $0x2b0] sm:$0xff]  ;;  %v411_v20 = vld [vmem:[%s10722_s15 + $0x2b8] sm:$0xff] }
 0x28e   : > { %6944 = vmatpush1.bf16.msra.mxu0 %v9830_v41  ;;  %7272 = vmatpush1.bf16.msra.mxu1 %v9832_v42  ;;  %v8858_v41 = vcombine.low %v366_v25, %v370_v26  ;;  %v8860_v42 = vcombine.low %v367_v28, %v371_v30  ;;  %v414_v25 = vld [vmem:[%s10722_s15 + $0x2d0] sm:$0xff]  ;;  %v415_v28 = vld [vmem:[%s10722_s15 + $0x2d8] sm:$0xff] }
 0x28f   : > { %7282 = vmatprep.subr.bf16.mxu0 %v8819_v44  ;;  %7610 = vmatprep.subr.bf16.mxu1 %v8821_v45  ;;  %v8867_v44 = vcombine.high %v374_v35, %v378_v36  ;;  %v8869_v45 = vcombine.high %v375_v38, %v379_v39  ;;  %v418_v26 = vld [vmem:[%s10722_s15 + $0x2f0] sm:$0xff]  ;;  %v419_v30 = vld [vmem:[%s10722_s15 + $0x2f8] sm:$0xff] }
 0x291   : > { %6946 = vmatmul.mubr.bf16.vlgmr.msra.gmra.mrb[0].mxu0 %v11388_v49  ;;  %7274 = vmatmul.mubr.bf16.vlgmr.msra.gmra.mrb[0].mxu1 %v11388_v49 }
 0x292   : > { %7283 = vmatpush1.bf16.msra.mxu0 %v8818_v54  ;;  %7611 = vmatpush1.bf16.msra.mxu1 %v8820_v55  ;;  %v8866_v54 = vcombine.low %v374_v35, %v378_v36  ;;  %v8868_v55 = vcombine.low %v375_v38, %v379_v39  ;;  %v422_v35 = vld [vmem:[%s10722_s15 + $0x310] sm:$0xff]  ;;  %v423_v38 = vld [vmem:[%s10722_s15 + $0x318] sm:$0xff] }
 0x293   : > { %7284 = vmatprep.subr.bf16.mxu0 %v8827_v56  ;;  %7612 = vmatprep.subr.bf16.mxu1 %v8829_v57  ;;  %v8875_v56 = vcombine.high %v382_v46, %v386_v47  ;;  %v8877_v57 = vcombine.high %v383_v50, %v387_v52  ;;  %v426_v36 = vld [vmem:[%s10722_s15 + $0x330] sm:$0xff]  ;;  %v427_v39 = vld [vmem:[%s10722_s15 + $0x338] sm:$0xff] }
 0x294   : > { %7314 = vmatprep.mubr.bf16.mxu0 %v10792_v9  ;;  %7642 = vmatprep.mubr.bf16.mxu1 %v10792_v9  ;;  %v8844_v9 = vcombine.low %v351_v11, %v355_v12  ;;  %v399_v11 = vld [vmem:[%s10722_s15 + $0x258] sm:$0xff] }
 0x295   : > { %v403_v12 = vld [vmem:[%s10722_s15 + $0x278] sm:$0xff] }
 0x296   : > { %7285 = vmatpush1.bf16.msra.mxu0 %v8826_v2  ;;  %7613 = vmatpush1.bf16.msra.mxu1 %v8828_v3  ;;  %v8874_v2 = vcombine.low %v382_v46, %v386_v47  ;;  %v8876_v3 = vcombine.low %v383_v50, %v387_v52  ;;  %v430_v46 = vld [vmem:[%s10722_s15 + $0x350] sm:$0xff]  ;;  %v431_v50 = vld [vmem:[%s10722_s15 + $0x358] sm:$0xff] }
 0x297   : > { %7286 = vmatprep.subr.bf16.mxu0 %v8835_v4  ;;  %7614 = vmatprep.subr.bf16.mxu1 %v8837_v31  ;;  %v8883_v4 = vcombine.high %v390_v60, %v394_v61  ;;  %v8885_v31 = vcombine.high %v391_v62, %v395_v8  ;;  %v434_v47 = vld [vmem:[%s10722_s15 + $0x370] sm:$0xff]  ;;  %v435_v52 = vld [vmem:[%s10722_s15 + $0x378] sm:$0xff] }
 0x29a   : > { %7287 = vmatpush1.bf16.msra.mxu0 %v8834_v13  ;;  %7615 = vmatpush1.bf16.msra.mxu1 %v8836_v14  ;;  %v8882_v13 = vcombine.low %v390_v60, %v394_v61  ;;  %v8884_v14 = vcombine.low %v391_v62, %v395_v8  ;;  %v438_v60 = vld [vmem:[%s10722_s15 + $0x390] sm:$0xff]  ;;  %v439_v62 = vld [vmem:[%s10722_s15 + $0x398] sm:$0xff] }
 0x29b   : > { %7288 = vmatprep.subr.bf16.mxu0 %v8843_v15  ;;  %7616 = vmatprep.subr.bf16.mxu1 %v8845_v1  ;;  %v8891_v15 = vcombine.high %v398_v6, %v402_v10  ;;  %v8893_v1 = vcombine.high %v399_v11, %v403_v12  ;;  %v442_v61 = vld [vmem:[%s10722_s15 + $0x3b0] sm:$0xff]  ;;  %v443_v8 = vld [vmem:[%s10722_s15 + $0x3b8] sm:$0xff] }
 0x29e   : > { %7289 = vmatpush1.bf16.msra.mxu0 %v8842_v21  ;;  %7617 = vmatpush1.bf16.msra.mxu1 %v8844_v9  ;;  %v8890_v21 = vcombine.low %v398_v6, %v402_v10  ;;  %v8892_v9 = vcombine.low %v399_v11, %v403_v12  ;;  %v446_v6 = vld [vmem:[%s10722_s15 + $0x3d0] sm:$0xff]  ;;  %v447_v11 = vld [vmem:[%s10722_s15 + $0x3d8] sm:$0xff] }
 0x29f   : > { %7290 = vmatprep.subr.bf16.mxu0 %v8851_v22  ;;  %7618 = vmatprep.subr.bf16.mxu1 %v8853_v24  ;;  %v8899_v22 = vcombine.high %v406_v17, %v410_v53  ;;  %v8901_v24 = vcombine.high %v407_v16, %v411_v20  ;;  %v450_v10 = vld [vmem:[%s10722_s15 + $0x3f0] sm:$0xff]  ;;  %v451_v12 = vld [vmem:[%s10722_s15 + $0x3f8] sm:$0xff] }
 0x2a2   : > { %7291 = vmatpush1.bf16.msra.mxu0 %v8850_v59  ;;  %7619 = vmatpush1.bf16.msra.mxu1 %v8852_v32  ;;  %v8898_v59 = vcombine.low %v406_v17, %v410_v53  ;;  %v8900_v32 = vcombine.low %v407_v16, %v411_v20  ;;  %v454_v17 = vld [vmem:[%s10722_s15 + $0x410] sm:$0xff]  ;;  %v455_v16 = vld [vmem:[%s10722_s15 + $0x418] sm:$0xff] }
 0x2a3   : > { %7292 = vmatprep.subr.bf16.mxu0 %v8859_v33  ;;  %7620 = vmatprep.subr.bf16.mxu1 %v8861_v34  ;;  %v8907_v33 = vcombine.high %v414_v25, %v418_v26  ;;  %v8909_v34 = vcombine.high %v415_v28, %v419_v30  ;;  %v458_v53 = vld [vmem:[%s10722_s15 + $0x430] sm:$0xff]  ;;  %v459_v20 = vld [vmem:[%s10722_s15 + $0x438] sm:$0xff] }
 0x2a6   : > { %7293 = vmatpush1.bf16.msra.mxu0 %v8858_v41  ;;  %7621 = vmatpush1.bf16.msra.mxu1 %v8860_v42  ;;  %v8906_v41 = vcombine.low %v414_v25, %v418_v26  ;;  %v8908_v42 = vcombine.low %v415_v28, %v419_v30  ;;  %v462_v25 = vld [vmem:[%s10722_s15 + $0x450] sm:$0xff]  ;;  %v463_v28 = vld [vmem:[%s10722_s15 + $0x458] sm:$0xff] }
 0x2a7   : > { %7294 = vmatprep.subr.bf16.mxu0 %v8867_v44  ;;  %7622 = vmatprep.subr.bf16.mxu1 %v8869_v45  ;;  %v8915_v44 = vcombine.high %v422_v35, %v426_v36  ;;  %v8917_v45 = vcombine.high %v423_v38, %v427_v39  ;;  %v466_v26 = vld [vmem:[%s10722_s15 + $0x470] sm:$0xff]  ;;  %v467_v30 = vld [vmem:[%s10722_s15 + $0x478] sm:$0xff] }
 0x2aa   : > { %7295 = vmatpush1.bf16.msra.mxu0 %v8866_v54  ;;  %7623 = vmatpush1.bf16.msra.mxu1 %v8868_v55  ;;  %v8914_v54 = vcombine.low %v422_v35, %v426_v36  ;;  %v8916_v55 = vcombine.low %v423_v38, %v427_v39  ;;  %v470_v35 = vld [vmem:[%s10722_s15 + $0x490] sm:$0xff]  ;;  %v471_v38 = vld [vmem:[%s10722_s15 + $0x498] sm:$0xff] }
 0x2ab   : > { %7296 = vmatprep.subr.bf16.mxu0 %v8875_v56  ;;  %7624 = vmatprep.subr.bf16.mxu1 %v8877_v57  ;;  %v8923_v56 = vcombine.high %v430_v46, %v434_v47  ;;  %v8925_v57 = vcombine.high %v431_v50, %v435_v52  ;;  %v474_v36 = vld [vmem:[%s10722_s15 + $0x4b0] sm:$0xff]  ;;  %v475_v39 = vld [vmem:[%s10722_s15 + $0x4b8] sm:$0xff] }
 0x2ae   : > { %7297 = vmatpush1.bf16.msra.mxu0 %v8874_v2  ;;  %7625 = vmatpush1.bf16.msra.mxu1 %v8876_v3  ;;  %v8922_v2 = vcombine.low %v430_v46, %v434_v47  ;;  %v8924_v3 = vcombine.low %v431_v50, %v435_v52  ;;  %v478_v46 = vld [vmem:[%s10722_s15 + $0x4d0] sm:$0xff]  ;;  %v479_v50 = vld [vmem:[%s10722_s15 + $0x4d8] sm:$0xff] }
 0x2af   : > { %7298 = vmatprep.subr.bf16.mxu0 %v8883_v4  ;;  %7626 = vmatprep.subr.bf16.mxu1 %v8885_v31  ;;  %v8931_v4 = vcombine.high %v438_v60, %v442_v61  ;;  %v8933_v31 = vcombine.high %v439_v62, %v443_v8  ;;  %v482_v47 = vld [vmem:[%s10722_s15 + $0x4f0] sm:$0xff]  ;;  %v483_v52 = vld [vmem:[%s10722_s15 + $0x4f8] sm:$0xff] }
 0x2b2   : > { %7299 = vmatpush1.bf16.msra.mxu0 %v8882_v13  ;;  %7627 = vmatpush1.bf16.msra.mxu1 %v8884_v14  ;;  %v8930_v13 = vcombine.low %v438_v60, %v442_v61  ;;  %v8932_v14 = vcombine.low %v439_v62, %v443_v8  ;;  %v490_v60 = vld [vmem:[%s10722_s15 + $0x530] sm:$0xff]  ;;  %v487_v61 = vld [vmem:[%s10722_s15 + $0x518] sm:$0xff]  ;;  %v8970_v8 = vcombine.low %v478_v46, %v482_v47 }
 0x2b3   : > { %7300 = vmatprep.subr.bf16.mxu0 %v8891_v15  ;;  %7628 = vmatprep.subr.bf16.mxu1 %v8893_v1  ;;  %v8939_v15 = vcombine.high %v446_v6, %v450_v10  ;;  %v8941_v1 = vcombine.high %v447_v11, %v451_v12  ;;  %v491_v62 = vld [vmem:[%s10722_s15 + $0x538] sm:$0xff] }
 0x2b6   : > { %7301 = vmatpush1.bf16.msra.mxu0 %v8890_v21  ;;  %7629 = vmatpush1.bf16.msra.mxu1 %v8892_v9  ;;  %v8938_v21 = vcombine.low %v446_v6, %v450_v10  ;;  %v8940_v9 = vcombine.low %v447_v11, %v451_v12  ;;  %v495_v6 = vld [vmem:[%s10722_s15 + $0x558] sm:$0xff]  ;;  %v8980_v12 = vcombine.low %v487_v61, %v491_v62 }
 0x2b7   : > { %7302 = vmatprep.subr.bf16.mxu0 %v8899_v22  ;;  %7630 = vmatprep.subr.bf16.mxu1 %v8901_v24  ;;  %v8947_v22 = vcombine.high %v454_v17, %v458_v53  ;;  %v8949_v24 = vcombine.high %v455_v16, %v459_v20  ;;  %v499_v10 = vld [vmem:[%s10722_s15 + $0x578] sm:$0xff] }
 0x2ba   : > { %7303 = vmatpush1.bf16.msra.mxu0 %v8898_v59  ;;  %7631 = vmatpush1.bf16.msra.mxu1 %v8900_v32  ;;  %v8946_v59 = vcombine.low %v454_v17, %v458_v53  ;;  %v8948_v32 = vcombine.low %v455_v16, %v459_v20  ;;  %v503_v17 = vld [vmem:[%s10722_s15 + $0x598] sm:$0xff]  ;;  %v8988_v20 = vcombine.low %v495_v6, %v499_v10 }
 0x2bb   : > { %7304 = vmatprep.subr.bf16.mxu0 %v8907_v33  ;;  %7632 = vmatprep.subr.bf16.mxu1 %v8909_v34  ;;  %v8955_v33 = vcombine.high %v462_v25, %v466_v26  ;;  %v8957_v34 = vcombine.high %v463_v28, %v467_v30  ;;  %v507_v53 = vld [vmem:[%s10722_s15 + $0x5b8] sm:$0xff] }
 0x2be   : > { %7305 = vmatpush1.bf16.msra.mxu0 %v8906_v41  ;;  %7633 = vmatpush1.bf16.msra.mxu1 %v8908_v42  ;;  %v8954_v41 = vcombine.low %v462_v25, %v466_v26  ;;  %v8956_v42 = vcombine.low %v463_v28, %v467_v30  ;;  %v511_v25 = vld [vmem:[%s10722_s15 + $0x5d8] sm:$0xff]  ;;  %v8996_v30 = vcombine.low %v503_v17, %v507_v53 }
 0x2bf   : > { %7306 = vmatprep.subr.bf16.mxu0 %v8915_v44  ;;  %7634 = vmatprep.subr.bf16.mxu1 %v8917_v45  ;;  %v8963_v44 = vcombine.high %v470_v35, %v474_v36  ;;  %v8965_v45 = vcombine.high %v471_v38, %v475_v39  ;;  %v515_v26 = vld [vmem:[%s10722_s15 + $0x5f8] sm:$0xff] }
 0x2c2   : > { %7307 = vmatpush1.bf16.msra.mxu0 %v8914_v54  ;;  %7635 = vmatpush1.bf16.msra.mxu1 %v8916_v55  ;;  %v8964_v54 = vcombine.low %v471_v38, %v475_v39  ;;  %v8971_v55 = vcombine.high %v478_v46, %v482_v47  ;;  %v9004_v39 = vcombine.low %v511_v25, %v515_v26  ;;  %v527_v46 = vld [vmem:[%s10722_s15 + $0x658] sm:$0xff] }
 0x2c3   : > { %7308 = vmatprep.subr.bf16.mxu0 %v8923_v56  ;;  %7636 = vmatprep.subr.bf16.mxu1 %v8925_v57  ;;  %v8973_v56 = vcombine.high %v479_v50, %v483_v52  ;;  %v486_v57 = vld [vmem:[%s10722_s15 + $0x510] sm:$0xff]  ;;  %v531_v47 = vld [vmem:[%s10722_s15 + $0x678] sm:$0xff] }
 0x2c4   : > { %v8978_v11 = vcombine.low %v486_v57, %v490_v60 }
 0x2c6   : > { %7309 = vmatpush1.bf16.msra.mxu0 %v8922_v2  ;;  %7637 = vmatpush1.bf16.msra.mxu1 %v8924_v3  ;;  %v8979_v2 = vcombine.high %v486_v57, %v490_v60  ;;  %v8981_v3 = vcombine.high %v487_v61, %v491_v62  ;;  %v535_v57 = vld [vmem:[%s10722_s15 + $0x698] sm:$0xff]  ;;  %v9020_v62 = vcombine.low %v527_v46, %v531_v47 }
 0x2c7   : > { %7310 = vmatprep.subr.bf16.mxu0 %v8931_v4  ;;  %7638 = vmatprep.subr.bf16.mxu1 %v8933_v31  ;;  %v494_v4 = vld [vmem:[%s10722_s15 + $0x550] sm:$0xff]  ;;  %v539_v60 = vld [vmem:[%s10722_s15 + $0x6b8] sm:$0xff] }
 0x2c8   : > { %v498_v31 = vld [vmem:[%s10722_s15 + $0x570] sm:$0xff] }
 0x2c9   : > { %v8986_v16 = vcombine.low %v494_v4, %v498_v31 }
 0x2ca   : > { %7311 = vmatpush1.bf16.msra.mxu0 %v8930_v13  ;;  %7639 = vmatpush1.bf16.msra.mxu1 %v8932_v14  ;;  %v8987_v13 = vcombine.high %v494_v4, %v498_v31  ;;  %v8989_v14 = vcombine.high %v495_v6, %v499_v10  ;;  %v543_v4 = vld [vmem:[%s10722_s15 + $0x6d8] sm:$0xff]  ;;  %v9028_v10 = vcombine.low %v535_v57, %v539_v60 }
 0x2cb   : > { %7312 = vmatprep.subr.bf16.mxu0 %v8939_v15  ;;  %7640 = vmatprep.subr.bf16.mxu1 %v8941_v1  ;;  %v502_v15 = vld [vmem:[%s10722_s15 + $0x590] sm:$0xff]  ;;  %v547_v31 = vld [vmem:[%s10722_s15 + $0x6f8] sm:$0xff] }
 0x2cc   : > { %v506_v1 = vld [vmem:[%s10722_s15 + $0x5b0] sm:$0xff] }
 0x2cd   : > { %v8994_v28 = vcombine.low %v502_v15, %v506_v1 }
 0x2ce   : > { %7313 = vmatpush1.bf16.msra.mxu0 %v8938_v21  ;;  %7641 = vmatpush1.bf16.msra.mxu1 %v8940_v9  ;;  %v8995_v21 = vcombine.high %v502_v15, %v506_v1  ;;  %v8997_v9 = vcombine.high %v503_v17, %v507_v53  ;;  %v551_v15 = vld [vmem:[%s10722_s15 + $0x718] sm:$0xff]  ;;  %v9036_v53 = vcombine.low %v543_v4, %v547_v31 }
 0x2cf   : > { %7323 = vmatprep.subr.bf16.mxu0 %v8947_v22  ;;  %7651 = vmatprep.subr.bf16.mxu1 %v8949_v24  ;;  %v510_v22 = vld [vmem:[%s10722_s15 + $0x5d0] sm:$0xff]  ;;  %v555_v1 = vld [vmem:[%s10722_s15 + $0x738] sm:$0xff] }
 0x2d0   : > { %v514_v24 = vld [vmem:[%s10722_s15 + $0x5f0] sm:$0xff] }
 0x2d1   : > { %7315 = vmatmul.mubr.bf16.vlgmr.msra.gmra.mrb[4].mxu0 %v10834_v23  ;;  %7643 = vmatmul.mubr.bf16.vlgmr.msra.gmra.mrb[4].mxu1 %v10834_v23  ;;  %v8962_v23 = vcombine.low %v470_v35, %v474_v36  ;;  %v519_v35 = vld [vmem:[%s10722_s15 + $0x618] sm:$0xff]  ;;  %v9002_v38 = vcombine.low %v510_v22, %v514_v24 }
 0x2d2   : > { %7324 = vmatpush1.bf16.msra.mxu0 %v8946_v59  ;;  %7652 = vmatpush1.bf16.msra.mxu1 %v8948_v32  ;;  %v9003_v59 = vcombine.high %v510_v22, %v514_v24  ;;  %v9005_v32 = vcombine.high %v511_v25, %v515_v26  ;;  %v523_v36 = vld [vmem:[%s10722_s15 + $0x638] sm:$0xff]  ;;  %v9044_v26 = vcombine.low %v551_v15, %v555_v1 }
 0x2d3   : > { %7325 = vmatprep.subr.bf16.mxu0 %v8955_v33  ;;  %7653 = vmatprep.subr.bf16.mxu1 %v8957_v34  ;;  %v518_v33 = vld [vmem:[%s10722_s15 + $0x610] sm:$0xff]  ;;  %v559_v22 = vld [vmem:[%s10722_s15 + $0x758] sm:$0xff] }
 0x2d4   : > { %7355 = vmatprep.mubr.bf16.mxu0 %v10844_v63  ;;  %7683 = vmatprep.mubr.bf16.mxu1 %v10844_v63  ;;  %v8972_v63 = vcombine.low %v479_v50, %v483_v52  ;;  %v522_v34 = vld [vmem:[%s10722_s15 + $0x630] sm:$0xff]  ;;  %v9012_v52 = vcombine.low %v519_v35, %v523_v36  ;;  %v563_v24 = vld [vmem:[%s10722_s15 + $0x778] sm:$0xff] }
 0x2d5   : > { %v9010_v50 = vcombine.low %v518_v33, %v522_v34 }
 0x2d6   : > { %7326 = vmatpush1.bf16.msra.mxu0 %v8954_v41  ;;  %7654 = vmatpush1.bf16.msra.mxu1 %v8956_v42  ;;  %v9011_v41 = vcombine.high %v518_v33, %v522_v34  ;;  %v9013_v42 = vcombine.high %v519_v35, %v523_v36  ;;  %v567_v33 = vld [vmem:[%s10722_s15 + $0x798] sm:$0xff]  ;;  %v9052_v36 = vcombine.low %v559_v22, %v563_v24 }
 0x2d7   : > { %7327 = vmatprep.subr.bf16.mxu0 %v8963_v44  ;;  %7655 = vmatprep.subr.bf16.mxu1 %v8965_v45  ;;  %v526_v44 = vld [vmem:[%s10722_s15 + $0x650] sm:$0xff]  ;;  %v571_v34 = vld [vmem:[%s10722_s15 + $0x7b8] sm:$0xff] }
 0x2d8   : > { %v530_v45 = vld [vmem:[%s10722_s15 + $0x670] sm:$0xff] }
 0x2d9   : > { %v9018_v61 = vcombine.low %v526_v44, %v530_v45 }
 0x2da   : > { %7328 = vmatpush1.bf16.msra.mxu0 %v8962_v23  ;;  %7656 = vmatpush1.bf16.msra.mxu1 %v8964_v54  ;;  %v9019_v23 = vcombine.high %v526_v44, %v530_v45  ;;  %v9021_v54 = vcombine.high %v527_v46, %v531_v47  ;;  %v575_v44 = vld [vmem:[%s10722_s15 + $0x7d8] sm:$0xff]  ;;  %v9060_v47 = vcombine.low %v567_v33, %v571_v34 }
 0x2db   : > { %7329 = vmatprep.subr.bf16.mxu0 %v8971_v55  ;;  %7657 = vmatprep.subr.bf16.mxu1 %v8973_v56  ;;  %v534_v55 = vld [vmem:[%s10722_s15 + $0x690] sm:$0xff]  ;;  %v579_v45 = vld [vmem:[%s10722_s15 + $0x7f8] sm:$0xff] }
 0x2dc   : > { %v538_v56 = vld [vmem:[%s10722_s15 + $0x6b0] sm:$0xff] }
 0x2dd   : > { %v9026_v6 = vcombine.low %v534_v55, %v538_v56 }
 0x2de   : > { %7330 = vmatpush1.bf16.msra.mxu0 %v8970_v8  ;;  %7658 = vmatpush1.bf16.msra.mxu1 %v8972_v63  ;;  %v9027_v8 = vcombine.high %v534_v55, %v538_v56  ;;  %v9029_v63 = vcombine.high %v535_v57, %v539_v60  ;;  %v583_v55 = vld [vmem:[%s10722_s15 + $0x818] sm:$0xff]  ;;  %v9068_v60 = vcombine.low %v575_v44, %v579_v45 }
 0x2df   : > { %7331 = vmatprep.subr.bf16.mxu0 %v8979_v2  ;;  %7659 = vmatprep.subr.bf16.mxu1 %v8981_v3  ;;  %v542_v2 = vld [vmem:[%s10722_s15 + $0x6d0] sm:$0xff]  ;;  %v587_v56 = vld [vmem:[%s10722_s15 + $0x838] sm:$0xff] }
 0x2e0   : > { %v546_v3 = vld [vmem:[%s10722_s15 + $0x6f0] sm:$0xff] }
 0x2e1   : > { %v9034_v17 = vcombine.low %v542_v2, %v546_v3 }
 0x2e2   : > { %7332 = vmatpush1.bf16.msra.mxu0 %v8978_v11  ;;  %7660 = vmatpush1.bf16.msra.mxu1 %v8980_v12  ;;  %v9035_v11 = vcombine.high %v542_v2, %v546_v3  ;;  %v9037_v12 = vcombine.high %v543_v4, %v547_v31  ;;  %v591_v2 = vld [vmem:[%s10722_s15 + $0x858] sm:$0xff]  ;;  %v9076_v31 = vcombine.low %v583_v55, %v587_v56 }
 0x2e3   : > { %7333 = vmatprep.subr.bf16.mxu0 %v8987_v13  ;;  %7661 = vmatprep.subr.bf16.mxu1 %v8989_v14  ;;  %v550_v13 = vld [vmem:[%s10722_s15 + $0x710] sm:$0xff]  ;;  %v595_v3 = vld [vmem:[%s10722_s15 + $0x878] sm:$0xff] }
 0x2e4   : > { %v554_v14 = vld [vmem:[%s10722_s15 + $0x730] sm:$0xff] }
 0x2e5   : > { %v9042_v25 = vcombine.low %v550_v13, %v554_v14 }
 0x2e6   : > { %7334 = vmatpush1.bf16.msra.mxu0 %v8986_v16  ;;  %7662 = vmatpush1.bf16.msra.mxu1 %v8988_v20  ;;  %v9043_v16 = vcombine.high %v550_v13, %v554_v14  ;;  %v9045_v20 = vcombine.high %v551_v15, %v555_v1  ;;  %v599_v13 = vld [vmem:[%s10722_s15 + $0x898] sm:$0xff]  ;;  %v9084_v1 = vcombine.low %v591_v2, %v595_v3 }
 0x2e7   : > { %7335 = vmatprep.subr.bf16.mxu0 %v8995_v21  ;;  %7663 = vmatprep.subr.bf16.mxu1 %v8997_v9  ;;  %v558_v21 = vld [vmem:[%s10722_s15 + $0x750] sm:$0xff]  ;;  %v603_v14 = vld [vmem:[%s10722_s15 + $0x8b8] sm:$0xff] }
 0x2e8   : > { %v562_v9 = vld [vmem:[%s10722_s15 + $0x770] sm:$0xff] }
 0x2e9   : > { %v9050_v35 = vcombine.low %v558_v21, %v562_v9 }
 0x2ea   : > { %7336 = vmatpush1.bf16.msra.mxu0 %v8994_v28  ;;  %7664 = vmatpush1.bf16.msra.mxu1 %v8996_v30  ;;  %v9051_v28 = vcombine.high %v558_v21, %v562_v9  ;;  %v9053_v30 = vcombine.high %v559_v22, %v563_v24  ;;  %v607_v21 = vld [vmem:[%s10722_s15 + $0x8d8] sm:$0xff]  ;;  %v9092_v22 = vcombine.low %v599_v13, %v603_v14 }
 0x2eb   : > { %7337 = vmatprep.subr.bf16.mxu0 %v9003_v59  ;;  %7665 = vmatprep.subr.bf16.mxu1 %v9005_v32  ;;  %v566_v59 = vld [vmem:[%s10722_s15 + $0x790] sm:$0xff]  ;;  %v611_v9 = vld [vmem:[%s10722_s15 + $0x8f8] sm:$0xff] }
 0x2ec   : > { %v570_v32 = vld [vmem:[%s10722_s15 + $0x7b0] sm:$0xff] }
 0x2ed   : > { %v9058_v46 = vcombine.low %v566_v59, %v570_v32 }
 0x2ee   : > { %7338 = vmatpush1.bf16.msra.mxu0 %v9002_v38  ;;  %7666 = vmatpush1.bf16.msra.mxu1 %v9004_v39  ;;  %v9059_v38 = vcombine.high %v566_v59, %v570_v32  ;;  %v9061_v39 = vcombine.high %v567_v33, %v571_v34  ;;  %v619_v59 = vld [vmem:[%s10722_s15 + $0x938] sm:$0xff] }
 0x2ef   : > { %7339 = vmatprep.subr.bf16.mxu0 %v9011_v41  ;;  %7667 = vmatprep.subr.bf16.mxu1 %v9013_v42  ;;  %v574_v41 = vld [vmem:[%s10722_s15 + $0x7d0] sm:$0xff] }
 0x2f0   : > { %v578_v42 = vld [vmem:[%s10722_s15 + $0x7f0] sm:$0xff] }
 0x2f1   : > { %v9066_v57 = vcombine.low %v574_v41, %v578_v42 }
 0x2f2   : > { %7340 = vmatpush1.bf16.msra.mxu0 %v9010_v50  ;;  %7668 = vmatpush1.bf16.msra.mxu1 %v9012_v52  ;;  %v9067_v50 = vcombine.high %v574_v41, %v578_v42  ;;  %v9069_v52 = vcombine.high %v575_v44, %v579_v45 }
 0x2f3   : > { %7341 = vmatprep.subr.bf16.mxu0 %v9019_v23  ;;  %7669 = vmatprep.subr.bf16.mxu1 %v9021_v54  ;;  %v582_v23 = vld [vmem:[%s10722_s15 + $0x810] sm:$0xff] }
 0x2f4   : > { %v586_v54 = vld [vmem:[%s10722_s15 + $0x830] sm:$0xff] }
 0x2f5   : > { %v9074_v4 = vcombine.low %v582_v23, %v586_v54 }
 0x2f6   : > { %7342 = vmatpush1.bf16.msra.mxu0 %v9018_v61  ;;  %7670 = vmatpush1.bf16.msra.mxu1 %v9020_v62  ;;  %v9075_v61 = vcombine.high %v582_v23, %v586_v54  ;;  %v9077_v62 = vcombine.high %v583_v55, %v587_v56 }
 0x2f7   : > { %7343 = vmatprep.subr.bf16.mxu0 %v9027_v8  ;;  %7671 = vmatprep.subr.bf16.mxu1 %v9029_v63  ;;  %v590_v8 = vld [vmem:[%s10722_s15 + $0x850] sm:$0xff] }
 0x2f8   : > { %v594_v63 = vld [vmem:[%s10722_s15 + $0x870] sm:$0xff] }
 0x2f9   : > { %v9082_v15 = vcombine.low %v590_v8, %v594_v63 }
 0x2fa   : > { %7344 = vmatpush1.bf16.msra.mxu0 %v9026_v6  ;;  %7672 = vmatpush1.bf16.msra.mxu1 %v9028_v10  ;;  %v9083_v6 = vcombine.high %v590_v8, %v594_v63  ;;  %v9085_v10 = vcombine.high %v591_v2, %v595_v3 }
 0x2fb   : > { %7345 = vmatprep.subr.bf16.mxu0 %v9035_v11  ;;  %7673 = vmatprep.subr.bf16.mxu1 %v9037_v12  ;;  %v598_v11 = vld [vmem:[%s10722_s15 + $0x890] sm:$0xff] }
 0x2fc   : > { %v602_v12 = vld [vmem:[%s10722_s15 + $0x8b0] sm:$0xff] }
 0x2fe   : > { %7346 = vmatpush1.bf16.msra.mxu0 %v9034_v17  ;;  %7674 = vmatpush1.bf16.msra.mxu1 %v9036_v53  ;;  %v9091_v17 = vcombine.high %v598_v11, %v602_v12  ;;  %v9093_v53 = vcombine.high %v599_v13, %v603_v14 }
 0x2ff   : > { %7347 = vmatprep.subr.bf16.mxu0 %v9043_v16  ;;  %7675 = vmatprep.subr.bf16.mxu1 %v9045_v20  ;;  %v606_v16 = vld [vmem:[%s10722_s15 + $0x8d0] sm:$0xff] }
 0x300   : > { %v610_v20 = vld [vmem:[%s10722_s15 + $0x8f0] sm:$0xff] }
 0x301   : > { %v9099_v24 = vcombine.high %v606_v16, %v610_v20  ;;  %v9098_v32 = vcombine.low %v606_v16, %v610_v20 }
 0x302   : > { %7348 = vmatpush1.bf16.msra.mxu0 %v9042_v25  ;;  %7676 = vmatpush1.bf16.msra.mxu1 %v9044_v26  ;;  %v9101_v25 = vcombine.high %v607_v21, %v611_v9  ;;  %v614_v26 = vld [vmem:[%s10722_s15 + $0x910] sm:$0xff] }
 0x303   : > { %7349 = vmatprep.subr.bf16.mxu0 %v9051_v28  ;;  %7677 = vmatprep.subr.bf16.mxu1 %v9053_v30  ;;  %v618_v28 = vld [vmem:[%s10722_s15 + $0x930] sm:$0xff]  ;;  %v615_v30 = vld [vmem:[%s10722_s15 + $0x918] sm:$0xff] }
 0x304   : > { %v9107_v33 = vcombine.high %v614_v26, %v618_v28  ;;  %v9109_v34 = vcombine.high %v615_v30, %v619_v59  ;;  %v9106_v41 = vcombine.low %v614_v26, %v618_v28  ;;  %v9108_v42 = vcombine.low %v615_v30, %v619_v59 }
 0x306   : > { %7350 = vmatpush1.bf16.msra.mxu0 %v9050_v35  ;;  %7678 = vmatpush1.bf16.msra.mxu1 %v9052_v36  ;;  %v622_v35 = vld [vmem:[%s10722_s15 + $0x950] sm:$0xff] }
 0x307   : > { %7351 = vmatprep.subr.bf16.mxu0 %v9059_v38  ;;  %7679 = vmatprep.subr.bf16.mxu1 %v9061_v39  ;;  %v626_v36 = vld [vmem:[%s10722_s15 + $0x970] sm:$0xff]  ;;  %v623_v38 = vld [vmem:[%s10722_s15 + $0x958] sm:$0xff] }
 0x308   : > { %v627_v39 = vld [vmem:[%s10722_s15 + $0x978] sm:$0xff]  ;;  %v9115_v44 = vcombine.high %v622_v35, %v626_v36  ;;  %v9114_v23 = vcombine.low %v622_v35, %v626_v36 }
 0x309   : > { %v9117_v45 = vcombine.high %v623_v38, %v627_v39  ;;  %v9116_v54 = vcombine.low %v623_v38, %v627_v39 }
 0x30a   : > { %7352 = vmatpush1.bf16.msra.mxu0 %v9058_v46  ;;  %7680 = vmatpush1.bf16.msra.mxu1 %v9060_v47  ;;  %v630_v46 = vld [vmem:[%s10722_s15 + $0x990] sm:$0xff] }
 0x30b   : > { %7353 = vmatprep.subr.bf16.mxu0 %v9067_v50  ;;  %7681 = vmatprep.subr.bf16.mxu1 %v9069_v52  ;;  %v634_v47 = vld [vmem:[%s10722_s15 + $0x9b0] sm:$0xff]  ;;  %v631_v50 = vld [vmem:[%s10722_s15 + $0x998] sm:$0xff] }
 0x30c   : > { %v635_v52 = vld [vmem:[%s10722_s15 + $0x9b8] sm:$0xff]  ;;  %v9123_v55 = vcombine.high %v630_v46, %v634_v47  ;;  %v9122_v8 = vcombine.low %v630_v46, %v634_v47 }
 0x30d   : > { %v9125_v56 = vcombine.high %v631_v50, %v635_v52  ;;  %v9124_v63 = vcombine.low %v631_v50, %v635_v52 }
 0x30e   : > { %7354 = vmatpush1.bf16.msra.mxu0 %v9066_v57  ;;  %7682 = vmatpush1.bf16.msra.mxu1 %v9068_v60  ;;  %v638_v57 = vld [vmem:[%s10722_s15 + $0x9d0] sm:$0xff] }
 0x30f   : > { %7364 = vmatprep.subr.bf16.mxu0 %v9075_v61  ;;  %7692 = vmatprep.subr.bf16.mxu1 %v9077_v62  ;;  %v642_v60 = vld [vmem:[%s10722_s15 + $0x9f0] sm:$0xff]  ;;  %v639_v61 = vld [vmem:[%s10722_s15 + $0x9d8] sm:$0xff] }
 0x310   : > { %v643_v62 = vld [vmem:[%s10722_s15 + $0x9f8] sm:$0xff]  ;;  %v9131_v2 = vcombine.high %v638_v57, %v642_v60 }
 0x311   : > { %7356 = vmatmul.mubr.bf16.vlgmr.msra.gmra.mrb[4].mxu0 %v10919_v40  ;;  %7684 = vmatmul.mubr.bf16.vlgmr.msra.gmra.mrb[4].mxu1 %v10919_v40  ;;  %v9090_v40 = vcombine.low %v598_v11, %v602_v12  ;;  %v9133_v3 = vcombine.high %v639_v61, %v643_v62  ;;  %v9130_v11 = vcombine.low %v638_v57, %v642_v60 }
 0x312   : > { %7365 = vmatpush1.bf16.msra.mxu0 %v9074_v4  ;;  %7693 = vmatpush1.bf16.msra.mxu1 %v9076_v31  ;;  %v646_v4 = vld [vmem:[%s10722_s15 + $0xa10] sm:$0xff]  ;;  %v9132_v12 = vcombine.low %v639_v61, %v643_v62 }
 0x313   : > { %7366 = vmatprep.subr.bf16.mxu0 %v9083_v6  ;;  %7694 = vmatprep.subr.bf16.mxu1 %v9085_v10  ;;  %v650_v31 = vld [vmem:[%s10722_s15 + $0xa30] sm:$0xff]  ;;  %v647_v6 = vld [vmem:[%s10722_s15 + $0xa18] sm:$0xff] }
 0x314   : > { %7396 = vmatprep.mubr.bf16.mxu0 %v10924_v48  ;;  %7724 = vmatprep.mubr.bf16.mxu1 %v10924_v48  ;;  %v9100_v48 = vcombine.low %v607_v21, %v611_v9  ;;  %v651_v10 = vld [vmem:[%s10722_s15 + $0xa38] sm:$0xff]  ;;  %v9139_v13 = vcombine.high %v646_v4, %v650_v31  ;;  %v9138_v16 = vcombine.low %v646_v4, %v650_v31 }
 0x315   : > { %v9141_v14 = vcombine.high %v647_v6, %v651_v10  ;;  %v9140_v20 = vcombine.low %v647_v6, %v651_v10 }
 0x316   : > { %7367 = vmatpush1.bf16.msra.mxu0 %v9082_v15  ;;  %7695 = vmatpush1.bf16.msra.mxu1 %v9084_v1  ;;  %v654_v15 = vld [vmem:[%s10722_s15 + $0xa50] sm:$0xff] }
 0x317   : > { %7368 = vmatprep.subr.bf16.mxu0 %v9091_v17  ;;  %7696 = vmatprep.subr.bf16.mxu1 %v9093_v53  ;;  %v658_v1 = vld [vmem:[%s10722_s15 + $0xa70] sm:$0xff]  ;;  %v655_v17 = vld [vmem:[%s10722_s15 + $0xa58] sm:$0xff] }
 0x318   : > { %v659_v53 = vld [vmem:[%s10722_s15 + $0xa78] sm:$0xff]  ;;  %v9147_v21 = vcombine.high %v654_v15, %v658_v1  ;;  %v9146_v26 = vcombine.low %v654_v15, %v658_v1 }
 0x319   : > { %v9149_v9 = vcombine.high %v655_v17, %v659_v53  ;;  %v9148_v28 = vcombine.low %v655_v17, %v659_v53 }
 0x31a   : > { %7369 = vmatpush1.bf16.msra.mxu0 %v9090_v40  ;;  %7697 = vmatpush1.bf16.msra.mxu1 %v9092_v22  ;;  %v662_v40 = vld [vmem:[%s10722_s15 + $0xa90] sm:$0xff] }
 0x31b   : > { %7370 = vmatprep.subr.bf16.mxu0 %v9099_v24  ;;  %7698 = vmatprep.subr.bf16.mxu1 %v9101_v25  ;;  %v666_v22 = vld [vmem:[%s10722_s15 + $0xab0] sm:$0xff]  ;;  %v663_v24 = vld [vmem:[%s10722_s15 + $0xa98] sm:$0xff] }
 0x31c   : > { %v667_v25 = vld [vmem:[%s10722_s15 + $0xab8] sm:$0xff]  ;;  %v9155_v30 = vcombine.high %v662_v40, %v666_v22  ;;  %v9154_v35 = vcombine.low %v662_v40, %v666_v22 }
 0x31d   : > { %v9157_v59 = vcombine.high %v663_v24, %v667_v25  ;;  %v9156_v36 = vcombine.low %v663_v24, %v667_v25 }
 0x31e   : > { %7371 = vmatpush1.bf16.msra.mxu0 %v9098_v32  ;;  %7699 = vmatpush1.bf16.msra.mxu1 %v9100_v48  ;;  %v670_v32 = vld [vmem:[%s10722_s15 + $0xad0] sm:$0xff] }
 0x31f   : > { %7372 = vmatprep.subr.bf16.mxu0 %v9107_v33  ;;  %7700 = vmatprep.subr.bf16.mxu1 %v9109_v34  ;;  %v674_v48 = vld [vmem:[%s10722_s15 + $0xaf0] sm:$0xff]  ;;  %v671_v33 = vld [vmem:[%s10722_s15 + $0xad8] sm:$0xff] }
 0x320   : > { %v675_v34 = vld [vmem:[%s10722_s15 + $0xaf8] sm:$0xff]  ;;  %v9163_v38 = vcombine.high %v670_v32, %v674_v48  ;;  %v9162_v46 = vcombine.low %v670_v32, %v674_v48 }
 0x321   : > { %v9165_v39 = vcombine.high %v671_v33, %v675_v34  ;;  %v9164_v47 = vcombine.low %v671_v33, %v675_v34 }
 0x322   : > { %7373 = vmatpush1.bf16.msra.mxu0 %v9106_v41  ;;  %7701 = vmatpush1.bf16.msra.mxu1 %v9108_v42  ;;  %v678_v41 = vld [vmem:[%s10722_s15 + $0xb10] sm:$0xff] }
 0x323   : > { %7374 = vmatprep.subr.bf16.mxu0 %v9115_v44  ;;  %7702 = vmatprep.subr.bf16.mxu1 %v9117_v45  ;;  %v682_v42 = vld [vmem:[%s10722_s15 + $0xb30] sm:$0xff]  ;;  %v679_v44 = vld [vmem:[%s10722_s15 + $0xb18] sm:$0xff] }
 0x324   : > { %v683_v45 = vld [vmem:[%s10722_s15 + $0xb38] sm:$0xff]  ;;  %v9171_v50 = vcombine.high %v678_v41, %v682_v42  ;;  %v9170_v57 = vcombine.low %v678_v41, %v682_v42 }
 0x325   : > { %v9173_v52 = vcombine.high %v679_v44, %v683_v45  ;;  %v9172_v60 = vcombine.low %v679_v44, %v683_v45 }
 0x326   : > { %7375 = vmatpush1.bf16.msra.mxu0 %v9114_v23  ;;  %7703 = vmatpush1.bf16.msra.mxu1 %v9116_v54  ;;  %v686_v23 = vld [vmem:[%s10722_s15 + $0xb50] sm:$0xff] }
 0x327   : > { %7376 = vmatprep.subr.bf16.mxu0 %v9123_v55  ;;  %7704 = vmatprep.subr.bf16.mxu1 %v9125_v56  ;;  %v690_v54 = vld [vmem:[%s10722_s15 + $0xb70] sm:$0xff]  ;;  %v687_v55 = vld [vmem:[%s10722_s15 + $0xb58] sm:$0xff] }
 0x328   : > { %v691_v56 = vld [vmem:[%s10722_s15 + $0xb78] sm:$0xff]  ;;  %v9179_v61 = vcombine.high %v686_v23, %v690_v54  ;;  %v9178_v4 = vcombine.low %v686_v23, %v690_v54 }
 0x329   : > { %v9181_v62 = vcombine.high %v687_v55, %v691_v56  ;;  %v9180_v31 = vcombine.low %v687_v55, %v691_v56  ;;  %v742_v56 = vld [vmem:[%s10722_s15 + $0xd10] sm:$0xff] }
 0x32a   : > { %7377 = vmatpush1.bf16.msra.mxu0 %v9122_v8  ;;  %7705 = vmatpush1.bf16.msra.mxu1 %v9124_v63  ;;  %v694_v8 = vld [vmem:[%s10722_s15 + $0xb90] sm:$0xff] }
 0x32b   : > { %7378 = vmatprep.subr.bf16.mxu0 %v9131_v2  ;;  %7706 = vmatprep.subr.bf16.mxu1 %v9133_v3  ;;  %v698_v63 = vld [vmem:[%s10722_s15 + $0xbb0] sm:$0xff]  ;;  %v695_v2 = vld [vmem:[%s10722_s15 + $0xb98] sm:$0xff] }
 0x32c   : > { %v699_v3 = vld [vmem:[%s10722_s15 + $0xbb8] sm:$0xff]  ;;  %v9187_v6 = vcombine.high %v694_v8, %v698_v63  ;;  %v9186_v15 = vcombine.low %v694_v8, %v698_v63 }
 0x32d   : > { %v9189_v10 = vcombine.high %v695_v2, %v699_v3  ;;  %v9188_v1 = vcombine.low %v695_v2, %v699_v3  ;;  %v750_v2 = vld [vmem:[%s10722_s15 + $0xd50] sm:$0xff] }
 0x32e   : > { %7379 = vmatpush1.bf16.msra.mxu0 %v9130_v11  ;;  %7707 = vmatpush1.bf16.msra.mxu1 %v9132_v12  ;;  %v702_v11 = vld [vmem:[%s10722_s15 + $0xbd0] sm:$0xff] }
 0x32f   : > { %7380 = vmatprep.subr.bf16.mxu0 %v9139_v13  ;;  %7708 = vmatprep.subr.bf16.mxu1 %v9141_v14  ;;  %v706_v12 = vld [vmem:[%s10722_s15 + $0xbf0] sm:$0xff]  ;;  %v703_v13 = vld [vmem:[%s10722_s15 + $0xbd8] sm:$0xff] }
 0x330   : > { %v707_v14 = vld [vmem:[%s10722_s15 + $0xbf8] sm:$0xff]  ;;  %v9195_v17 = vcombine.high %v702_v11, %v706_v12  ;;  %v9194_v40 = vcombine.low %v702_v11, %v706_v12  ;;  %v754_v3 = vld [vmem:[%s10722_s15 + $0xd70] sm:$0xff] }
 0x331   : > { %v9197_v53 = vcombine.high %v703_v13, %v707_v14  ;;  %v9196_v22 = vcombine.low %v703_v13, %v707_v14  ;;  %v9243_v11 = vcombine.high %v750_v2, %v754_v3  ;;  %v758_v13 = vld [vmem:[%s10722_s15 + $0xd90] sm:$0xff] }
 0x332   : > { %7381 = vmatpush1.bf16.msra.mxu0 %v9138_v16  ;;  %7709 = vmatpush1.bf16.msra.mxu1 %v9140_v20  ;;  %v710_v16 = vld [vmem:[%s10722_s15 + $0xc10] sm:$0xff] }
 0x333   : > { %7382 = vmatprep.subr.bf16.mxu0 %v9147_v21  ;;  %7710 = vmatprep.subr.bf16.mxu1 %v9149_v9  ;;  %v714_v20 = vld [vmem:[%s10722_s15 + $0xc30] sm:$0xff]  ;;  %v711_v21 = vld [vmem:[%s10722_s15 + $0xc18] sm:$0xff] }
 0x334   : > { %v715_v9 = vld [vmem:[%s10722_s15 + $0xc38] sm:$0xff]  ;;  %v9203_v24 = vcombine.high %v710_v16, %v714_v20  ;;  %v9202_v32 = vcombine.low %v710_v16, %v714_v20  ;;  %v762_v14 = vld [vmem:[%s10722_s15 + $0xdb0] sm:$0xff] }
 0x335   : > { %v9205_v25 = vcombine.high %v711_v21, %v715_v9  ;;  %v9204_v48 = vcombine.low %v711_v21, %v715_v9  ;;  %v9251_v16 = vcombine.high %v758_v13, %v762_v14  ;;  %v766_v9 = vld [vmem:[%s10722_s15 + $0xdd0] sm:$0xff] }
 0x336   : > { %7383 = vmatpush1.bf16.msra.mxu0 %v9146_v26  ;;  %7711 = vmatpush1.bf16.msra.mxu1 %v9148_v28  ;;  %v718_v26 = vld [vmem:[%s10722_s15 + $0xc50] sm:$0xff] }
 0x337   : > { %7384 = vmatprep.subr.bf16.mxu0 %v9155_v30  ;;  %7712 = vmatprep.subr.bf16.mxu1 %v9157_v59  ;;  %v722_v28 = vld [vmem:[%s10722_s15 + $0xc70] sm:$0xff]  ;;  %v719_v30 = vld [vmem:[%s10722_s15 + $0xc58] sm:$0xff] }
 0x338   : > { %v723_v59 = vld [vmem:[%s10722_s15 + $0xc78] sm:$0xff]  ;;  %v9211_v33 = vcombine.high %v718_v26, %v722_v28  ;;  %v9210_v41 = vcombine.low %v718_v26, %v722_v28 }
 0x339   : > { %v9213_v34 = vcombine.high %v719_v30, %v723_v59  ;;  %v9212_v42 = vcombine.low %v719_v30, %v723_v59  ;;  %v771_v26 = vld [vmem:[%s10722_s15 + $0xdf8] sm:$0xff]  ;;  %v9250_v59 = vcombine.low %v758_v13, %v762_v14 }
 0x33a   : > { %7385 = vmatpush1.bf16.msra.mxu0 %v9154_v35  ;;  %7713 = vmatpush1.bf16.msra.mxu1 %v9156_v36  ;;  %v726_v35 = vld [vmem:[%s10722_s15 + $0xc90] sm:$0xff] }
 0x33b   : > { %7386 = vmatprep.subr.bf16.mxu0 %v9163_v38  ;;  %7714 = vmatprep.subr.bf16.mxu1 %v9165_v39  ;;  %v730_v36 = vld [vmem:[%s10722_s15 + $0xcb0] sm:$0xff]  ;;  %v727_v38 = vld [vmem:[%s10722_s15 + $0xc98] sm:$0xff] }
 0x33c   : > { %v731_v39 = vld [vmem:[%s10722_s15 + $0xcb8] sm:$0xff]  ;;  %v9219_v44 = vcombine.high %v726_v35, %v730_v36 }
 0x33d   : > { %v9221_v45 = vcombine.high %v727_v38, %v731_v39  ;;  %v9220_v23 = vcombine.low %v727_v38, %v731_v39  ;;  %v774_v38 = vld [vmem:[%s10722_s15 + $0xe10] sm:$0xff] }
 0x33e   : > { %7387 = vmatpush1.bf16.msra.mxu0 %v9162_v46  ;;  %7715 = vmatpush1.bf16.msra.mxu1 %v9164_v47  ;;  %v734_v46 = vld [vmem:[%s10722_s15 + $0xcd0] sm:$0xff] }
 0x33f   : > { %7388 = vmatprep.subr.bf16.mxu0 %v9171_v50  ;;  %7716 = vmatprep.subr.bf16.mxu1 %v9173_v52  ;;  %v738_v47 = vld [vmem:[%s10722_s15 + $0xcf0] sm:$0xff]  ;;  %v735_v50 = vld [vmem:[%s10722_s15 + $0xcd8] sm:$0xff] }
 0x340   : > { %v739_v52 = vld [vmem:[%s10722_s15 + $0xcf8] sm:$0xff]  ;;  %v9227_v54 = vcombine.high %v734_v46, %v738_v47  ;;  %v778_v39 = vld [vmem:[%s10722_s15 + $0xe30] sm:$0xff] }
 0x341   : > { %v9229_v55 = vcombine.high %v735_v50, %v739_v52 }
 0x342   : > { %7389 = vmatpush1.bf16.msra.mxu0 %v9170_v57  ;;  %7717 = vmatpush1.bf16.msra.mxu1 %v9172_v60  ;;  %v746_v57 = vld [vmem:[%s10722_s15 + $0xd30] sm:$0xff]  ;;  %v743_v60 = vld [vmem:[%s10722_s15 + $0xd18] sm:$0xff] }
 0x343   : > { %7390 = vmatprep.subr.bf16.mxu0 %v9179_v61  ;;  %7718 = vmatprep.subr.bf16.mxu1 %v9181_v62  ;;  %v747_v61 = vld [vmem:[%s10722_s15 + $0xd38] sm:$0xff]  ;;  %v9226_v62 = vcombine.low %v734_v46, %v738_v47  ;;  %v9235_v8 = vcombine.high %v742_v56, %v746_v57  ;;  %v9267_v46 = vcombine.high %v774_v38, %v778_v39 }
 0x344   : > { %v9237_v63 = vcombine.high %v743_v60, %v747_v61 }
 0x346   : > { %7391 = vmatpush1.bf16.msra.mxu0 %v9178_v4  ;;  %7719 = vmatpush1.bf16.msra.mxu1 %v9180_v31  ;;  %v751_v4 = vld [vmem:[%s10722_s15 + $0xd58] sm:$0xff] }
 0x347   : > { %7392 = vmatprep.subr.bf16.mxu0 %v9187_v6  ;;  %7720 = vmatprep.subr.bf16.mxu1 %v9189_v10  ;;  %v755_v31 = vld [vmem:[%s10722_s15 + $0xd78] sm:$0xff]  ;;  %v9234_v6 = vcombine.low %v742_v56, %v746_v57  ;;  %v9236_v10 = vcombine.low %v743_v60, %v747_v61  ;;  %v790_v60 = vld [vmem:[%s10722_s15 + $0xe90] sm:$0xff] }
 0x348   : > { %v9245_v12 = vcombine.high %v751_v4, %v755_v31  ;;  %v794_v61 = vld [vmem:[%s10722_s15 + $0xeb0] sm:$0xff] }
 0x34a   : > { %7393 = vmatpush1.bf16.msra.mxu0 %v9186_v15  ;;  %7721 = vmatpush1.bf16.msra.mxu1 %v9188_v1  ;;  %v759_v15 = vld [vmem:[%s10722_s15 + $0xd98] sm:$0xff] }
 0x34b   : > { %7394 = vmatprep.subr.bf16.mxu0 %v9195_v17  ;;  %7722 = vmatprep.subr.bf16.mxu1 %v9197_v53  ;;  %v763_v1 = vld [vmem:[%s10722_s15 + $0xdb8] sm:$0xff]  ;;  %v9242_v17 = vcombine.low %v750_v2, %v754_v3  ;;  %v9244_v53 = vcombine.low %v751_v4, %v755_v31  ;;  %v9283_v2 = vcombine.high %v790_v60, %v794_v61  ;;  %v798_v4 = vld [vmem:[%s10722_s15 + $0xed0] sm:$0xff] }
 0x34c   : > { %v9253_v21 = vcombine.high %v759_v15, %v763_v1  ;;  %v802_v31 = vld [vmem:[%s10722_s15 + $0xef0] sm:$0xff] }
 0x34d   : > { %v9291_v13 = vcombine.high %v798_v4, %v802_v31 }
 0x34e   : > { %7395 = vmatpush1.bf16.msra.mxu0 %v9194_v40  ;;  %7723 = vmatpush1.bf16.msra.mxu1 %v9196_v22  ;;  %v770_v40 = vld [vmem:[%s10722_s15 + $0xdf0] sm:$0xff] }
 0x34f   : > { %7405 = vmatprep.subr.bf16.mxu0 %v9203_v24  ;;  %7733 = vmatprep.subr.bf16.mxu1 %v9205_v25  ;;  %v767_v25 = vld [vmem:[%s10722_s15 + $0xdd8] sm:$0xff] }
 0x351   : > { %7397 = vmatmul.mubr.bf16.vlgmr.msra.gmra.mrb[4].mxu0 %v10992_v58  ;;  %7725 = vmatmul.mubr.bf16.vlgmr.msra.gmra.mrb[4].mxu1 %v10992_v58  ;;  %v9218_v58 = vcombine.low %v726_v35, %v730_v36  ;;  %v9261_v36 = vcombine.high %v767_v25, %v771_v26 }
 0x352   : > { %7406 = vmatpush1.bf16.msra.mxu0 %v9202_v32  ;;  %7734 = vmatpush1.bf16.msra.mxu1 %v9204_v48 }
 0x353   : > { %7407 = vmatprep.subr.bf16.mxu0 %v9211_v33  ;;  %7735 = vmatprep.subr.bf16.mxu1 %v9213_v34  ;;  %v9252_v33 = vcombine.low %v759_v15, %v763_v1  ;;  %v9259_v34 = vcombine.high %v766_v9, %v770_v40  ;;  %v806_v15 = vld [vmem:[%s10722_s15 + $0xf10] sm:$0xff] }
 0x354   : > { %7437 = vmatprep.mubr.bf16.mxu0 %v11000_v5  ;;  %7765 = vmatprep.mubr.bf16.mxu1 %v11000_v5  ;;  %v9228_v5 = vcombine.low %v735_v50, %v739_v52  ;;  %v782_v50 = vld [vmem:[%s10722_s15 + $0xe50] sm:$0xff] }
 0x355   : > { %v786_v52 = vld [vmem:[%s10722_s15 + $0xe70] sm:$0xff] }
 0x356   : > { %7408 = vmatpush1.bf16.msra.mxu0 %v9210_v41  ;;  %7736 = vmatpush1.bf16.msra.mxu1 %v9212_v42  ;;  %v775_v41 = vld [vmem:[%s10722_s15 + $0xe18] sm:$0xff]  ;;  %v9275_v56 = vcombine.high %v782_v50, %v786_v52  ;;  %v810_v1 = vld [vmem:[%s10722_s15 + $0xf30] sm:$0xff] }
 0x357   : > { %7409 = vmatprep.subr.bf16.mxu0 %v9219_v44  ;;  %7737 = vmatprep.subr.bf16.mxu1 %v9221_v45  ;;  %v779_v42 = vld [vmem:[%s10722_s15 + $0xe38] sm:$0xff]  ;;  %v9258_v44 = vcombine.low %v766_v9, %v770_v40  ;;  %v9260_v45 = vcombine.low %v767_v25, %v771_v26  ;;  %v9299_v9 = vcombine.high %v806_v15, %v810_v1  ;;  %v814_v25 = vld [vmem:[%s10722_s15 + $0xf50] sm:$0xff] }
 0x358   : > { %v9269_v47 = vcombine.high %v775_v41, %v779_v42  ;;  %v818_v26 = vld [vmem:[%s10722_s15 + $0xf70] sm:$0xff] }
 0x35a   : > { %7410 = vmatpush1.bf16.msra.mxu0 %v9218_v58  ;;  %7738 = vmatpush1.bf16.msra.mxu1 %v9220_v23  ;;  %v783_v58 = vld [vmem:[%s10722_s15 + $0xe58] sm:$0xff] }
 0x35b   : > { %7411 = vmatprep.subr.bf16.mxu0 %v9227_v54  ;;  %7739 = vmatprep.subr.bf16.mxu1 %v9229_v55  ;;  %v787_v23 = vld [vmem:[%s10722_s15 + $0xe78] sm:$0xff]  ;;  %v9266_v54 = vcombine.low %v774_v38, %v778_v39  ;;  %v9268_v55 = vcombine.low %v775_v41, %v779_v42  ;;  %v9306_v41 = vcombine.low %v814_v25, %v818_v26 }
 0x35c   : > { %v9277_v57 = vcombine.high %v783_v58, %v787_v23  ;;  %v823_v38 = vld [vmem:[%s10722_s15 + $0xf98] sm:$0xff] }
 0x35d   : > { %v827_v39 = vld [vmem:[%s10722_s15 + $0xfb8] sm:$0xff] }
 0x35e   : > { %7412 = vmatpush1.bf16.msra.mxu0 %v9226_v62  ;;  %7740 = vmatpush1.bf16.msra.mxu1 %v9228_v5  ;;  %v791_v62 = vld [vmem:[%s10722_s15 + $0xe98] sm:$0xff] }
 0x35f   : > { %7413 = vmatprep.subr.bf16.mxu0 %v9235_v8  ;;  %7741 = vmatprep.subr.bf16.mxu1 %v9237_v63  ;;  %v795_v5 = vld [vmem:[%s10722_s15 + $0xeb8] sm:$0xff]  ;;  %v9274_v8 = vcombine.low %v782_v50, %v786_v52  ;;  %v9276_v63 = vcombine.low %v783_v58, %v787_v23  ;;  %v9316_v23 = vcombine.low %v823_v38, %v827_v39 }
 0x360   : > { %v9285_v3 = vcombine.high %v791_v62, %v795_v5  ;;  %v831_v50 = vld [vmem:[%s10722_s15 + $0xfd8] sm:$0xff] }
 0x361   : > { %v835_v52 = vld [vmem:[%s10722_s15 + $0xff8] sm:$0xff] }
 0x362   : > { %7414 = vmatpush1.bf16.msra.mxu0 %v9234_v6  ;;  %7742 = vmatpush1.bf16.msra.mxu1 %v9236_v10  ;;  %v799_v6 = vld [vmem:[%s10722_s15 + $0xed8] sm:$0xff] }
 0x363   : > { %7415 = vmatprep.subr.bf16.mxu0 %v9243_v11  ;;  %7743 = vmatprep.subr.bf16.mxu1 %v9245_v12  ;;  %v803_v10 = vld [vmem:[%s10722_s15 + $0xef8] sm:$0xff]  ;;  %v9282_v11 = vcombine.low %v790_v60, %v794_v61  ;;  %v9284_v12 = vcombine.low %v791_v62, %v795_v5  ;;  %v9324_v5 = vcombine.low %v831_v50, %v835_v52 }
 0x364   : > { %v11620_v20 = vpop.f32.mrb[0].mxu0  ;;  %v11624_v22 = vpop.f32.mrb[0].mxu1  ;;  %v9293_v14 = vcombine.high %v799_v6, %v803_v10  ;;  %v839_v60 = vld [vmem:[%s10722_s15 + $0x1018] sm:$0xff] }
 0x365   : > { %v11626_v24 = vpop.f32.mrb[1].mxu0  ;;  %v11630_v28 = vpop.f32.mrb[1].mxu1  ;;  %v843_v61 = vld [vmem:[%s10722_s15 + $0x1038] sm:$0xff] }
 0x366   : > { %v6951_v30 = vpop.f32.mrb[2].mxu0  ;;  %7416 = vmatpush1.bf16.msra.mxu0 %v9242_v17  ;;  %v7279_v32 = vpop.f32.mrb[2].mxu1  ;;  %7744 = vmatpush1.bf16.msra.mxu1 %v9244_v53  ;;  %v807_v17 = vld [vmem:[%s10722_s15 + $0xf18] sm:$0xff] }
 0x367   : > { %v6952_v48 = vpop.f32.mrb[3].mxu0  ;;  %7417 = vmatprep.subr.bf16.mxu0 %v9251_v16  ;;  %v7280_v35 = vpop.f32.mrb[3].mxu1  ;;  %7745 = vmatprep.subr.bf16.mxu1 %v9253_v21  ;;  %v811_v53 = vld [vmem:[%s10722_s15 + $0xf38] sm:$0xff]  ;;  %v9290_v16 = vcombine.low %v798_v4, %v802_v31  ;;  %v9292_v21 = vcombine.low %v799_v6, %v803_v10  ;;  %v9298_v32 = vcombine.low %v806_v15, %v810_v1 }
 0x368   : > { %v9301_v40 = vcombine.high %v807_v17, %v811_v53  ;;  %v815_v30 = vld [vmem:[%s10722_s15 + $0xf58] sm:$0xff]  ;;  %v9300_v48 = vcombine.low %v807_v17, %v811_v53  ;;  %v822_v35 = vld [vmem:[%s10722_s15 + $0xf90] sm:$0xff]  ;;  %v9332_v10 = vcombine.low %v839_v60, %v843_v61 }
 0x369   : > { %v847_v4 = vld [vmem:[%s10722_s15 + $0x1058] sm:$0xff] }
 0x36a   : > { %7418 = vmatpush1.bf16.msra.mxu0 %v9250_v59  ;;  %7746 = vmatpush1.bf16.msra.mxu1 %v9252_v33  ;;  %v819_v59 = vld [vmem:[%s10722_s15 + $0xf78] sm:$0xff]  ;;  %v9307_v33 = vcombine.high %v814_v25, %v818_v26 }
 0x36b   : > { %7419 = vmatprep.subr.bf16.mxu0 %v9259_v34  ;;  %7747 = vmatprep.subr.bf16.mxu1 %v9261_v36  ;;  %v9309_v34 = vcombine.high %v815_v30, %v819_v59  ;;  %v826_v36 = vld [vmem:[%s10722_s15 + $0xfb0] sm:$0xff]  ;;  %v9308_v42 = vcombine.low %v815_v30, %v819_v59  ;;  %v851_v31 = vld [vmem:[%s10722_s15 + $0x1078] sm:$0xff] }
 0x36c   : > { %v9314_v58 = vcombine.low %v822_v35, %v826_v36  ;;  %v855_v15 = vld [vmem:[%s10722_s15 + $0x1098] sm:$0xff]  ;;  %v9340_v53 = vcombine.low %v847_v4, %v851_v31 }
 0x36d   : > { %v859_v1 = vld [vmem:[%s10722_s15 + $0x10b8] sm:$0xff] }
 0x36e   : > { %7420 = vmatpush1.bf16.msra.mxu0 %v9258_v44  ;;  %7748 = vmatpush1.bf16.msra.mxu1 %v9260_v45  ;;  %v9315_v44 = vcombine.high %v822_v35, %v826_v36  ;;  %v9317_v45 = vcombine.high %v823_v38, %v827_v39  ;;  %v863_v25 = vld [vmem:[%s10722_s15 + $0x10d8] sm:$0xff]  ;;  %v9348_v30 = vcombine.low %v855_v15, %v859_v1 }
 0x36f   : > { %7421 = vmatprep.subr.bf16.mxu0 %v9267_v46  ;;  %7749 = vmatprep.subr.bf16.mxu1 %v9269_v47  ;;  %v830_v46 = vld [vmem:[%s10722_s15 + $0xfd0] sm:$0xff]  ;;  %v867_v26 = vld [vmem:[%s10722_s15 + $0x10f8] sm:$0xff] }
 0x370   : > { %v834_v47 = vld [vmem:[%s10722_s15 + $0xff0] sm:$0xff]  ;;  %v875_v35 = vld [vmem:[%s10722_s15 + $0x1138] sm:$0xff] }
 0x371   : > { %v9322_v62 = vcombine.low %v830_v46, %v834_v47 }
 0x372   : > { %7422 = vmatpush1.bf16.msra.mxu0 %v9266_v54  ;;  %7750 = vmatpush1.bf16.msra.mxu1 %v9268_v55  ;;  %v9323_v54 = vcombine.high %v830_v46, %v834_v47  ;;  %v9325_v55 = vcombine.high %v831_v50, %v835_v52 }
 0x373   : > { %7423 = vmatprep.subr.bf16.mxu0 %v9275_v56  ;;  %7751 = vmatprep.subr.bf16.mxu1 %v9277_v57  ;;  %v838_v56 = vld [vmem:[%s10722_s15 + $0x1010] sm:$0xff] }
 0x374   : > { %v842_v57 = vld [vmem:[%s10722_s15 + $0x1030] sm:$0xff] }
 0x375   : > { %v9330_v6 = vcombine.low %v838_v56, %v842_v57 }
 0x376   : > { %7424 = vmatpush1.bf16.msra.mxu0 %v9274_v8  ;;  %7752 = vmatpush1.bf16.msra.mxu1 %v9276_v63  ;;  %v9331_v8 = vcombine.high %v838_v56, %v842_v57  ;;  %v9333_v63 = vcombine.high %v839_v60, %v843_v61 }
 0x377   : > { %7425 = vmatprep.subr.bf16.mxu0 %v9283_v2  ;;  %7753 = vmatprep.subr.bf16.mxu1 %v9285_v3  ;;  %v846_v2 = vld [vmem:[%s10722_s15 + $0x1050] sm:$0xff] }
 0x378   : > { %v850_v3 = vld [vmem:[%s10722_s15 + $0x1070] sm:$0xff] }
 0x379   : > { %v9338_v17 = vcombine.low %v846_v2, %v850_v3 }
 0x37a   : > { %7426 = vmatpush1.bf16.msra.mxu0 %v9282_v11  ;;  %7754 = vmatpush1.bf16.msra.mxu1 %v9284_v12  ;;  %v9339_v11 = vcombine.high %v846_v2, %v850_v3  ;;  %v9341_v12 = vcombine.high %v847_v4, %v851_v31 }
 0x37b   : > { %7427 = vmatprep.subr.bf16.mxu0 %v9291_v13  ;;  %7755 = vmatprep.subr.bf16.mxu1 %v9293_v14  ;;  %v854_v13 = vld [vmem:[%s10722_s15 + $0x1090] sm:$0xff] }
 0x37c   : > { %v858_v14 = vld [vmem:[%s10722_s15 + $0x10b0] sm:$0xff] }
 0x37e   : > { %7428 = vmatpush1.bf16.msra.mxu0 %v9290_v16  ;;  %7756 = vmatpush1.bf16.msra.mxu1 %v9292_v21  ;;  %v9347_v16 = vcombine.high %v854_v13, %v858_v14  ;;  %v9349_v21 = vcombine.high %v855_v15, %v859_v1 }
 0x37f   : > { %7429 = vmatprep.subr.bf16.mxu0 %v9299_v9  ;;  %7757 = vmatprep.subr.bf16.mxu1 %v9301_v40  ;;  %v862_v9 = vld [vmem:[%s10722_s15 + $0x10d0] sm:$0xff] }
 0x380   : > { %v866_v40 = vld [vmem:[%s10722_s15 + $0x10f0] sm:$0xff] }
 0x381   : > { %v9355_v59 = vcombine.high %v862_v9, %v866_v40  ;;  %v9354_v36 = vcombine.low %v862_v9, %v866_v40 }
 0x382   : > { %7430 = vmatpush1.bf16.msra.mxu0 %v9298_v32  ;;  %7758 = vmatpush1.bf16.msra.mxu1 %v9300_v48  ;;  %v9357_v32 = vcombine.high %v863_v25, %v867_v26  ;;  %v870_v48 = vld [vmem:[%s10722_s15 + $0x1110] sm:$0xff] }
 0x383   : > { %7431 = vmatprep.subr.bf16.mxu0 %v9307_v33  ;;  %7759 = vmatprep.subr.bf16.mxu1 %v9309_v34  ;;  %v874_v33 = vld [vmem:[%s10722_s15 + $0x1130] sm:$0xff]  ;;  %v871_v34 = vld [vmem:[%s10722_s15 + $0x1118] sm:$0xff] }
 0x384   : > { %v9363_v38 = vcombine.high %v870_v48, %v874_v33  ;;  %v9365_v39 = vcombine.high %v871_v34, %v875_v35  ;;  %v9362_v46 = vcombine.low %v870_v48, %v874_v33  ;;  %v9364_v47 = vcombine.low %v871_v34, %v875_v35 }
 0x386   : > { %7432 = vmatpush1.bf16.msra.mxu0 %v9306_v41  ;;  %7760 = vmatpush1.bf16.msra.mxu1 %v9308_v42  ;;  %v878_v41 = vld [vmem:[%s10722_s15 + $0x1150] sm:$0xff] }
 0x387   : > { %7433 = vmatprep.subr.bf16.mxu0 %v9315_v44  ;;  %7761 = vmatprep.subr.bf16.mxu1 %v9317_v45  ;;  %v882_v42 = vld [vmem:[%s10722_s15 + $0x1170] sm:$0xff]  ;;  %v879_v44 = vld [vmem:[%s10722_s15 + $0x1158] sm:$0xff] }
 0x388   : > { %v883_v45 = vld [vmem:[%s10722_s15 + $0x1178] sm:$0xff]  ;;  %v9371_v50 = vcombine.high %v878_v41, %v882_v42  ;;  %v9370_v56 = vcombine.low %v878_v41, %v882_v42 }
 0x389   : > { %v9373_v52 = vcombine.high %v879_v44, %v883_v45  ;;  %v9372_v57 = vcombine.low %v879_v44, %v883_v45 }
 0x38a   : > { %7434 = vmatpush1.bf16.msra.mxu0 %v9314_v58  ;;  %7762 = vmatpush1.bf16.msra.mxu1 %v9316_v23  ;;  %v886_v58 = vld [vmem:[%s10722_s15 + $0x1190] sm:$0xff] }
 0x38b   : > { %7435 = vmatprep.subr.bf16.mxu0 %v9323_v54  ;;  %7763 = vmatprep.subr.bf16.mxu1 %v9325_v55  ;;  %v890_v23 = vld [vmem:[%s10722_s15 + $0x11b0] sm:$0xff]  ;;  %v887_v54 = vld [vmem:[%s10722_s15 + $0x1198] sm:$0xff] }
 0x38c   : > { %v891_v55 = vld [vmem:[%s10722_s15 + $0x11b8] sm:$0xff]  ;;  %v9379_v60 = vcombine.high %v886_v58, %v890_v23  ;;  %v9378_v2 = vcombine.low %v886_v58, %v890_v23 }
 0x38d   : > { %v9381_v61 = vcombine.high %v887_v54, %v891_v55  ;;  %v9380_v3 = vcombine.low %v887_v54, %v891_v55 }
 0x38e   : > { %7436 = vmatpush1.bf16.msra.mxu0 %v9322_v62  ;;  %7764 = vmatpush1.bf16.msra.mxu1 %v9324_v5  ;;  %v894_v62 = vld [vmem:[%s10722_s15 + $0x11d0] sm:$0xff] }
 0x38f   : > { %7446 = vmatprep.subr.bf16.mxu0 %v9331_v8  ;;  %7774 = vmatprep.subr.bf16.mxu1 %v9333_v63  ;;  %v898_v5 = vld [vmem:[%s10722_s15 + $0x11f0] sm:$0xff]  ;;  %v895_v8 = vld [vmem:[%s10722_s15 + $0x11d8] sm:$0xff] }
 0x390   : > { %v899_v63 = vld [vmem:[%s10722_s15 + $0x11f8] sm:$0xff]  ;;  %v9387_v4 = vcombine.high %v894_v62, %v898_v5 }
 0x391   : > { %7438 = vmatmul.mubr.bf16.vlgmr.msra.gmra.mrb[4].mxu0 %v11079_v19  ;;  %7766 = vmatmul.mubr.bf16.vlgmr.msra.gmra.mrb[4].mxu1 %v11079_v19  ;;  %v9346_v19 = vcombine.low %v854_v13, %v858_v14  ;;  %v9389_v31 = vcombine.high %v895_v8, %v899_v63  ;;  %v9386_v13 = vcombine.low %v894_v62, %v898_v5 }
 0x392   : > { %7447 = vmatpush1.bf16.msra.mxu0 %v9330_v6  ;;  %7775 = vmatpush1.bf16.msra.mxu1 %v9332_v10  ;;  %v902_v6 = vld [vmem:[%s10722_s15 + $0x1210] sm:$0xff]  ;;  %v9388_v14 = vcombine.low %v895_v8, %v899_v63 }
 0x393   : > { %7448 = vmatprep.subr.bf16.mxu0 %v9339_v11  ;;  %7776 = vmatprep.subr.bf16.mxu1 %v9341_v12  ;;  %v906_v10 = vld [vmem:[%s10722_s15 + $0x1230] sm:$0xff]  ;;  %v903_v11 = vld [vmem:[%s10722_s15 + $0x1218] sm:$0xff] }
 0x394   : > { %7478 = vmatprep.mubr.bf16.mxu0 %v11086_v29  ;;  %7806 = vmatprep.mubr.bf16.mxu1 %v11086_v29  ;;  %v9356_v29 = vcombine.low %v863_v25, %v867_v26  ;;  %v907_v12 = vld [vmem:[%s10722_s15 + $0x1238] sm:$0xff]  ;;  %v9395_v15 = vcombine.high %v902_v6, %v906_v10  ;;  %v9394_v9 = vcombine.low %v902_v6, %v906_v10 }
 0x395   : > { %v9397_v1 = vcombine.high %v903_v11, %v907_v12  ;;  %v9396_v40 = vcombine.low %v903_v11, %v907_v12 }
 0x396   : > { %7449 = vmatpush1.bf16.msra.mxu0 %v9338_v17  ;;  %7777 = vmatpush1.bf16.msra.mxu1 %v9340_v53  ;;  %v910_v17 = vld [vmem:[%s10722_s15 + $0x1250] sm:$0xff] }
 0x397   : > { %7450 = vmatprep.subr.bf16.mxu0 %v9347_v16  ;;  %7778 = vmatprep.subr.bf16.mxu1 %v9349_v21  ;;  %v914_v53 = vld [vmem:[%s10722_s15 + $0x1270] sm:$0xff]  ;;  %v911_v16 = vld [vmem:[%s10722_s15 + $0x1258] sm:$0xff] }
 0x398   : > { %v915_v21 = vld [vmem:[%s10722_s15 + $0x1278] sm:$0xff]  ;;  %v9403_v25 = vcombine.high %v910_v17, %v914_v53  ;;  %v9402_v48 = vcombine.low %v910_v17, %v914_v53 }
 0x399   : > { %v9405_v26 = vcombine.high %v911_v16, %v915_v21  ;;  %v9404_v33 = vcombine.low %v911_v16, %v915_v21 }
 0x39a   : > { %7451 = vmatpush1.bf16.msra.mxu0 %v9346_v19  ;;  %7779 = vmatpush1.bf16.msra.mxu1 %v9348_v30  ;;  %v918_v19 = vld [vmem:[%s10722_s15 + $0x1290] sm:$0xff] }
 0x39b   : > { %7452 = vmatprep.subr.bf16.mxu0 %v9355_v59  ;;  %7780 = vmatprep.subr.bf16.mxu1 %v9357_v32  ;;  %v922_v30 = vld [vmem:[%s10722_s15 + $0x12b0] sm:$0xff]  ;;  %v919_v59 = vld [vmem:[%s10722_s15 + $0x1298] sm:$0xff] }
 0x39c   : > { %v923_v32 = vld [vmem:[%s10722_s15 + $0x12b8] sm:$0xff]  ;;  %v9411_v34 = vcombine.high %v918_v19, %v922_v30  ;;  %v9410_v41 = vcombine.low %v918_v19, %v922_v30 }
 0x39d   : > { %v9413_v35 = vcombine.high %v919_v59, %v923_v32  ;;  %v9412_v42 = vcombine.low %v919_v59, %v923_v32 }
 0x39e   : > { %7453 = vmatpush1.bf16.msra.mxu0 %v9354_v36  ;;  %7781 = vmatpush1.bf16.msra.mxu1 %v9356_v29  ;;  %v926_v36 = vld [vmem:[%s10722_s15 + $0x12d0] sm:$0xff] }
 0x39f   : > { %7454 = vmatprep.subr.bf16.mxu0 %v9363_v38  ;;  %7782 = vmatprep.subr.bf16.mxu1 %v9365_v39  ;;  %v930_v29 = vld [vmem:[%s10722_s15 + $0x12f0] sm:$0xff]  ;;  %v927_v38 = vld [vmem:[%s10722_s15 + $0x12d8] sm:$0xff] }
 0x3a0   : > { %v931_v39 = vld [vmem:[%s10722_s15 + $0x12f8] sm:$0xff]  ;;  %v9419_v44 = vcombine.high %v926_v36, %v930_v29  ;;  %v9418_v58 = vcombine.low %v926_v36, %v930_v29 }
 0x3a1   : > { %v9421_v45 = vcombine.high %v927_v38, %v931_v39  ;;  %v9420_v23 = vcombine.low %v927_v38, %v931_v39 }
 0x3a2   : > { %7455 = vmatpush1.bf16.msra.mxu0 %v9362_v46  ;;  %7783 = vmatpush1.bf16.msra.mxu1 %v9364_v47  ;;  %v934_v46 = vld [vmem:[%s10722_s15 + $0x1310] sm:$0xff] }
 0x3a3   : > { %7456 = vmatprep.subr.bf16.mxu0 %v9371_v50  ;;  %7784 = vmatprep.subr.bf16.mxu1 %v9373_v52  ;;  %v938_v47 = vld [vmem:[%s10722_s15 + $0x1330] sm:$0xff]  ;;  %v935_v50 = vld [vmem:[%s10722_s15 + $0x1318] sm:$0xff] }
 0x3a4   : > { %v939_v52 = vld [vmem:[%s10722_s15 + $0x1338] sm:$0xff]  ;;  %v9427_v54 = vcombine.high %v934_v46, %v938_v47  ;;  %v9426_v62 = vcombine.low %v934_v46, %v938_v47 }
 0x3a5   : > { %v9429_v55 = vcombine.high %v935_v50, %v939_v52  ;;  %v9428_v5 = vcombine.low %v935_v50, %v939_v52 }
 0x3a6   : > { %7457 = vmatpush1.bf16.msra.mxu0 %v9370_v56  ;;  %7785 = vmatpush1.bf16.msra.mxu1 %v9372_v57  ;;  %v942_v56 = vld [vmem:[%s10722_s15 + $0x1350] sm:$0xff] }
 0x3a7   : > { %7458 = vmatprep.subr.bf16.mxu0 %v9379_v60  ;;  %7786 = vmatprep.subr.bf16.mxu1 %v9381_v61  ;;  %v946_v57 = vld [vmem:[%s10722_s15 + $0x1370] sm:$0xff]  ;;  %v943_v60 = vld [vmem:[%s10722_s15 + $0x1358] sm:$0xff] }
 0x3a8   : > { %v947_v61 = vld [vmem:[%s10722_s15 + $0x1378] sm:$0xff]  ;;  %v9435_v8 = vcombine.high %v942_v56, %v946_v57  ;;  %v9434_v6 = vcombine.low %v942_v56, %v946_v57 }
 0x3a9   : > { %v9437_v63 = vcombine.high %v943_v60, %v947_v61  ;;  %v9436_v10 = vcombine.low %v943_v60, %v947_v61  ;;  %v998_v61 = vld [vmem:[%s10722_s15 + $0x1510] sm:$0xff] }
 0x3aa   : > { %7459 = vmatpush1.bf16.msra.mxu0 %v9378_v2  ;;  %7787 = vmatpush1.bf16.msra.mxu1 %v9380_v3  ;;  %v950_v2 = vld [vmem:[%s10722_s15 + $0x1390] sm:$0xff] }
 0x3ab   : > { %7460 = vmatprep.subr.bf16.mxu0 %v9387_v4  ;;  %7788 = vmatprep.subr.bf16.mxu1 %v9389_v31  ;;  %v954_v3 = vld [vmem:[%s10722_s15 + $0x13b0] sm:$0xff]  ;;  %v951_v4 = vld [vmem:[%s10722_s15 + $0x1398] sm:$0xff] }
 0x3ac   : > { %v955_v31 = vld [vmem:[%s10722_s15 + $0x13b8] sm:$0xff]  ;;  %v9443_v11 = vcombine.high %v950_v2, %v954_v3  ;;  %v9442_v17 = vcombine.low %v950_v2, %v954_v3 }
 0x3ad   : > { %v9445_v12 = vcombine.high %v951_v4, %v955_v31  ;;  %v9444_v53 = vcombine.low %v951_v4, %v955_v31  ;;  %v1006_v4 = vld [vmem:[%s10722_s15 + $0x1550] sm:$0xff] }
 0x3ae   : > { %7461 = vmatpush1.bf16.msra.mxu0 %v9386_v13  ;;  %7789 = vmatpush1.bf16.msra.mxu1 %v9388_v14  ;;  %v958_v13 = vld [vmem:[%s10722_s15 + $0x13d0] sm:$0xff] }
 0x3af   : > { %7462 = vmatprep.subr.bf16.mxu0 %v9395_v15  ;;  %7790 = vmatprep.subr.bf16.mxu1 %v9397_v1  ;;  %v962_v14 = vld [vmem:[%s10722_s15 + $0x13f0] sm:$0xff]  ;;  %v959_v15 = vld [vmem:[%s10722_s15 + $0x13d8] sm:$0xff] }
 0x3b0   : > { %v963_v1 = vld [vmem:[%s10722_s15 + $0x13f8] sm:$0xff]  ;;  %v9451_v16 = vcombine.high %v958_v13, %v962_v14  ;;  %v9450_v19 = vcombine.low %v958_v13, %v962_v14  ;;  %v1010_v31 = vld [vmem:[%s10722_s15 + $0x1570] sm:$0xff] }
 0x3b1   : > { %v9453_v21 = vcombine.high %v959_v15, %v963_v1  ;;  %v9452_v30 = vcombine.low %v959_v15, %v963_v1  ;;  %v9499_v13 = vcombine.high %v1006_v4, %v1010_v31  ;;  %v1014_v15 = vld [vmem:[%s10722_s15 + $0x1590] sm:$0xff] }
 0x3b2   : > { %7463 = vmatpush1.bf16.msra.mxu0 %v9394_v9  ;;  %7791 = vmatpush1.bf16.msra.mxu1 %v9396_v40  ;;  %v966_v9 = vld [vmem:[%s10722_s15 + $0x1410] sm:$0xff] }
 0x3b3   : > { %7464 = vmatprep.subr.bf16.mxu0 %v9403_v25  ;;  %7792 = vmatprep.subr.bf16.mxu1 %v9405_v26  ;;  %v970_v40 = vld [vmem:[%s10722_s15 + $0x1430] sm:$0xff]  ;;  %v967_v25 = vld [vmem:[%s10722_s15 + $0x1418] sm:$0xff] }
 0x3b4   : > { %v971_v26 = vld [vmem:[%s10722_s15 + $0x1438] sm:$0xff]  ;;  %v9459_v59 = vcombine.high %v966_v9, %v970_v40  ;;  %v9458_v36 = vcombine.low %v966_v9, %v970_v40  ;;  %v1018_v1 = vld [vmem:[%s10722_s15 + $0x15b0] sm:$0xff] }
 0x3b5   : > { %v9461_v32 = vcombine.high %v967_v25, %v971_v26  ;;  %v9460_v29 = vcombine.low %v967_v25, %v971_v26  ;;  %v9507_v9 = vcombine.high %v1014_v15, %v1018_v1  ;;  %v1022_v25 = vld [vmem:[%s10722_s15 + $0x15d0] sm:$0xff] }
 0x3b6   : > { %7465 = vmatpush1.bf16.msra.mxu0 %v9402_v48  ;;  %7793 = vmatpush1.bf16.msra.mxu1 %v9404_v33  ;;  %v974_v48 = vld [vmem:[%s10722_s15 + $0x1450] sm:$0xff] }
 0x3b7   : > { %7466 = vmatprep.subr.bf16.mxu0 %v9411_v34  ;;  %7794 = vmatprep.subr.bf16.mxu1 %v9413_v35  ;;  %v978_v33 = vld [vmem:[%s10722_s15 + $0x1470] sm:$0xff]  ;;  %v975_v34 = vld [vmem:[%s10722_s15 + $0x1458] sm:$0xff] }
 0x3b8   : > { %v979_v35 = vld [vmem:[%s10722_s15 + $0x1478] sm:$0xff]  ;;  %v9467_v38 = vcombine.high %v974_v48, %v978_v33  ;;  %v9466_v46 = vcombine.low %v974_v48, %v978_v33  ;;  %v1026_v26 = vld [vmem:[%s10722_s15 + $0x15f0] sm:$0xff] }
 0x3b9   : > { %v9469_v39 = vcombine.high %v975_v34, %v979_v35  ;;  %v9468_v47 = vcombine.low %v975_v34, %v979_v35  ;;  %v9515_v48 = vcombine.high %v1022_v25, %v1026_v26  ;;  %v1030_v34 = vld [vmem:[%s10722_s15 + $0x1610] sm:$0xff] }
 0x3ba   : > { %7467 = vmatpush1.bf16.msra.mxu0 %v9410_v41  ;;  %7795 = vmatpush1.bf16.msra.mxu1 %v9412_v42  ;;  %v982_v41 = vld [vmem:[%s10722_s15 + $0x1490] sm:$0xff] }
 0x3bb   : > { %7468 = vmatprep.subr.bf16.mxu0 %v9419_v44  ;;  %7796 = vmatprep.subr.bf16.mxu1 %v9421_v45  ;;  %v986_v42 = vld [vmem:[%s10722_s15 + $0x14b0] sm:$0xff]  ;;  %v983_v44 = vld [vmem:[%s10722_s15 + $0x1498] sm:$0xff] }
 0x3bc   : > { %v987_v45 = vld [vmem:[%s10722_s15 + $0x14b8] sm:$0xff]  ;;  %v9475_v50 = vcombine.high %v982_v41, %v986_v42  ;;  %v1034_v35 = vld [vmem:[%s10722_s15 + $0x1630] sm:$0xff] }
 0x3bd   : > { %v9477_v52 = vcombine.high %v983_v44, %v987_v45  ;;  %v9476_v56 = vcombine.low %v983_v44, %v987_v45  ;;  %v1038_v44 = vld [vmem:[%s10722_s15 + $0x1650] sm:$0xff] }
 0x3be   : > { %7469 = vmatpush1.bf16.msra.mxu0 %v9418_v58  ;;  %7797 = vmatpush1.bf16.msra.mxu1 %v9420_v23  ;;  %v990_v58 = vld [vmem:[%s10722_s15 + $0x14d0] sm:$0xff] }
 0x3bf   : > { %7470 = vmatprep.subr.bf16.mxu0 %v9427_v54  ;;  %7798 = vmatprep.subr.bf16.mxu1 %v9429_v55  ;;  %v994_v23 = vld [vmem:[%s10722_s15 + $0x14f0] sm:$0xff]  ;;  %v991_v54 = vld [vmem:[%s10722_s15 + $0x14d8] sm:$0xff] }
 0x3c0   : > { %v995_v55 = vld [vmem:[%s10722_s15 + $0x14f8] sm:$0xff]  ;;  %v9483_v57 = vcombine.high %v990_v58, %v994_v23  ;;  %v1042_v45 = vld [vmem:[%s10722_s15 + $0x1670] sm:$0xff] }
 0x3c1   : > { %v9485_v60 = vcombine.high %v991_v54, %v995_v55 }
 0x3c2   : > { %7471 = vmatpush1.bf16.msra.mxu0 %v9426_v62  ;;  %7799 = vmatpush1.bf16.msra.mxu1 %v9428_v5  ;;  %v1002_v62 = vld [vmem:[%s10722_s15 + $0x1530] sm:$0xff]  ;;  %v999_v5 = vld [vmem:[%s10722_s15 + $0x1518] sm:$0xff] }
 0x3c3   : > { %7472 = vmatprep.subr.bf16.mxu0 %v9435_v8  ;;  %7800 = vmatprep.subr.bf16.mxu1 %v9437_v63  ;;  %v1003_v8 = vld [vmem:[%s10722_s15 + $0x1538] sm:$0xff]  ;;  %v9482_v63 = vcombine.low %v990_v58, %v994_v23  ;;  %v9491_v2 = vcombine.high %v998_v61, %v1002_v62  ;;  %v9531_v58 = vcombine.high %v1038_v44, %v1042_v45 }
 0x3c4   : > { %v9493_v3 = vcombine.high %v999_v5, %v1003_v8 }
 0x3c6   : > { %7473 = vmatpush1.bf16.msra.mxu0 %v9434_v6  ;;  %7801 = vmatpush1.bf16.msra.mxu1 %v9436_v10  ;;  %v1007_v6 = vld [vmem:[%s10722_s15 + $0x1558] sm:$0xff] }
 0x3c7   : > { %7474 = vmatprep.subr.bf16.mxu0 %v9443_v11  ;;  %7802 = vmatprep.subr.bf16.mxu1 %v9445_v12  ;;  %v1011_v10 = vld [vmem:[%s10722_s15 + $0x1578] sm:$0xff]  ;;  %v9490_v11 = vcombine.low %v998_v61, %v1002_v62  ;;  %v9492_v12 = vcombine.low %v999_v5, %v1003_v8  ;;  %v1054_v5 = vld [vmem:[%s10722_s15 + $0x16d0] sm:$0xff] }
 0x3c8   : > { %v9501_v14 = vcombine.high %v1007_v6, %v1011_v10  ;;  %v1058_v8 = vld [vmem:[%s10722_s15 + $0x16f0] sm:$0xff] }
 0x3ca   : > { %7475 = vmatpush1.bf16.msra.mxu0 %v9442_v17  ;;  %7803 = vmatpush1.bf16.msra.mxu1 %v9444_v53  ;;  %v1015_v17 = vld [vmem:[%s10722_s15 + $0x1598] sm:$0xff] }
 0x3cb   : > { %7476 = vmatprep.subr.bf16.mxu0 %v9451_v16  ;;  %7804 = vmatprep.subr.bf16.mxu1 %v9453_v21  ;;  %v1019_v53 = vld [vmem:[%s10722_s15 + $0x15b8] sm:$0xff]  ;;  %v9498_v16 = vcombine.low %v1006_v4, %v1010_v31  ;;  %v9500_v21 = vcombine.low %v1007_v6, %v1011_v10  ;;  %v9547_v4 = vcombine.high %v1054_v5, %v1058_v8  ;;  %v1062_v6 = vld [vmem:[%s10722_s15 + $0x1710] sm:$0xff] }
 0x3cc   : > { %v9509_v40 = vcombine.high %v1015_v17, %v1019_v53  ;;  %v1066_v10 = vld [vmem:[%s10722_s15 + $0x1730] sm:$0xff] }
 0x3ce   : > { %7477 = vmatpush1.bf16.msra.mxu0 %v9450_v19  ;;  %7805 = vmatpush1.bf16.msra.mxu1 %v9452_v30  ;;  %v1023_v19 = vld [vmem:[%s10722_s15 + $0x15d8] sm:$0xff] }
 0x3cf   : > { %7487 = vmatprep.subr.bf16.mxu0 %v9459_v59  ;;  %7815 = vmatprep.subr.bf16.mxu1 %v9461_v32  ;;  %v1027_v30 = vld [vmem:[%s10722_s15 + $0x15f8] sm:$0xff]  ;;  %v9506_v59 = vcombine.low %v1014_v15, %v1018_v1  ;;  %v9508_v32 = vcombine.low %v1015_v17, %v1019_v53  ;;  %v9555_v15 = vcombine.high %v1062_v6, %v1066_v10  ;;  %v1070_v17 = vld [vmem:[%s10722_s15 + $0x1750] sm:$0xff] }
 0x3d0   : > { %v9517_v33 = vcombine.high %v1023_v19, %v1027_v30  ;;  %v1074_v53 = vld [vmem:[%s10722_s15 + $0x1770] sm:$0xff] }
 0x3d1   : > { %7479 = vmatmul.mubr.bf16.vlgmr.msra.gmra.mrb[4].mxu0 %v11154_v51  ;;  %7807 = vmatmul.mubr.bf16.vlgmr.msra.gmra.mrb[4].mxu1 %v11154_v51  ;;  %v9474_v51 = vcombine.low %v982_v41, %v986_v42  ;;  %v9523_v41 = vcombine.high %v1030_v34, %v1034_v35 }
 0x3d2   : > { %7488 = vmatpush1.bf16.msra.mxu0 %v9458_v36  ;;  %7816 = vmatpush1.bf16.msra.mxu1 %v9460_v29  ;;  %v1031_v36 = vld [vmem:[%s10722_s15 + $0x1618] sm:$0xff] }
 0x3d3   : > { %7489 = vmatprep.subr.bf16.mxu0 %v9467_v38  ;;  %7817 = vmatprep.subr.bf16.mxu1 %v9469_v39  ;;  %v1035_v29 = vld [vmem:[%s10722_s15 + $0x1638] sm:$0xff]  ;;  %v9514_v38 = vcombine.low %v1022_v25, %v1026_v26  ;;  %v9516_v39 = vcombine.low %v1023_v19, %v1027_v30  ;;  %v9563_v25 = vcombine.high %v1070_v17, %v1074_v53  ;;  %v1078_v19 = vld [vmem:[%s10722_s15 + $0x1790] sm:$0xff] }
 0x3d4   : > { %7519 = vmatprep.mubr.bf16.mxu0 %v11162_v0  ;;  %7847 = vmatprep.mubr.bf16.mxu1 %v11162_v0  ;;  %v9484_v0 = vcombine.low %v991_v54, %v995_v55  ;;  %v9525_v42 = vcombine.high %v1031_v36, %v1035_v29  ;;  %v1046_v54 = vld [vmem:[%s10722_s15 + $0x1690] sm:$0xff] }
 0x3d5   : > { %v1050_v55 = vld [vmem:[%s10722_s15 + $0x16b0] sm:$0xff] }
 0x3d6   : > { %7490 = vmatpush1.bf16.msra.mxu0 %v9466_v46  ;;  %7818 = vmatpush1.bf16.msra.mxu1 %v9468_v47  ;;  %v1039_v46 = vld [vmem:[%s10722_s15 + $0x1658] sm:$0xff]  ;;  %v9539_v61 = vcombine.high %v1046_v54, %v1050_v55  ;;  %v1082_v30 = vld [vmem:[%s10722_s15 + $0x17b0] sm:$0xff] }
 0x3d7   : > { %7491 = vmatprep.subr.bf16.mxu0 %v9475_v50  ;;  %7819 = vmatprep.subr.bf16.mxu1 %v9477_v52  ;;  %v1043_v47 = vld [vmem:[%s10722_s15 + $0x1678] sm:$0xff]  ;;  %v9522_v50 = vcombine.low %v1030_v34, %v1034_v35  ;;  %v9524_v52 = vcombine.low %v1031_v36, %v1035_v29  ;;  %v9571_v34 = vcombine.high %v1078_v19, %v1082_v30  ;;  %v1086_v36 = vld [vmem:[%s10722_s15 + $0x17d0] sm:$0xff] }
 0x3d8   : > { %v9533_v23 = vcombine.high %v1039_v46, %v1043_v47  ;;  %v1090_v29 = vld [vmem:[%s10722_s15 + $0x17f0] sm:$0xff] }
 0x3da   : > { %7492 = vmatpush1.bf16.msra.mxu0 %v9474_v51  ;;  %7820 = vmatpush1.bf16.msra.mxu1 %v9476_v56  ;;  %v1047_v51 = vld [vmem:[%s10722_s15 + $0x1698] sm:$0xff] }
 0x3db   : > { %7493 = vmatprep.subr.bf16.mxu0 %v9483_v57  ;;  %7821 = vmatprep.subr.bf16.mxu1 %v9485_v60  ;;  %v1051_v56 = vld [vmem:[%s10722_s15 + $0x16b8] sm:$0xff]  ;;  %v9530_v57 = vcombine.low %v1038_v44, %v1042_v45  ;;  %v9532_v60 = vcombine.low %v1039_v46, %v1043_v47  ;;  %v9579_v44 = vcombine.high %v1086_v36, %v1090_v29  ;;  %v1094_v46 = vld [vmem:[%s10722_s15 + $0x1810] sm:$0xff] }
 0x3dc   : > { %v9541_v62 = vcombine.high %v1047_v51, %v1051_v56  ;;  %v1098_v47 = vld [vmem:[%s10722_s15 + $0x1830] sm:$0xff] }
 0x3de   : > { %7494 = vmatpush1.bf16.msra.mxu0 %v9482_v63  ;;  %7822 = vmatpush1.bf16.msra.mxu1 %v9484_v0  ;;  %v1055_v63 = vld [vmem:[%s10722_s15 + $0x16d8] sm:$0xff] }
 0x3df   : > { %7495 = vmatprep.subr.bf16.mxu0 %v9491_v2  ;;  %7823 = vmatprep.subr.bf16.mxu1 %v9493_v3  ;;  %v1059_v0 = vld [vmem:[%s10722_s15 + $0x16f8] sm:$0xff]  ;;  %v9538_v2 = vcombine.low %v1046_v54, %v1050_v55  ;;  %v9540_v3 = vcombine.low %v1047_v51, %v1051_v56  ;;  %v9587_v54 = vcombine.high %v1094_v46, %v1098_v47  ;;  %v1102_v51 = vld [vmem:[%s10722_s15 + $0x1850] sm:$0xff] }
 0x3e0   : > { %v9549_v31 = vcombine.high %v1055_v63, %v1059_v0  ;;  %v1106_v56 = vld [vmem:[%s10722_s15 + $0x1870] sm:$0xff] }
 0x3e2   : > { %7496 = vmatpush1.bf16.msra.mxu0 %v9490_v11  ;;  %7824 = vmatpush1.bf16.msra.mxu1 %v9492_v12  ;;  %v1063_v11 = vld [vmem:[%s10722_s15 + $0x1718] sm:$0xff] }
 0x3e3   : > { %7497 = vmatprep.subr.bf16.mxu0 %v9499_v13  ;;  %7825 = vmatprep.subr.bf16.mxu1 %v9501_v14  ;;  %v1067_v12 = vld [vmem:[%s10722_s15 + $0x1738] sm:$0xff]  ;;  %v9546_v13 = vcombine.low %v1054_v5, %v1058_v8  ;;  %v9548_v14 = vcombine.low %v1055_v63, %v1059_v0  ;;  %v9595_v5 = vcombine.high %v1102_v51, %v1106_v56  ;;  %v1110_v63 = vld [vmem:[%s10722_s15 + $0x1890] sm:$0xff] }
 0x3e4   : > { %v9557_v1 = vcombine.high %v1063_v11, %v1067_v12  ;;  %v1114_v0 = vld [vmem:[%s10722_s15 + $0x18b0] sm:$0xff] }
 0x3e6   : > { %7498 = vmatpush1.bf16.msra.mxu0 %v9498_v16  ;;  %7826 = vmatpush1.bf16.msra.mxu1 %v9500_v21  ;;  %v1071_v16 = vld [vmem:[%s10722_s15 + $0x1758] sm:$0xff] }
 0x3e7   : > { %7499 = vmatprep.subr.bf16.mxu0 %v9507_v9  ;;  %7827 = vmatprep.subr.bf16.mxu1 %v9509_v40  ;;  %v1075_v21 = vld [vmem:[%s10722_s15 + $0x1778] sm:$0xff]  ;;  %v9554_v9 = vcombine.low %v1062_v6, %v1066_v10  ;;  %v9556_v40 = vcombine.low %v1063_v11, %v1067_v12  ;;  %v9603_v6 = vcombine.high %v1110_v63, %v1114_v0  ;;  %v1118_v11 = vld [vmem:[%s10722_s15 + $0x18d0] sm:$0xff] }
 0x3e8   : > { %v9565_v26 = vcombine.high %v1071_v16, %v1075_v21  ;;  %v1122_v12 = vld [vmem:[%s10722_s15 + $0x18f0] sm:$0xff] }
 0x3ea   : > { %7500 = vmatpush1.bf16.msra.mxu0 %v9506_v59  ;;  %7828 = vmatpush1.bf16.msra.mxu1 %v9508_v32  ;;  %v1079_v59 = vld [vmem:[%s10722_s15 + $0x1798] sm:$0xff] }
 0x3eb   : > { %7501 = vmatprep.subr.bf16.mxu0 %v9515_v48  ;;  %7829 = vmatprep.subr.bf16.mxu1 %v9517_v33  ;;  %v1083_v32 = vld [vmem:[%s10722_s15 + $0x17b8] sm:$0xff]  ;;  %v9562_v48 = vcombine.low %v1070_v17, %v1074_v53  ;;  %v9564_v33 = vcombine.low %v1071_v16, %v1075_v21  ;;  %v1126_v53 = vld [vmem:[%s10722_s15 + $0x1910] sm:$0xff] }
 0x3ec   : > { %v9573_v35 = vcombine.high %v1079_v59, %v1083_v32  ;;  %v1130_v16 = vld [vmem:[%s10722_s15 + $0x1930] sm:$0xff]  ;;  %v1127_v21 = vld [vmem:[%s10722_s15 + $0x1918] sm:$0xff] }
 0x3ee   : > { %7502 = vmatpush1.bf16.msra.mxu0 %v9514_v38  ;;  %7830 = vmatpush1.bf16.msra.mxu1 %v9516_v39  ;;  %v1087_v38 = vld [vmem:[%s10722_s15 + $0x17d8] sm:$0xff] }
 0x3ef   : > { %7503 = vmatprep.subr.bf16.mxu0 %v9523_v41  ;;  %7831 = vmatprep.subr.bf16.mxu1 %v9525_v42  ;;  %v1091_v39 = vld [vmem:[%s10722_s15 + $0x17f8] sm:$0xff]  ;;  %v9570_v41 = vcombine.low %v1078_v19, %v1082_v30  ;;  %v9572_v42 = vcombine.low %v1079_v59, %v1083_v32  ;;  %v1134_v19 = vld [vmem:[%s10722_s15 + $0x1950] sm:$0xff] }
 0x3f0   : > { %v9581_v45 = vcombine.high %v1087_v38, %v1091_v39  ;;  %v1138_v30 = vld [vmem:[%s10722_s15 + $0x1970] sm:$0xff]  ;;  %v1135_v59 = vld [vmem:[%s10722_s15 + $0x1958] sm:$0xff] }
 0x3f1   : > { %v1139_v32 = vld [vmem:[%s10722_s15 + $0x1978] sm:$0xff] }
 0x3f2   : > { %7504 = vmatpush1.bf16.msra.mxu0 %v9522_v50  ;;  %7832 = vmatpush1.bf16.msra.mxu1 %v9524_v52  ;;  %v1095_v50 = vld [vmem:[%s10722_s15 + $0x1818] sm:$0xff] }
 0x3f3   : > { %7505 = vmatprep.subr.bf16.mxu0 %v9531_v58  ;;  %7833 = vmatprep.subr.bf16.mxu1 %v9533_v23  ;;  %v1099_v52 = vld [vmem:[%s10722_s15 + $0x1838] sm:$0xff]  ;;  %v9578_v58 = vcombine.low %v1086_v36, %v1090_v29  ;;  %v9580_v23 = vcombine.low %v1087_v38, %v1091_v39  ;;  %v1142_v36 = vld [vmem:[%s10722_s15 + $0x1990] sm:$0xff] }
 0x3f4   : > { %v9589_v55 = vcombine.high %v1095_v50, %v1099_v52  ;;  %v1146_v29 = vld [vmem:[%s10722_s15 + $0x19b0] sm:$0xff]  ;;  %v1143_v38 = vld [vmem:[%s10722_s15 + $0x1998] sm:$0xff] }
 0x3f5   : > { %v1147_v39 = vld [vmem:[%s10722_s15 + $0x19b8] sm:$0xff] }
 0x3f6   : > { %7506 = vmatpush1.bf16.msra.mxu0 %v9530_v57  ;;  %7834 = vmatpush1.bf16.msra.mxu1 %v9532_v60  ;;  %v1103_v57 = vld [vmem:[%s10722_s15 + $0x1858] sm:$0xff] }
 0x3f7   : > { %7507 = vmatprep.subr.bf16.mxu0 %v9539_v61  ;;  %7835 = vmatprep.subr.bf16.mxu1 %v9541_v62  ;;  %v1107_v60 = vld [vmem:[%s10722_s15 + $0x1878] sm:$0xff]  ;;  %v9586_v61 = vcombine.low %v1094_v46, %v1098_v47  ;;  %v9588_v62 = vcombine.low %v1095_v50, %v1099_v52  ;;  %v1150_v46 = vld [vmem:[%s10722_s15 + $0x19d0] sm:$0xff] }
 0x3f8   : > { %v9597_v8 = vcombine.high %v1103_v57, %v1107_v60  ;;  %v1154_v47 = vld [vmem:[%s10722_s15 + $0x19f0] sm:$0xff]  ;;  %v1151_v50 = vld [vmem:[%s10722_s15 + $0x19d8] sm:$0xff] }
 0x3f9   : > { %v1155_v52 = vld [vmem:[%s10722_s15 + $0x19f8] sm:$0xff] }
 0x3fa   : > { %7508 = vmatpush1.bf16.msra.mxu0 %v9538_v2  ;;  %7836 = vmatpush1.bf16.msra.mxu1 %v9540_v3  ;;  %v1111_v2 = vld [vmem:[%s10722_s15 + $0x1898] sm:$0xff] }
 0x3fb   : > { %7509 = vmatprep.subr.bf16.mxu0 %v9547_v4  ;;  %7837 = vmatprep.subr.bf16.mxu1 %v9549_v31  ;;  %v1115_v3 = vld [vmem:[%s10722_s15 + $0x18b8] sm:$0xff]  ;;  %v9594_v4 = vcombine.low %v1102_v51, %v1106_v56  ;;  %v9596_v31 = vcombine.low %v1103_v57, %v1107_v60  ;;  %v1158_v51 = vld [vmem:[%s10722_s15 + $0x1a10] sm:$0xff] }
 0x3fc   : > { %v9605_v10 = vcombine.high %v1111_v2, %v1115_v3  ;;  %v1162_v56 = vld [vmem:[%s10722_s15 + $0x1a30] sm:$0xff]  ;;  %v1159_v57 = vld [vmem:[%s10722_s15 + $0x1a18] sm:$0xff] }
 0x3fd   : > { %v1163_v60 = vld [vmem:[%s10722_s15 + $0x1a38] sm:$0xff] }
 0x3fe   : > { %7510 = vmatpush1.bf16.msra.mxu0 %v9546_v13  ;;  %7838 = vmatpush1.bf16.msra.mxu1 %v9548_v14  ;;  %v1119_v13 = vld [vmem:[%s10722_s15 + $0x18d8] sm:$0xff] }
 0x3ff   : > { %7511 = vmatprep.subr.bf16.mxu0 %v9555_v15  ;;  %7839 = vmatprep.subr.bf16.mxu1 %v9557_v1  ;;  %v1123_v14 = vld [vmem:[%s10722_s15 + $0x18f8] sm:$0xff]  ;;  %v9604_v15 = vcombine.low %v1111_v2, %v1115_v3  ;;  %v9611_v1 = vcombine.high %v1118_v11, %v1122_v12 }
 0x400   : > { %v9613_v17 = vcombine.high %v1119_v13, %v1123_v14  ;;  %v1167_v2 = vld [vmem:[%s10722_s15 + $0x1a58] sm:$0xff] }
 0x401   : > { %v1171_v3 = vld [vmem:[%s10722_s15 + $0x1a78] sm:$0xff] }
 0x402   : > { %7512 = vmatpush1.bf16.msra.mxu0 %v9554_v9  ;;  %7840 = vmatpush1.bf16.msra.mxu1 %v9556_v40  ;;  %v1131_v9 = vld [vmem:[%s10722_s15 + $0x1938] sm:$0xff]  ;;  %v9610_v40 = vcombine.low %v1118_v11, %v1122_v12  ;;  %v1174_v11 = vld [vmem:[%s10722_s15 + $0x1a90] sm:$0xff] }
 0x403   : > { %7513 = vmatprep.subr.bf16.mxu0 %v9563_v25  ;;  %7841 = vmatprep.subr.bf16.mxu1 %v9565_v26  ;;  %v9619_v25 = vcombine.high %v1126_v53, %v1130_v16  ;;  %v9621_v26 = vcombine.high %v1127_v21, %v1131_v9  ;;  %v1178_v12 = vld [vmem:[%s10722_s15 + $0x1ab0] sm:$0xff] }
 0x406   : > { %7514 = vmatpush1.bf16.msra.mxu0 %v9562_v48  ;;  %7842 = vmatpush1.bf16.msra.mxu1 %v9564_v33  ;;  %v9618_v48 = vcombine.low %v1126_v53, %v1130_v16  ;;  %v9620_v33 = vcombine.low %v1127_v21, %v1131_v9  ;;  %v1182_v53 = vld [vmem:[%s10722_s15 + $0x1ad0] sm:$0xff]  ;;  %v1183_v21 = vld [vmem:[%s10722_s15 + $0x1ad8] sm:$0xff] }
 0x407   : > { %7515 = vmatprep.subr.bf16.mxu0 %v9571_v34  ;;  %7843 = vmatprep.subr.bf16.mxu1 %v9573_v35  ;;  %v9627_v34 = vcombine.high %v1134_v19, %v1138_v30  ;;  %v9629_v35 = vcombine.high %v1135_v59, %v1139_v32  ;;  %v1186_v16 = vld [vmem:[%s10722_s15 + $0x1af0] sm:$0xff]  ;;  %v1187_v9 = vld [vmem:[%s10722_s15 + $0x1af8] sm:$0xff] }
 0x40a   : > { %7516 = vmatpush1.bf16.msra.mxu0 %v9570_v41  ;;  %7844 = vmatpush1.bf16.msra.mxu1 %v9572_v42  ;;  %v9626_v41 = vcombine.low %v1134_v19, %v1138_v30  ;;  %v9628_v42 = vcombine.low %v1135_v59, %v1139_v32  ;;  %v1190_v19 = vld [vmem:[%s10722_s15 + $0x1b10] sm:$0xff]  ;;  %v1191_v59 = vld [vmem:[%s10722_s15 + $0x1b18] sm:$0xff] }
 0x40b   : > { %7517 = vmatprep.subr.bf16.mxu0 %v9579_v44  ;;  %7845 = vmatprep.subr.bf16.mxu1 %v9581_v45  ;;  %v9635_v44 = vcombine.high %v1142_v36, %v1146_v29  ;;  %v9637_v45 = vcombine.high %v1143_v38, %v1147_v39  ;;  %v1194_v30 = vld [vmem:[%s10722_s15 + $0x1b30] sm:$0xff]  ;;  %v1195_v32 = vld [vmem:[%s10722_s15 + $0x1b38] sm:$0xff] }
 0x40e   : > { %7518 = vmatpush1.bf16.msra.mxu0 %v9578_v58  ;;  %7846 = vmatpush1.bf16.msra.mxu1 %v9580_v23  ;;  %v9634_v58 = vcombine.low %v1142_v36, %v1146_v29  ;;  %v9636_v23 = vcombine.low %v1143_v38, %v1147_v39  ;;  %v1198_v36 = vld [vmem:[%s10722_s15 + $0x1b50] sm:$0xff]  ;;  %v1199_v38 = vld [vmem:[%s10722_s15 + $0x1b58] sm:$0xff] }
 0x40f   : > { %7528 = vmatprep.subr.bf16.mxu0 %v9587_v54  ;;  %7856 = vmatprep.subr.bf16.mxu1 %v9589_v55  ;;  %v9643_v54 = vcombine.high %v1150_v46, %v1154_v47  ;;  %v9645_v55 = vcombine.high %v1151_v50, %v1155_v52  ;;  %v1202_v29 = vld [vmem:[%s10722_s15 + $0x1b70] sm:$0xff]  ;;  %v1203_v39 = vld [vmem:[%s10722_s15 + $0x1b78] sm:$0xff] }
 0x411   : > { %7520 = vmatmul.mubr.bf16.vlgmr.msra.gmra.mrb[4].mxu0 %v11237_v27  ;;  %7848 = vmatmul.mubr.bf16.vlgmr.msra.gmra.mrb[4].mxu1 %v11237_v27  ;;  %v9602_v27 = vcombine.low %v1110_v63, %v1114_v0  ;;  %v1166_v63 = vld [vmem:[%s10722_s15 + $0x1a50] sm:$0xff] }
 0x412   : > { %7529 = vmatpush1.bf16.msra.mxu0 %v9586_v61  ;;  %7857 = vmatpush1.bf16.msra.mxu1 %v9588_v62  ;;  %v9642_v61 = vcombine.low %v1150_v46, %v1154_v47  ;;  %v9644_v62 = vcombine.low %v1151_v50, %v1155_v52  ;;  %v1170_v0 = vld [vmem:[%s10722_s15 + $0x1a70] sm:$0xff]  ;;  %v1207_v50 = vld [vmem:[%s10722_s15 + $0x1b98] sm:$0xff] }
 0x413   : > { %7530 = vmatprep.subr.bf16.mxu0 %v9595_v5  ;;  %7858 = vmatprep.subr.bf16.mxu1 %v9597_v8  ;;  %v9651_v5 = vcombine.high %v1158_v51, %v1162_v56  ;;  %v9653_v8 = vcombine.high %v1159_v57, %v1163_v60  ;;  %v1206_v46 = vld [vmem:[%s10722_s15 + $0x1b90] sm:$0xff]  ;;  %v1211_v52 = vld [vmem:[%s10722_s15 + $0x1bb8] sm:$0xff] }
 0x414   : > { %7560 = vmatprep.mubr.bf16.mxu0 %v11244_v37  ;;  %7888 = vmatprep.mubr.bf16.mxu1 %v11244_v37  ;;  %v9612_v37 = vcombine.low %v1119_v13, %v1123_v14  ;;  %v1175_v13 = vld [vmem:[%s10722_s15 + $0x1a98] sm:$0xff]  ;;  %v1210_v47 = vld [vmem:[%s10722_s15 + $0x1bb0] sm:$0xff] }
 0x415   : > { %v1179_v14 = vld [vmem:[%s10722_s15 + $0x1ab8] sm:$0xff] }
 0x416   : > { %7531 = vmatpush1.bf16.msra.mxu0 %v9594_v4  ;;  %7859 = vmatpush1.bf16.msra.mxu1 %v9596_v31  ;;  %v9650_v4 = vcombine.low %v1158_v51, %v1162_v56  ;;  %v9652_v31 = vcombine.low %v1159_v57, %v1163_v60  ;;  %v1214_v51 = vld [vmem:[%s10722_s15 + $0x1bd0] sm:$0xff]  ;;  %v1215_v57 = vld [vmem:[%s10722_s15 + $0x1bd8] sm:$0xff] }
 0x417   : > { %7532 = vmatprep.subr.bf16.mxu0 %v9603_v6  ;;  %7860 = vmatprep.subr.bf16.mxu1 %v9605_v10  ;;  %v9659_v6 = vcombine.high %v1166_v63, %v1170_v0  ;;  %v9661_v10 = vcombine.high %v1167_v2, %v1171_v3  ;;  %v1218_v56 = vld [vmem:[%s10722_s15 + $0x1bf0] sm:$0xff]  ;;  %v1219_v60 = vld [vmem:[%s10722_s15 + $0x1bf8] sm:$0xff] }
 0x41a   : > { %7533 = vmatpush1.bf16.msra.mxu0 %v9602_v27  ;;  %7861 = vmatpush1.bf16.msra.mxu1 %v9604_v15  ;;  %v9658_v27 = vcombine.low %v1166_v63, %v1170_v0  ;;  %v9660_v15 = vcombine.low %v1167_v2, %v1171_v3  ;;  %v1222_v63 = vld [vmem:[%s10722_s15 + $0x1c10] sm:$0xff]  ;;  %v1223_v2 = vld [vmem:[%s10722_s15 + $0x1c18] sm:$0xff] }
 0x41b   : > { %7534 = vmatprep.subr.bf16.mxu0 %v9611_v1  ;;  %7862 = vmatprep.subr.bf16.mxu1 %v9613_v17  ;;  %v9667_v1 = vcombine.high %v1174_v11, %v1178_v12  ;;  %v9669_v17 = vcombine.high %v1175_v13, %v1179_v14  ;;  %v1226_v0 = vld [vmem:[%s10722_s15 + $0x1c30] sm:$0xff]  ;;  %v1227_v3 = vld [vmem:[%s10722_s15 + $0x1c38] sm:$0xff] }
 0x41e   : > { %7535 = vmatpush1.bf16.msra.mxu0 %v9610_v40  ;;  %7863 = vmatpush1.bf16.msra.mxu1 %v9612_v37  ;;  %v9666_v40 = vcombine.low %v1174_v11, %v1178_v12  ;;  %v9668_v37 = vcombine.low %v1175_v13, %v1179_v14  ;;  %v1230_v11 = vld [vmem:[%s10722_s15 + $0x1c50] sm:$0xff]  ;;  %v1231_v13 = vld [vmem:[%s10722_s15 + $0x1c58] sm:$0xff] }
 0x41f   : > { %7536 = vmatprep.subr.bf16.mxu0 %v9619_v25  ;;  %7864 = vmatprep.subr.bf16.mxu1 %v9621_v26  ;;  %v9675_v25 = vcombine.high %v1182_v53, %v1186_v16  ;;  %v9677_v26 = vcombine.high %v1183_v21, %v1187_v9  ;;  %v1234_v12 = vld [vmem:[%s10722_s15 + $0x1c70] sm:$0xff]  ;;  %v1235_v14 = vld [vmem:[%s10722_s15 + $0x1c78] sm:$0xff] }
 0x422   : > { %7537 = vmatpush1.bf16.msra.mxu0 %v9618_v48  ;;  %7865 = vmatpush1.bf16.msra.mxu1 %v9620_v33  ;;  %v9674_v48 = vcombine.low %v1182_v53, %v1186_v16  ;;  %v9676_v33 = vcombine.low %v1183_v21, %v1187_v9  ;;  %v1238_v53 = vld [vmem:[%s10722_s15 + $0x1c90] sm:$0xff]  ;;  %v1239_v21 = vld [vmem:[%s10722_s15 + $0x1c98] sm:$0xff] }
 0x423   : > { %7538 = vmatprep.subr.bf16.mxu0 %v9627_v34  ;;  %7866 = vmatprep.subr.bf16.mxu1 %v9629_v35  ;;  %v9683_v34 = vcombine.high %v1190_v19, %v1194_v30  ;;  %v9685_v35 = vcombine.high %v1191_v59, %v1195_v32  ;;  %v1242_v16 = vld [vmem:[%s10722_s15 + $0x1cb0] sm:$0xff]  ;;  %v1243_v9 = vld [vmem:[%s10722_s15 + $0x1cb8] sm:$0xff] }
 0x426   : > { %7539 = vmatpush1.bf16.msra.mxu0 %v9626_v41  ;;  %7867 = vmatpush1.bf16.msra.mxu1 %v9628_v42  ;;  %v9682_v41 = vcombine.low %v1190_v19, %v1194_v30  ;;  %v9684_v42 = vcombine.low %v1191_v59, %v1195_v32  ;;  %v1246_v19 = vld [vmem:[%s10722_s15 + $0x1cd0] sm:$0xff]  ;;  %v1247_v59 = vld [vmem:[%s10722_s15 + $0x1cd8] sm:$0xff] }
 0x427   : > { %7540 = vmatprep.subr.bf16.mxu0 %v9635_v44  ;;  %7868 = vmatprep.subr.bf16.mxu1 %v9637_v45  ;;  %v9691_v44 = vcombine.high %v1198_v36, %v1202_v29  ;;  %v9693_v45 = vcombine.high %v1199_v38, %v1203_v39  ;;  %v1250_v30 = vld [vmem:[%s10722_s15 + $0x1cf0] sm:$0xff]  ;;  %v1251_v32 = vld [vmem:[%s10722_s15 + $0x1cf8] sm:$0xff] }
 0x42a   : > { %7541 = vmatpush1.bf16.msra.mxu0 %v9634_v58  ;;  %7869 = vmatpush1.bf16.msra.mxu1 %v9636_v23  ;;  %v9690_v58 = vcombine.low %v1198_v36, %v1202_v29  ;;  %v9692_v23 = vcombine.low %v1199_v38, %v1203_v39  ;;  %v1258_v36 = vld [vmem:[%s10722_s15 + $0x1d30] sm:$0xff]  ;;  %v1255_v29 = vld [vmem:[%s10722_s15 + $0x1d18] sm:$0xff]  ;;  %v9738_v39 = vcombine.low %v1246_v19, %v1250_v30 }
 0x42b   : > { %7542 = vmatprep.subr.bf16.mxu0 %v9643_v54  ;;  %7870 = vmatprep.subr.bf16.mxu1 %v9645_v55  ;;  %v9699_v54 = vcombine.high %v1206_v46, %v1210_v47  ;;  %v9701_v55 = vcombine.high %v1207_v50, %v1211_v52  ;;  %v1259_v38 = vld [vmem:[%s10722_s15 + $0x1d38] sm:$0xff] }
 0x42e   : > { %7543 = vmatpush1.bf16.msra.mxu0 %v9642_v61  ;;  %7871 = vmatpush1.bf16.msra.mxu1 %v9644_v62  ;;  %v9698_v61 = vcombine.low %v1206_v46, %v1210_v47  ;;  %v9700_v62 = vcombine.low %v1207_v50, %v1211_v52  ;;  %v1263_v46 = vld [vmem:[%s10722_s15 + $0x1d58] sm:$0xff]  ;;  %v9748_v52 = vcombine.low %v1255_v29, %v1259_v38 }
 0x42f   : > { %7544 = vmatprep.subr.bf16.mxu0 %v9651_v5  ;;  %7872 = vmatprep.subr.bf16.mxu1 %v9653_v8  ;;  %v9707_v5 = vcombine.high %v1214_v51, %v1218_v56  ;;  %v9709_v8 = vcombine.high %v1215_v57, %v1219_v60  ;;  %v1267_v47 = vld [vmem:[%s10722_s15 + $0x1d78] sm:$0xff] }
 0x432   : > { %7545 = vmatpush1.bf16.msra.mxu0 %v9650_v4  ;;  %7873 = vmatpush1.bf16.msra.mxu1 %v9652_v31  ;;  %v9706_v4 = vcombine.low %v1214_v51, %v1218_v56  ;;  %v9708_v31 = vcombine.low %v1215_v57, %v1219_v60  ;;  %v1271_v51 = vld [vmem:[%s10722_s15 + $0x1d98] sm:$0xff]  ;;  %v1356_v60 = vsub.s32 1, %v10763_v43 }
 0x433   : > { %7546 = vmatprep.subr.bf16.mxu0 %v9659_v6  ;;  %7874 = vmatprep.subr.bf16.mxu1 %v9661_v10  ;;  %v9715_v6 = vcombine.high %v1222_v63, %v1226_v0  ;;  %v9717_v10 = vcombine.high %v1223_v2, %v1227_v3  ;;  %v1275_v56 = vld [vmem:[%s10722_s15 + $0x1db8] sm:$0xff] }
 0x436   : > { %7547 = vmatpush1.bf16.msra.mxu0 %v9658_v27  ;;  %7875 = vmatpush1.bf16.msra.mxu1 %v9660_v15  ;;  %v9714_v27 = vcombine.low %v1222_v63, %v1226_v0  ;;  %v9716_v15 = vcombine.low %v1223_v2, %v1227_v3  ;;  %v9765_v63 = vcombine.high %v1271_v51, %v1275_v56  ;;  %v1278_v0 = vld [vmem:[%s10722_s15 + $0x1dd0] sm:$0xff]  ;;  %v1279_v3 = vld [vmem:[%s10722_s15 + $0x1dd8] sm:$0xff] }
 0x437   : > { %7548 = vmatprep.subr.bf16.mxu0 %v9667_v1  ;;  %7876 = vmatprep.subr.bf16.mxu1 %v9669_v17  ;;  %v9723_v1 = vcombine.high %v1230_v11, %v1234_v12  ;;  %v9725_v17 = vcombine.high %v1231_v13, %v1235_v14  ;;  %v1282_v2 = vld [vmem:[%s10722_s15 + $0x1df0] sm:$0xff] }
 0x43a   : > { %7549 = vmatpush1.bf16.msra.mxu0 %v9666_v40  ;;  %7877 = vmatpush1.bf16.msra.mxu1 %v9668_v37  ;;  %v9722_v40 = vcombine.low %v1230_v11, %v1234_v12  ;;  %v9724_v37 = vcombine.low %v1231_v13, %v1235_v14  ;;  %v9771_v11 = vcombine.high %v1278_v0, %v1282_v2  ;;  %v1286_v14 = vld [vmem:[%s10722_s15 + $0x1e10] sm:$0xff] }
 0x43b   : > { %7550 = vmatprep.subr.bf16.mxu0 %v9675_v25  ;;  %7878 = vmatprep.subr.bf16.mxu1 %v9677_v26  ;;  %v9731_v25 = vcombine.high %v1238_v53, %v1242_v16  ;;  %v9733_v26 = vcombine.high %v1239_v21, %v1243_v9 }
 0x43e   : > { %7551 = vmatpush1.bf16.msra.mxu0 %v9674_v48  ;;  %7879 = vmatpush1.bf16.msra.mxu1 %v9676_v33  ;;  %v9732_v48 = vcombine.low %v1239_v21, %v1243_v9  ;;  %v9739_v33 = vcombine.high %v1246_v19, %v1250_v30  ;;  %v1299_v19 = vld [vmem:[%s10722_s15 + $0x1e78] sm:$0xff] }
 0x43f   : > { %7552 = vmatprep.subr.bf16.mxu0 %v9683_v34  ;;  %7880 = vmatprep.subr.bf16.mxu1 %v9685_v35  ;;  %v9741_v34 = vcombine.high %v1247_v59, %v1251_v32  ;;  %v1254_v35 = vld [vmem:[%s10722_s15 + $0x1d10] sm:$0xff] }
 0x440   : > { %v9746_v50 = vcombine.low %v1254_v35, %v1258_v36 }
 0x442   : > { %7553 = vmatpush1.bf16.msra.mxu0 %v9682_v41  ;;  %7881 = vmatpush1.bf16.msra.mxu1 %v9684_v42  ;;  %v9747_v41 = vcombine.high %v1254_v35, %v1258_v36  ;;  %v9749_v42 = vcombine.high %v1255_v29, %v1259_v38  ;;  %v1307_v35 = vld [vmem:[%s10722_s15 + $0x1eb8] sm:$0xff] }
 0x443   : > { %7554 = vmatprep.subr.bf16.mxu0 %v9691_v44  ;;  %7882 = vmatprep.subr.bf16.mxu1 %v9693_v45  ;;  %v1262_v44 = vld [vmem:[%s10722_s15 + $0x1d50] sm:$0xff] }
 0x444   : > { %v1266_v45 = vld [vmem:[%s10722_s15 + $0x1d70] sm:$0xff] }
 0x445   : > { %v9754_v57 = vcombine.low %v1262_v44, %v1266_v45 }
 0x446   : > { %7555 = vmatpush1.bf16.msra.mxu0 %v9690_v58  ;;  %7883 = vmatpush1.bf16.msra.mxu1 %v9692_v23  ;;  %v9755_v58 = vcombine.high %v1262_v44, %v1266_v45  ;;  %v9757_v23 = vcombine.high %v1263_v46, %v1267_v47  ;;  %v1315_v44 = vld [vmem:[%s10722_s15 + $0x1ef8] sm:$0xff] }
 0x447   : > { %7556 = vmatprep.subr.bf16.mxu0 %v9699_v54  ;;  %7884 = vmatprep.subr.bf16.mxu1 %v9701_v55  ;;  %v1270_v54 = vld [vmem:[%s10722_s15 + $0x1d90] sm:$0xff] }
 0x448   : > { %v1274_v55 = vld [vmem:[%s10722_s15 + $0x1db0] sm:$0xff] }
 0x44a   : > { %7557 = vmatpush1.bf16.msra.mxu0 %v9698_v61  ;;  %7885 = vmatpush1.bf16.msra.mxu1 %v9700_v62  ;;  %v9756_v61 = vcombine.low %v1263_v46, %v1267_v47  ;;  %v9763_v62 = vcombine.high %v1270_v54, %v1274_v55 }
 0x44b   : > { %7558 = vmatprep.subr.bf16.mxu0 %v9707_v5  ;;  %7886 = vmatprep.subr.bf16.mxu1 %v9709_v8  ;;  %v11902_v5 = vld [vmem:[%s10729_s17] sm:$0xff]  ;;  %v1364_v8 = vsub.s32 3, %v10763_v43 }
 0x44d   : > { %v1365_v12 = vrot.slane %v11902_v5, %v1364_v8  ;;  %v1327_v8 = vld [vmem:[%s10722_s15 + $0x1f58] sm:$0xff] }
 0x44e   : > { %7559 = vmatpush1.bf16.msra.mxu0 %v9706_v4  ;;  %7887 = vmatpush1.bf16.msra.mxu1 %v9708_v31  ;;  %v1283_v4 = vld [vmem:[%s10722_s15 + $0x1df8] sm:$0xff]  ;;  %v9762_v31 = vcombine.low %v1270_v54, %v1274_v55 }
 0x44f   : > { %7569 = vmatprep.subr.bf16.mxu0 %v9715_v6  ;;  %7897 = vmatprep.subr.bf16.mxu1 %v9717_v10  ;;  %v1357_v6 = vrot.slane %v11902_v5, %v1356_v60  ;;  %v9764_v10 = vcombine.low %v1271_v51, %v1275_v56  ;;  %v9773_v13 = vcombine.high %v1279_v3, %v1283_v4  ;;  %v1323_v54 = vld [vmem:[%s10722_s15 + $0x1f38] sm:$0xff]  ;;  %v1326_v60 = vld [vmem:[%s10722_s15 + $0x1f50] sm:$0xff] }
 0x450   : > { %v10011_v9 = vadd.f32 %v11630_v28, %v1365_v12  ;;  %v1352_v12 = vsub.s32 0, %v10763_v43 }
 0x451   : > { %7561 = vmatmul.mubr.bf16.vlgmr.msra.gmra.mrb[4].mxu0 %v11312_v7  ;;  %7889 = vmatmul.mubr.bf16.vlgmr.msra.gmra.mrb[4].mxu1 %v11312_v7  ;;  %v9730_v7 = vcombine.low %v1238_v53, %v1242_v16  ;;  %v10009_v53 = vadd.f32 %v11626_v24, %v1357_v6  ;;  %v9772_v16 = vcombine.low %v1279_v3, %v1283_v4 }
 0x452   : > { %7570 = vmatpush1.bf16.msra.mxu0 %v9714_v27  ;;  %7898 = vmatpush1.bf16.msra.mxu1 %v9716_v15  ;;  %v1290_v27 = vld [vmem:[%s10722_s15 + $0x1e30] sm:$0xff]  ;;  %v1287_v15 = vld [vmem:[%s10722_s15 + $0x1e18] sm:$0xff] }
 0x453   : > { %7571 = vmatprep.subr.bf16.mxu0 %v9723_v1  ;;  %7899 = vmatprep.subr.bf16.mxu1 %v9725_v17  ;;  %v1291_v1 = vld [vmem:[%s10722_s15 + $0x1e38] sm:$0xff]  ;;  %v9770_v17 = vcombine.low %v1278_v0, %v1282_v2  ;;  %v9779_v21 = vcombine.high %v1286_v14, %v1290_v27  ;;  %v9778_v30 = vcombine.low %v1286_v14, %v1290_v27 }
 0x454   : > { %7601 = vmatprep.mubr.bf16.mxu0 %v11320_v18  ;;  %7929 = vmatprep.mubr.bf16.mxu1 %v11320_v18  ;;  %v9740_v18 = vcombine.low %v1247_v59, %v1251_v32  ;;  %v9839_v59 = vmul.f32 -1.442695, %v10009_v53  ;;  %v9780_v24 = vcombine.low %v1287_v15, %v1291_v1  ;;  %v1335_v14 = vld [vmem:[%s10722_s15 + $0x1f98] sm:$0xff] }
 0x455   : > { %v1339_v27 = vld [vmem:[%s10722_s15 + $0x1fb8] sm:$0xff] }
 0x456   : > { %7572 = vmatpush1.bf16.msra.mxu0 %v9722_v40  ;;  %7900 = vmatpush1.bf16.msra.mxu1 %v9724_v37  ;;  %v9781_v40 = vcombine.high %v1287_v15, %v1291_v1  ;;  %v1294_v37 = vld [vmem:[%s10722_s15 + $0x1e50] sm:$0xff]  ;;  %10266 = vpow2.f32 %v9839_v59  ;;  %v1360_v15 = vsub.s32 2, %v10763_v43 }
 0x457   : > { %7573 = vmatprep.subr.bf16.mxu0 %v9731_v25  ;;  %7901 = vmatprep.subr.bf16.mxu1 %v9733_v26  ;;  %v1298_v25 = vld [vmem:[%s10722_s15 + $0x1e70] sm:$0xff]  ;;  %v1295_v26 = vld [vmem:[%s10722_s15 + $0x1e58] sm:$0xff] }
 0x458   : > { %v9787_v32 = vcombine.high %v1294_v37, %v1298_v25  ;;  %v9789_v28 = vcombine.high %v1295_v26, %v1299_v19  ;;  %v9786_v36 = vcombine.low %v1294_v37, %v1298_v25  ;;  %v9788_v29 = vcombine.low %v1295_v26, %v1299_v19  ;;  %v1343_v37 = vld [vmem:[%s10722_s15 + $0x1fd8] sm:$0xff] }
 0x459   : > { %v1347_v25 = vld [vmem:[%s10722_s15 + $0x1ff8] sm:$0xff]  ;;  %v1361_v26 = vrot.slane %v11902_v5, %v1360_v15 }
 0x45a   : > { %7574 = vmatpush1.bf16.msra.mxu0 %v9730_v7  ;;  %7902 = vmatpush1.bf16.msra.mxu1 %v9732_v48  ;;  %v9841_v7 = vmul.f32 -1.442695, %v10011_v9  ;;  %v1302_v48 = vld [vmem:[%s10722_s15 + $0x1e90] sm:$0xff] }
 0x45b   : > { %7575 = vmatprep.subr.bf16.mxu0 %v9739_v33  ;;  %7903 = vmatprep.subr.bf16.mxu1 %v9741_v34  ;;  %v1306_v33 = vld [vmem:[%s10722_s15 + $0x1eb0] sm:$0xff]  ;;  %v1303_v34 = vld [vmem:[%s10722_s15 + $0x1e98] sm:$0xff] }
 0x45c   : > { %v9795_v38 = vcombine.high %v1302_v48, %v1306_v33  ;;  %10268 = vpow2.f32 %v9841_v7  ;;  %v9794_v45 = vcombine.low %v1302_v48, %v1306_v33  ;;  %v9796_v46 = vcombine.low %v1303_v34, %v1307_v35  ;;  %v1346_v9 = vld [vmem:[%s10722_s15 + $0x1ff0] sm:$0xff] }
 0x45d   : > { %v10010_v7 = vadd.f32 %v11624_v22, %v1361_v26  ;;  %v9836_v48 = vcombine.low %v1343_v37, %v1347_v25  ;;  %v10202_v33 = vld [vmem:[%s10735_s18 + $0x40] sm:$0xff]   ;;  %v10241_v26 = vld [vmem:[%s10735_s18 + $0x188] sm:$0xff]  }
 0x45e   : > { %7576 = vmatpush1.bf16.msra.mxu0 %v9738_v39  ;;  %7904 = vmatpush1.bf16.msra.mxu1 %v9740_v18  ;;  %v9797_v39 = vcombine.high %v1303_v34, %v1307_v35  ;;  %v1310_v18 = vld [vmem:[%s10722_s15 + $0x1ed0] sm:$0xff] }
 0x45f   : > { %7577 = vmatprep.subr.bf16.mxu0 %v9747_v41  ;;  %7905 = vmatprep.subr.bf16.mxu1 %v9749_v42  ;;  %v1314_v41 = vld [vmem:[%s10722_s15 + $0x1ef0] sm:$0xff]  ;;  %v1311_v42 = vld [vmem:[%s10722_s15 + $0x1ed8] sm:$0xff] }
 0x460   : > { %v9803_v47 = vcombine.high %v1310_v18, %v1314_v41  ;;  %v9802_v55 = vcombine.low %v1310_v18, %v1314_v41  ;;  %v9804_v51 = vcombine.low %v1311_v42, %v1315_v44  ;;  %v10203_v34 = vld [vmem:[%s10735_s18 + $0xc0] sm:$0xff]   ;;  %v10207_v41 = vld [vmem:[%s10735_s18 + $0xc8] sm:$0xff]  }
 0x461   : > { %v10205_v22 = vld [vmem:[%s10735_s18 + $0x80] sm:$0xff]  }
 0x462   : > { %7578 = vmatpush1.bf16.msra.mxu0 %v9746_v50  ;;  %7906 = vmatpush1.bf16.msra.mxu1 %v9748_v52  ;;  %v9805_v50 = vcombine.high %v1311_v42, %v1315_v44  ;;  %v1318_v52 = vld [vmem:[%s10722_s15 + $0x1f10] sm:$0xff]  ;;  %v10208_v44 = vld [vmem:[%s10735_s18 + $0x8] sm:$0xff]  }
 0x463   : > { %7579 = vmatprep.subr.bf16.mxu0 %v9755_v58  ;;  %7907 = vmatprep.subr.bf16.mxu1 %v9757_v23  ;;  %v1322_v58 = vld [vmem:[%s10722_s15 + $0x1f30] sm:$0xff]  ;;  %v1319_v23 = vld [vmem:[%s10722_s15 + $0x1f18] sm:$0xff] }
 0x464   : > { %v9811_v56 = vcombine.high %v1318_v52, %v1322_v58  ;;  %v9810_v2 = vcombine.low %v1318_v52, %v1322_v58  ;;  %v9812_v3 = vcombine.low %v1319_v23, %v1323_v54  ;;  %v10214_v52 = vld [vmem:[%s10735_s18 + $0x58] sm:$0xff]  }
 0x465   : > { %v10215_v58 = vld [vmem:[%s10735_s18 + $0xd8] sm:$0xff]  }
 0x466   : > { %7580 = vmatpush1.bf16.msra.mxu0 %v9754_v57  ;;  %7908 = vmatpush1.bf16.msra.mxu1 %v9756_v61  ;;  %v9813_v57 = vcombine.high %v1319_v23, %v1323_v54  ;;  %v1330_v61 = vld [vmem:[%s10722_s15 + $0x1f70] sm:$0xff]  ;;  %v10216_v23 = vld [vmem:[%s10735_s18 + $0x18] sm:$0xff]  }
 0x467   : > { %7581 = vmatprep.subr.bf16.mxu0 %v9763_v62  ;;  %7909 = vmatprep.subr.bf16.mxu1 %v9765_v63  ;;  %v10267_v62 = vpop.eup %10266  ;;  %v1331_v63 = vld [vmem:[%s10722_s15 + $0x1f78] sm:$0xff]  ;;  %v9819_v4 = vcombine.high %v1326_v60, %v1330_v61  ;;  %v9818_v1 = vcombine.low %v1326_v60, %v1330_v61  ;;  %v10220_v61 = vld [vmem:[%s10735_s18 + $0x20] sm:$0xff]  }
 0x468   : > { %v10269_v0 = vpop.eup %10268  ;;  %v9821_v6 = vcombine.high %v1327_v8, %v1331_v63 }
 0x46a   : > { %7582 = vmatpush1.bf16.msra.mxu0 %v9762_v31  ;;  %7910 = vmatpush1.bf16.msra.mxu1 %v9764_v10  ;;  %v7963_v31 = vadd.f32 1.0, %v10267_v62  ;;  %v1334_v10 = vld [vmem:[%s10722_s15 + $0x1f90] sm:$0xff] }
 0x46b   : > { %7583 = vmatprep.subr.bf16.mxu0 %v9771_v11  ;;  %7911 = vmatprep.subr.bf16.mxu1 %v9773_v13  ;;  %v1338_v11 = vld [vmem:[%s10722_s15 + $0x1fb0] sm:$0xff]  ;;  %v7965_v13 = vadd.f32 1.0, %v10269_v0  ;;  %v10223_v0 = vld [vmem:[%s10735_s18 + $0xe8] sm:$0xff]  }
 0x46c   : > { %v9827_v53 = vcombine.high %v1334_v10, %v1338_v11  ;;  %10270 = vrcp.f32 %v7963_v31  ;;  %v9826_v19 = vcombine.low %v1334_v10, %v1338_v11  ;;  %v10227_v31 = vld [vmem:[%s10735_s18 + $0xf0] sm:$0xff]   ;;  %v10230_v11 = vld [vmem:[%s10735_s18 + $0x78] sm:$0xff]  }
 0x46d   : > { %10272 = vrcp.f32 %v7965_v13  ;;  %v10229_v10 = vld [vmem:[%s10735_s18 + $0xb0] sm:$0xff]   ;;  %v10232_v13 = vld [vmem:[%s10735_s18 + $0x38] sm:$0xff]  }
 0x46e   : > { %7584 = vmatpush1.bf16.msra.mxu0 %v9770_v17  ;;  %7912 = vmatpush1.bf16.msra.mxu1 %v9772_v16  ;;  %v9820_v17 = vcombine.low %v1327_v8, %v1331_v63  ;;  %v9829_v16 = vcombine.high %v1335_v14, %v1339_v27  ;;  %v10221_v8 = vld [vmem:[%s10735_s18 + $0xa0] sm:$0xff]   ;;  %v10222_v63 = vld [vmem:[%s10735_s18 + $0x68] sm:$0xff]  }
 0x46f   : > { %7585 = vmatprep.subr.bf16.mxu0 %v9779_v21  ;;  %7913 = vmatprep.subr.bf16.mxu1 %v9781_v40  ;;  %v1342_v21 = vld [vmem:[%s10722_s15 + $0x1fd0] sm:$0xff]  ;;  %v1353_v40 = vrot.slane %v11902_v5, %v1352_v12  ;;  %v10231_v12 = vld [vmem:[%s10735_s18 + $0xf8] sm:$0xff]  }
 0x470   : > { %v9835_v59 = vcombine.high %v1342_v21, %v1346_v9 }
 0x472   : > { %7586 = vmatpush1.bf16.msra.mxu0 %v9778_v30  ;;  %7914 = vmatpush1.bf16.msra.mxu1 %v9780_v24  ;;  %v9828_v30 = vcombine.low %v1335_v14, %v1339_v27  ;;  %v9837_v24 = vcombine.high %v1343_v37, %v1347_v25  ;;  %v10233_v14 = vld [vmem:[%s10735_s18 + $0xb8] sm:$0xff]   ;;  %v10239_v37 = vld [vmem:[%s10735_s18 + $0x1c8] sm:$0xff]  }
 0x473   : > { %7587 = vmatprep.subr.bf16.mxu0 %v9787_v32  ;;  %7915 = vmatprep.subr.bf16.mxu1 %v9789_v28  ;;  %v10008_v32 = vadd.f32 %v11620_v20, %v1353_v40  ;;  %v9834_v28 = vcombine.low %v1342_v21, %v1346_v9  ;;  %v10236_v21 = vld [vmem:[%s10735_s18 + $0x100] sm:$0xff]   ;;  %v10238_v40 = vld [vmem:[%s10735_s18 + $0x148] sm:$0xff]  }
 0x474   : > { %v10237_v9 = vld [vmem:[%s10735_s18 + $0x180] sm:$0xff]   ;;  %v10240_v25 = vld [vmem:[%s10735_s18 + $0x108] sm:$0xff]  }
 0x475   : > { %v9838_v35 = vmul.f32 -1.442695, %v10008_v32  ;;  %v10246_v32 = vld [vmem:[%s10735_s18 + $0x158] sm:$0xff]  }
 0x476   : > { %7588 = vmatpush1.bf16.msra.mxu0 %v9786_v36  ;;  %7916 = vmatpush1.bf16.msra.mxu1 %v9788_v29  ;;  %v10271_v36 = vpop.eup %10270  ;;  %v9840_v29 = vmul.f32 -1.442695, %v10010_v7  ;;  %v10247_v7 = vld [vmem:[%s10735_s18 + $0x1d8] sm:$0xff]  }
 0x477   : > { %7589 = vmatprep.subr.bf16.mxu0 %v9795_v38  ;;  %7917 = vmatprep.subr.bf16.mxu1 %v9797_v39  ;;  %v10204_v38 = vld [vmem:[%s10735_s18] sm:$0xff]   ;;  %v10273_v20 = vpop.eup %10272  ;;  %v10206_v39 = vld [vmem:[%s10735_s18 + $0x48] sm:$0xff]   ;;  %10274 = vpow2.f32 %v9838_v35  ;;  %v7987_v18 = vpack.c.bf16 %v10271_v36, %v10271_v36 }
 0x478   : > { %10276 = vpow2.f32 %v9840_v29  ;;  %v7989_v42 = vpack.c.bf16 %v10273_v20, %v10273_v20  ;;  %v10252_v35 = vld [vmem:[%s10735_s18 + $0x120] sm:$0xff]   ;;  %v10254_v29 = vld [vmem:[%s10735_s18 + $0x168] sm:$0xff]  }
 0x479   : > { %v10253_v36 = vld [vmem:[%s10735_s18 + $0x1a0] sm:$0xff]   ;;  %v10256_v20 = vld [vmem:[%s10735_s18 + $0x128] sm:$0xff]  }
 0x47a   : > { %7590 = vmatpush1.bf16.msra.mxu0 %v9794_v45  ;;  %7918 = vmatpush1.bf16.msra.mxu1 %v9796_v46  ;;  %v10209_v45 = vld [vmem:[%s10735_s18 + $0x88] sm:$0xff]   ;;  %v10210_v46 = vld [vmem:[%s10735_s18 + $0x50] sm:$0xff]  }
 0x47b   : > { %7591 = vmatprep.subr.bf16.mxu0 %v9803_v47  ;;  %7919 = vmatprep.subr.bf16.mxu1 %v9805_v50  ;;  %v10211_v47 = vld [vmem:[%s10735_s18 + $0xd0] sm:$0xff]  }
 0x47c   : > { %v10212_v50 = vld [vmem:[%s10735_s18 + $0x10] sm:$0xff]  }
 0x47e   : > { %7592 = vmatpush1.bf16.msra.mxu0 %v9802_v55  ;;  %7920 = vmatpush1.bf16.msra.mxu1 %v9804_v51  ;;  %v10217_v55 = vld [vmem:[%s10735_s18 + $0x98] sm:$0xff]   ;;  %v10218_v51 = vld [vmem:[%s10735_s18 + $0x60] sm:$0xff]  }
 0x47f   : > { %7593 = vmatprep.subr.bf16.mxu0 %v9811_v56  ;;  %7921 = vmatprep.subr.bf16.mxu1 %v9813_v57  ;;  %v10219_v57 = vld [vmem:[%s10735_s18 + $0xe0] sm:$0xff]  }
 0x481   : > { %v10275_v54 = vpop.eup %10274 }
 0x482   : > { %7594 = vmatpush1.bf16.msra.mxu0 %v9810_v2  ;;  %7922 = vmatpush1.bf16.msra.mxu1 %v9812_v3  ;;  %v10277_v56 = vpop.eup %10276  ;;  %v7962_v60 = vadd.f32 1.0, %v10275_v54  ;;  %v10224_v2 = vld [vmem:[%s10735_s18 + $0x28] sm:$0xff]  }
 0x483   : > { %7595 = vmatprep.subr.bf16.mxu0 %v9819_v4  ;;  %7923 = vmatprep.subr.bf16.mxu1 %v9821_v6  ;;  %v7964_v62 = vadd.f32 1.0, %v10277_v56  ;;  %v10225_v3 = vld [vmem:[%s10735_s18 + $0xa8] sm:$0xff]   ;;  %v10226_v4 = vld [vmem:[%s10735_s18 + $0x70] sm:$0xff]  }
 0x484   : > { %10278 = vrcp.f32 %v7962_v60  ;;  %v10228_v6 = vld [vmem:[%s10735_s18 + $0x30] sm:$0xff]  }
 0x485   : > { %10280 = vrcp.f32 %v7964_v62 }
 0x486   : > { %7596 = vmatpush1.bf16.msra.mxu0 %v9818_v1  ;;  %7924 = vmatpush1.bf16.msra.mxu1 %v9820_v17 }
 0x487   : > { %7597 = vmatprep.subr.bf16.mxu0 %v9827_v53  ;;  %7925 = vmatprep.subr.bf16.mxu1 %v9829_v16  ;;  %v10234_v53 = vld [vmem:[%s10735_s18 + $0x140] sm:$0xff]  }
 0x488   : > { %v10235_v16 = vld [vmem:[%s10735_s18 + $0x1c0] sm:$0xff]  }
 0x48a   : > { %7598 = vmatpush1.bf16.msra.mxu0 %v9826_v19  ;;  %7926 = vmatpush1.bf16.msra.mxu1 %v9828_v30  ;;  %v10242_v19 = vld [vmem:[%s10735_s18 + $0x150] sm:$0xff]  }
 0x48b   : > { %7599 = vmatprep.subr.bf16.mxu0 %v9835_v59  ;;  %7927 = vmatprep.subr.bf16.mxu1 %v9837_v24  ;;  %v10243_v30 = vld [vmem:[%s10735_s18 + $0x1d0] sm:$0xff]  }
 0x48c   : > { %v10244_v59 = vld [vmem:[%s10735_s18 + $0x110] sm:$0xff]  }
 0x48d   : > { %v10245_v24 = vld [vmem:[%s10735_s18 + $0x190] sm:$0xff]  }
 0x48e   : > { %7600 = vmatpush1.bf16.msra.mxu0 %v9834_v28  ;;  %7928 = vmatpush1.bf16.msra.mxu1 %v9836_v48  ;;  %v10279_v27 = vpop.eup %10278  ;;  %v10248_v28 = vld [vmem:[%s10735_s18 + $0x118] sm:$0xff]  }
 0x48f   : > { %9920 = vmatprep.subr.bf16.mxu0 %v10202_v33  ;;  %9942 = vmatprep.subr.bf16.mxu1 %v10203_v34  ;;  %v10281_v15 = vpop.eup %10280  ;;  %v7986_v1 = vpack.c.bf16 %v10279_v27, %v10279_v27  ;;  %v10249_v48 = vld [vmem:[%s10735_s18 + $0x198] sm:$0xff]   ;;  %v10250_v33 = vld [vmem:[%s10735_s18 + $0x160] sm:$0xff]  }
 0x490   : > { %v7988_v17 = vpack.c.bf16 %v10281_v15, %v10281_v15  ;;  %v10251_v34 = vld [vmem:[%s10735_s18 + $0x1e0] sm:$0xff]  }
 0x491   : > { %7602 = vmatmul.mubr.bf16.vlgmr.msra.gmra.mrb[4].mxu0 %v11388_v49  ;;  %7930 = vmatmul.mubr.bf16.vlgmr.msra.gmra.mrb[4].mxu1 %v11388_v49  ;;  %v10213_v49 = vld [vmem:[%s10735_s18 + $0x90] sm:$0xff]  }
 0x492   : > { %9921 = vmatpush3.bf16.msra.mxu0 %v10204_v38  ;;  %8538 = vmatprep.mubr.bf16.mxu0 %v7987_v18  ;;  %v10255_v38 = vld [vmem:[%s10735_s18 + $0x1e8] sm:$0xff]   ;;  %v10259_v18 = vld [vmem:[%s10735_s18 + $0x1f0] sm:$0xff]  }
 0x493   : > { %9943 = vmatpush3.bf16.msra.mxu1 %v10205_v22  ;;  %8578 = vmatprep.mubr.bf16.mxu1 %v7989_v42  ;;  %v10257_v22 = vld [vmem:[%s10735_s18 + $0x1a8] sm:$0xff]   ;;  %v10261_v42 = vld [vmem:[%s10735_s18 + $0x1b0] sm:$0xff]  }
 0x494   : > { %9922 = vmatprep.subr.bf16.mxu0 %v10206_v39  ;;  %9944 = vmatprep.subr.bf16.mxu1 %v10207_v41  ;;  %v10258_v39 = vld [vmem:[%s10735_s18 + $0x170] sm:$0xff]  }
 0x495   : > { %v10260_v41 = vld [vmem:[%s10735_s18 + $0x130] sm:$0xff]  }
 0x496   : > { %9923 = vmatpush3.bf16.msra.mxu0 %v10208_v44  ;;  %v10262_v44 = vld [vmem:[%s10735_s18 + $0x178] sm:$0xff]  }
 0x497   : > { %9945 = vmatpush3.bf16.msra.mxu1 %v10209_v45  ;;  %9924 = vmatprep.subr.bf16.mxu0 %v10210_v46  ;;  %v10263_v45 = vld [vmem:[%s10735_s18 + $0x1f8] sm:$0xff]  }
 0x498   : > { %9946 = vmatprep.subr.bf16.mxu1 %v10211_v47  ;;  %v10264_v46 = vld [vmem:[%s10735_s18 + $0x138] sm:$0xff]  }
 0x499   : > { %v10265_v47 = vld [vmem:[%s10735_s18 + $0x1b8] sm:$0xff]  }
 0x49a   : > { %9925 = vmatpush3.bf16.msra.mxu0 %v10212_v50  ;;  %v1368_v50 = vsub.s32 4, %v10763_v43 }
 0x49b   : > { %9947 = vmatpush3.bf16.msra.mxu1 %v10213_v49  ;;  %9926 = vmatprep.subr.bf16.mxu0 %v10214_v52  ;;  %v1376_v49 = vsub.s32 6, %v10763_v43  ;;  %v1372_v52 = vsub.s32 5, %v10763_v43 }
 0x49c   : > { %9948 = vmatprep.subr.bf16.mxu1 %v10215_v58  ;;  %v1380_v58 = vsub.s32 7, %v10763_v43 }
 0x49d   : > { %v1377_v54 = vrot.slane %v11902_v5, %v1376_v49 }
 0x49e   : > { %9927 = vmatpush3.bf16.msra.mxu0 %v10216_v23  ;;  %v1369_v23 = vrot.slane %v11902_v5, %v1368_v50 }
 0x49f   : > { %9949 = vmatpush3.bf16.msra.mxu1 %v10217_v55  ;;  %9928 = vmatprep.subr.bf16.mxu0 %v10218_v51  ;;  %v1373_v55 = vrot.slane %v11902_v5, %v1372_v52  ;;  %v1381_v51 = vrot.slane %v11902_v5, %v1380_v58 }
 0x4a0   : > { %9950 = vmatprep.subr.bf16.mxu1 %v10219_v57 }
 0x4a2   : > { %9929 = vmatpush3.bf16.msra.mxu0 %v10220_v61 }
 0x4a3   : > { %9951 = vmatpush3.bf16.msra.mxu1 %v10221_v8  ;;  %9930 = vmatprep.subr.bf16.mxu0 %v10222_v63 }
 0x4a4   : > { %9952 = vmatprep.subr.bf16.mxu1 %v10223_v0 }
 0x4a6   : > { %9931 = vmatpush3.bf16.msra.mxu0 %v10224_v2 }
 0x4a7   : > { %9953 = vmatpush3.bf16.msra.mxu1 %v10225_v3  ;;  %9932 = vmatprep.subr.bf16.mxu0 %v10226_v4 }
 0x4a8   : > { %9954 = vmatprep.subr.bf16.mxu1 %v10227_v31 }
 0x4aa   : > { %9933 = vmatpush3.bf16.msra.mxu0 %v10228_v6 }
 0x4ab   : > { %9955 = vmatpush3.bf16.msra.mxu1 %v10229_v10  ;;  %9934 = vmatprep.subr.bf16.mxu0 %v10230_v11 }
 0x4ac   : > { %9956 = vmatprep.subr.bf16.mxu1 %v10231_v12 }
 0x4ae   : > { %9935 = vmatpush3.bf16.msra.mxu0 %v10232_v13 }
 0x4af   : > { %9957 = vmatpush3.bf16.msra.mxu1 %v10233_v14  ;;  %9964 = vmatprep.subr.bf16.mxu0 %v10234_v53 }
 0x4b0   : > { %9986 = vmatprep.subr.bf16.mxu1 %v10235_v16 }
 0x4b1   : > { %8539 = vmatmul.mubr.bf16.vlgmr.msra.gmra.mrb[8].mxu0 %v7986_v1 }
 0x4b2   : > { %8579 = vmatmul.mubr.bf16.vlgmr.msra.gmra.mrb[8].mxu1 %v7988_v17  ;;  %9965 = vmatpush3.bf16.msra.mxu0 %v10236_v21 }
 0x4b3   : > { %9987 = vmatpush3.bf16.msra.mxu1 %v10237_v9  ;;  %9966 = vmatprep.subr.bf16.mxu0 %v10238_v40 }
 0x4b4   : > { %9988 = vmatprep.subr.bf16.mxu1 %v10239_v37 }
 0x4b6   : > { %9967 = vmatpush3.bf16.msra.mxu0 %v10240_v25 }
 0x4b7   : > { %9989 = vmatpush3.bf16.msra.mxu1 %v10241_v26  ;;  %9968 = vmatprep.subr.bf16.mxu0 %v10242_v19 }
 0x4b8   : > { %9990 = vmatprep.subr.bf16.mxu1 %v10243_v30 }
 0x4ba   : > { %9969 = vmatpush3.bf16.msra.mxu0 %v10244_v59 }
 0x4bb   : > { %9991 = vmatpush3.bf16.msra.mxu1 %v10245_v24  ;;  %9970 = vmatprep.subr.bf16.mxu0 %v10246_v32 }
 0x4bc   : > { %9992 = vmatprep.subr.bf16.mxu1 %v10247_v7 }
 0x4be   : > { %9971 = vmatpush3.bf16.msra.mxu0 %v10248_v28 }
 0x4bf   : > { %9993 = vmatpush3.bf16.msra.mxu1 %v10249_v48  ;;  %9972 = vmatprep.subr.bf16.mxu0 %v10250_v33 }
 0x4c0   : > { %9994 = vmatprep.subr.bf16.mxu1 %v10251_v34 }
 0x4c2   : > { %9973 = vmatpush3.bf16.msra.mxu0 %v10252_v35 }
 0x4c3   : > { %9995 = vmatpush3.bf16.msra.mxu1 %v10253_v36  ;;  %9974 = vmatprep.subr.bf16.mxu0 %v10254_v29 }
 0x4c4   : > { %9996 = vmatprep.subr.bf16.mxu1 %v10255_v38 }
 0x4c6   : > { %9975 = vmatpush3.bf16.msra.mxu0 %v10256_v20 }
 0x4c7   : > { %9997 = vmatpush3.bf16.msra.mxu1 %v10257_v22  ;;  %9976 = vmatprep.subr.bf16.mxu0 %v10258_v39 }
 0x4c8   : > { %9998 = vmatprep.subr.bf16.mxu1 %v10259_v18 }
 0x4ca   : > { %9977 = vmatpush3.bf16.msra.mxu0 %v10260_v41 }
 0x4cb   : > { %9999 = vmatpush3.bf16.msra.mxu1 %v10261_v42  ;;  %9978 = vmatprep.subr.bf16.mxu0 %v10262_v44 }
 0x4cc   : > { %10000 = vmatprep.subr.bf16.mxu1 %v10263_v45 }
 0x4ce   : > { %9979 = vmatpush3.bf16.msra.mxu0 %v10264_v46 }
 0x4cf   : > { %10001 = vmatpush3.bf16.msra.mxu1 %v10265_v47  ;;  %v9911_v47 = vld [vmem:[#allocation8] ss:$0 sm:$0xff] (!%p12092_p13) }
 0x564   : > { %v7603_v56 = vpop.f32.mrb[4].mxu0  ;;  %v7931_v60 = vpop.f32.mrb[4].mxu1 }
 0x565   : > { %v10012_v57 = vadd.f32 %v7603_v56, %v1369_v23  ;;  %v7605_v61 = vpop.f32.mrb[5].mxu0  ;;  %v10014_v62 = vadd.f32 %v7931_v60, %v1377_v54  ;;  %v7933_v63 = vpop.f32.mrb[5].mxu1 }
 0x566   : > { %v10013_v8 = vadd.f32 %v7605_v61, %v1373_v55  ;;  %v7607_v0 = vpop.f32.mrb[6].mxu0  ;;  %v10015_v3 = vadd.f32 %v7933_v63, %v1381_v51  ;;  %v7935_v4 = vpop.f32.mrb[6].mxu1 }
 0x567   : > { %v9842_v2 = vmul.f32 -1.442695, %v10012_v57  ;;  %v7608_v43 = vpop.f32.mrb[7].mxu0  ;;  %v9844_v31 = vmul.f32 -1.442695, %v10014_v62  ;;  %v7936_v10 = vpop.f32.mrb[7].mxu1 }
 0x568   : > { %v9843_v6 = vmul.f32 -1.442695, %v10013_v8  ;;  %v9845_v11 = vmul.f32 -1.442695, %v10015_v3 }
 0x569   : > { %10282 = vpow2.f32 %v9842_v2 }
 0x56a   : > { %10284 = vpow2.f32 %v9844_v31 }
 0x56b   : > { %10286 = vpow2.f32 %v9843_v6 }
 0x56c   : > { %10288 = vpow2.f32 %v9845_v11 }
 0x573   : > { %v10283_v5 = vpop.eup %10282 }
 0x574   : > { %v10285_v12 = vpop.eup %10284  ;;  %v7966_v13 = vadd.f32 1.0, %v10283_v5 }
 0x575   : > { %v10287_v14 = vpop.eup %10286  ;;  %v7968_v27 = vadd.f32 1.0, %v10285_v12 }
 0x576   : > { %v10289_v15 = vpop.eup %10288  ;;  %10290 = vrcp.f32 %v7966_v13  ;;  %v7967_v1 = vadd.f32 1.0, %v10287_v14 }
 0x577   : > { %10292 = vrcp.f32 %v7968_v27  ;;  %v7969_v17 = vadd.f32 1.0, %v10289_v15 }
 0x578   : > { %10294 = vrcp.f32 %v7967_v1 }
 0x579   : > { %10296 = vrcp.f32 %v7969_v17 }
 0x580   : > { %v10291_v53 = vpop.eup %10290 }
 0x581   : > { %v10293_v16 = vpop.eup %10292  ;;  %v7990_v26 = vpack.c.bf16 %v10291_v53, %v10291_v53 }
 0x582   : > { %v10295_v21 = vpop.eup %10294  ;;  %v7992_v59 = vpack.c.bf16 %v10293_v16, %v10293_v16 }
 0x583   : > { %v10297_v9 = vpop.eup %10296  ;;  %v7991_v40 = vpack.c.bf16 %v10295_v21, %v10295_v21 }
 0x584   : > { %v9936_v37 = vpop.f32.mrb[8].mxu0  ;;  %v7993_v25 = vpack.c.bf16 %v10297_v9, %v10297_v9 }
 0x585   : > { %v9958_v19 = vpop.f32.mrb[8].mxu1  ;;  %8618 = vmatprep.mubr.bf16.mxu0 %v7991_v40  ;;  %v9937_v30 = vpop.f32.mrb[9].mxu0 }
 0x586   : > { %8658 = vmatprep.mubr.bf16.mxu1 %v7993_v25  ;;  %v9938_v24 = vadd.f32 %v9937_v30, %v9936_v37  ;;  %v9959_v32 = vpop.f32.mrb[9].mxu1  ;;  %8619 = vmatmul.mubr.bf16.vlgmr.msra.gmra.mrb[12].mxu0 %v7990_v26  ;;  %v9939_v7 = vpop.f32.mrb[10].mxu0 }
 0x587   : > { %v9960_v28 = vadd.f32 %v9959_v32, %v9958_v19  ;;  %8659 = vmatmul.mubr.bf16.vlgmr.msra.gmra.mrb[12].mxu1 %v7992_v59  ;;  %v9961_v48 = vpop.f32.mrb[10].mxu1  ;;  %v9940_v33 = vpop.f32.mrb[11].mxu0 }
 0x588   : > { %v9962_v34 = vpop.f32.mrb[11].mxu1 }
 0x589   : > { %v8581_v35 = vadd.f32 %v9960_v28, %v9938_v24 }
 0x659   : > { %v9980_v36 = vpop.f32.mrb[12].mxu0  ;;  %8669 = sbr.rel (%p12092_p13) target bundleno = 1636 (0x664), region = 60 }
 0x65a   : > { %v10002_v29 = vpop.f32.mrb[12].mxu1  ;;  %v9981_v38 = vpop.f32.mrb[13].mxu0 }
 0x65b   : > { %v9982_v20 = vadd.f32 %v9981_v38, %v9980_v36  ;;  %v10003_v22 = vpop.f32.mrb[13].mxu1  ;;  %v9983_v39 = vpop.f32.mrb[14].mxu0 }
 0x65c   : > { %v10004_v18 = vadd.f32 %v10003_v22, %v10002_v29  ;;  %v10005_v41 = vpop.f32.mrb[14].mxu1  ;;  %v9984_v42 = vpop.f32.mrb[15].mxu0 }
 0x65d   : > { %v8621_v44 = vadd.f32 %v9982_v20, %v8581_v35  ;;  %v10006_v45 = vpop.f32.mrb[15].mxu1 }
 0x65f   : > { %v8661_v46 = vadd.f32 %v10004_v18, %v8621_v44 }
 0x661   : > { %v8677_v50 = vadd.f32 %v9911_v47, %v8661_v46 }
 0x663   : > { %8678 = vst [vmem:[#allocation10] sm:$0x3] %v8677_v50 }
 0x664 PF: > { %p12093_p0 = scmp.eq.s32.totalorder %s10612_s7, 0 }
 0x666   : > { %8682 = sbr.rel (%p12093_p0) target bundleno = 1646 (0x66e), region = 64 }
 0x66a   : > { %v8683_v49 = vld [vmem:[#allocation10] sm:$0x3] (!%p12093_p0) }
 0x66b   : > { %v8684_v52 = vadd.f32 (!%p12093_p0), %v8683_v49, %v8661_v46 }
 0x66d   : > { %8685 = vst [vmem:[#allocation10] sm:$0x3] %v8684_v52 }
 0x66e PF: > { %p10159_p4 = scmp.eq.s32.totalorder %s10612_s7, 1  ;;  %s10499_s2 = smov [#allocation10]  }
 0x66f   : > { %s8693_s26 = sshll.u32 %s10499_s2, 4  ;;  %s8694_s26 = int_to_ptr.vmem [resolvable:$true] %s8693_s26 }
 0x670   : > { %s10416_s11 = scalar_lea.vmem %s8694_s26, 32  ;;  %p10423_p7 = scmp.lt.s32.totalorder %s8694_s26, %s8694_s26 }
 0x671   : > { %p10417_p2 = scmp.ne.s32.totalorder %s8694_s26, %s10416_s11  ;;  %p10424_p12 = scmp.lt.s32.totalorder %s10416_s11, %s10416_s11 }
 0x673   : > { %p10418_p10 = pnand %p10417_p2, %p10159_p4  ;;  %p10425_p11 = por %p10424_p12, %p10423_p7 }
 0x675   : > { %p10419_p5 = pneg %p10418_p10 }
 0x677   : > { %p10426_p9 = pnand %p10425_p11, %p10419_p5 }
 0x679   : > { %10429 = shalt.err (!%p10426_p9)
}
 0x67a   : > { %s10430_s8 = scalar_lea.hbm %s12070_s5, 32 }
 0x67b   : > { %p10431_p8 = scmp.ne.s32.totalorder %s12070_s5, %s10430_s8  ;;  %p10436_p6 = scmp.lt.u32.totalorder %s10430_s8, %s12070_s5 }
 0x67d   : > { %p10432_p3 = pnand %p10431_p8, %p10159_p4 }
 0x67f   : > { %p10433_p1 = pneg %p10432_p3 }
 0x681   : > { %p10438_p13 = pnand %p10436_p6, %p10433_p1 }
 0x683   : > { %10441 = shalt.err (!%p10438_p13)
}
 0x684   : > { %10139 = dma.vmem_to_hbm [thread:$0]  (%p10159_p4), %s8694_s26, 32, %s12070_s5, [#allocation4]  }
 0x685   : > { %10471 = dma.done.wait (%p10159_p4), [#allocation4], 32  }
 0x686   : > { %10473 = vsyncadd (%p10159_p4), [#allocation4], 4294967264 }
 0x687 PF: > { %p20_p0 = scmp.ge.s32.totalorder %s10551_s22, 4   ;;  %s12094_s18 = smov %s10480_s19 }
 0x688   : > { %s12095_s19 = smov %s10484_s20  ;;  %s12096_s20 = smov %s10561_s25 }
 0x689   : > { %s12097_s21 = smov %s10551_s22  ;;  %22 = sbr.rel (!%p20_p0) target bundleno = 9 (0x9), region = 113 }
 0x690   :  { %8706 = vsyncpa [#allocation3], 1 }
 0x691   :  { %8708 = vsyncpa [#allocation3 + $0x1], 1 }
 0x692   :  { %8709 = vsyncpa [#allocation6], 1 }
 0x693   :  { %8711 = vsyncpa [#allocation6 + $0x1], 1 }
 0x694   :  { %8712 = vsyncpa [#allocation9], 1 }
 0x695   :  { %8713 = vsyncpa [#allocation4], 1 }
 0x696   :  { %8715 = vsyncpa [#allocation4 + $0x1], 1 }

</bundles_post_ra>
